<compile_context>
chip_gen: v7x
topology: tpu7x:2x2x1
jax: 0.10.0
libtpu: 0.0.40
codegen_flags: <defaults>
</compile_context>

<pallas_src>
import functools

import jax
import jax.numpy as jnp
from jax.experimental import pallas as pl
from jax.experimental.pallas import tpu as pltpu

BN_EPS = 1e-5
LANE = 128          # pad feature dims to multiples of this (lane-dense vregs)
SUBLANE_BF16 = 16   # bf16 sublane packing: pad the batch dim to multiples of this
OUT_TILE = 128      # layer-5 output-column tile (grid axis)


def _round_up(n, m):
    return (n + m - 1) // m * m


def _bn_relu_block(x_bf16, w_ref, g_ref, beta_ref, valid, inv_n):
    """Bias-free Linear -> BatchNorm1d (training stats, single pass) -> ReLU.

    Padded batch rows of y are exactly zero (zero input rows, no bias), so the sums need no mask;
    only the post-ReLU activation is re-zeroed on padded rows (at most one mask multiply).
    """
    y = jnp.dot(x_bf16, w_ref[...], preferred_element_type=jnp.float32)
    s1 = jnp.sum(y, axis=0, keepdims=True)
    s2 = jnp.sum(y * y, axis=0, keepdims=True)
    mean = s1 * inv_n
    var = jnp.maximum(s2 * inv_n - mean * mean, 0.0)   # clamp: guard one-pass cancellation
    scale = g_ref[...] * jax.lax.rsqrt(var + BN_EPS)
    shift = beta_ref[...] - mean * scale
    h = jnp.maximum(y * scale + shift, 0.0)
    if valid is not None:
        h = h * valid          # preserve the zero-row invariant for the next layer's stats
    return h.astype(jnp.bfloat16)


def _generator_kernel(n_valid, x_ref,
                      w1, g1, be1,
                      w2, g2, be2,
                      w3, g3, be3,
                      w4, g4, be4,
                      w5, b5,
                      out_ref, h_ref):
    j = pl.program_id(0)

    # Layers 1-4 couple the whole batch through BatchNorm, so they run once (first column tile)
    # and persist in the h VMEM scratch; later grid steps only run the layer-5 tail on their tile.
    @pl.when(j == 0)
    def _():
        batch_pad = x_ref.shape[0]
        inv_n = jnp.float32(1.0 / n_valid)
        if n_valid == batch_pad:
            valid = None
        else:
            rows = jax.lax.broadcasted_iota(jnp.int32, (batch_pad, 1), 0)
            valid = (rows < n_valid).astype(jnp.float32)
        h = _bn_relu_block(x_ref[...], w1, g1, be1, valid, inv_n)
        h = _bn_relu_block(h, w2, g2, be2, valid, inv_n)
        h = _bn_relu_block(h, w3, g3, be3, valid, inv_n)
        h = _bn_relu_block(h, w4, g4, be4, valid, inv_n)
        h_ref[...] = h

    # Layer 5 tile: Linear + Sigmoid for this block of output columns.
    logits = jnp.dot(h_ref[...], w5[...], preferred_element_type=jnp.float32) + b5[...]
    # Only the negative side threatens exp(-logits); no upper clamp needed.
    logits = jnp.maximum(logits, -30.0)
    # exp + approximate reciprocal both run on the EUP -> nearly free epilogue.
    out_ref[...] = pl.reciprocal(1.0 + jnp.exp(-logits), approx=True).astype(out_ref.dtype)


def init_generator_params(key, z_dim, im_dim, hidden_dim, dtype=jnp.float32):
    """Deterministic synthetic parameters (shapes match the PyTorch module, weights transposed)."""
    dims = [z_dim, hidden_dim, hidden_dim * 2, hidden_dim * 4, hidden_dim * 8, im_dim]
    params = []
    for i in range(5):
        fan_in, fan_out = dims[i], dims[i + 1]
        key, kw, kb = jax.random.split(key, 3)
        bound = 1.0 / float(fan_in) ** 0.5
        w = jax.random.uniform(kw, (fan_in, fan_out), dtype, -bound, bound)
        b = jax.random.uniform(kb, (1, fan_out), dtype, -bound, bound)
        if i < 4:  # BN affine params (PyTorch init: gamma=1, beta=0)
            params.extend([w, b, jnp.ones((1, fan_out), dtype), jnp.zeros((1, fan_out), dtype)])
        else:
            params.extend([w, b])
    return params


def pad_and_cast_params(params):
    """Kernel-side params: zero-pad feature dims to multiples of 128, cast weights to bf16.

    The Linear biases of layers 1-4 are intentionally dropped: training-mode BN's mean subtraction
    cancels them exactly, so they are dead work in the kernel.
    """
    out, idx = [], 0
    for layer in range(5):
        if layer < 4:
            w, _b, g, be = params[idx:idx + 4]
            idx += 4
        else:
            w, b = params[idx:idx + 2]
            idx += 2
        fi, fo = w.shape
        fi_p, fo_p = _round_up(fi, LANE), _round_up(fo, LANE)
        w_p = jnp.zeros((fi_p, fo_p), jnp.float32).at[:fi, :fo].set(w).astype(jnp.bfloat16)
        if layer < 4:
            g_p = jnp.zeros((1, fo_p), jnp.float32).at[:, :fo].set(g)
            be_p = jnp.zeros((1, fo_p), jnp.float32).at[:, :fo].set(be)
            out.extend([w_p, g_p, be_p])
        else:
            b_p = jnp.zeros((1, fo_p), jnp.float32).at[:, :fo].set(b)
            out.extend([w_p, b_p])
    return out


def generator_forward(noise, kparams, im_dim):
    """Full generator forward pass in one pallas_call; layer-5 columns tiled over a 1-D grid."""
    batch, zd = noise.shape
    batch_pad = _round_up(batch, SUBLANE_BF16)
    z_pad = kparams[0].shape[0]          # padded z_dim
    h8_pad = kparams[-2].shape[0]        # padded 8*hidden
    im_pad = kparams[-2].shape[1]        # padded im_dim (multiple of 128)
    n_tiles = im_pad // OUT_TILE

    # Pre-pad + pre-cast the noise to the MXU dtype on the host (halves the input DMA,
    # avoids an in-kernel f32->bf16 relayout).
    x = jnp.zeros((batch_pad, z_pad), jnp.bfloat16).at[:batch, :zd].set(noise.astype(jnp.bfloat16))

    resident = kparams[:-2]              # w1,g1,be1, ..., w4,g4,be4 (stay fixed across the grid)
    w5, b5 = kparams[-2], kparams[-1]

    resident_specs = [pl.BlockSpec(x.shape, lambda j: (0, 0))] + \
                     [pl.BlockSpec(p.shape, lambda j: (0, 0)) for p in resident]
    w5_spec = pl.BlockSpec((h8_pad, OUT_TILE), lambda j: (0, j))
    b5_spec = pl.BlockSpec((1, OUT_TILE), lambda j: (0, j))
    out_spec = pl.BlockSpec((batch_pad, OUT_TILE), lambda j: (0, j))

    # Tight, footprint-derived VMEM limit (headroom preserved on v7x's 64 MiB / core).
    resident_bytes = x.size * x.dtype.itemsize + sum(p.size * p.dtype.itemsize for p in resident)
    tile_bytes = h8_pad * OUT_TILE * 2 + OUT_TILE * 4 + batch_pad * OUT_TILE * 4
    scratch_bytes = batch_pad * h8_pad * 2
    act_bytes = 4 * batch_pad * h8_pad * 4            # live f32 temporaries inside layers 1-4
    need = 2 * resident_bytes + 2 * tile_bytes + scratch_bytes + act_bytes
    vmem_limit = int(min(max(need + (4 << 20), 16 << 20), 32 << 20))

    out = pl.pallas_call(
        functools.partial(_generator_kernel, batch),
        out_shape=jax.ShapeDtypeStruct((batch_pad, im_pad), jnp.float32),
        grid=(n_tiles,),
        in_specs=resident_specs + [w5_spec, b5_spec],
        out_specs=out_spec,
        scratch_shapes=[pltpu.VMEM((batch_pad, h8_pad), jnp.bfloat16)],
        compiler_params=pltpu.CompilerParams(
            # Sequential: later column tiles reuse the h scratch written at j == 0.
            dimension_semantics=("arbitrary",),
            vmem_limit_bytes=vmem_limit,
        ),
    )(x, *resident, w5, b5)
    return out[:batch, :im_dim]


def generator_reference(noise, params):
    """Pure-JAX reference with the faithful PyTorch semantics (biases kept; bf16 matmuls)."""
    x = noise.astype(jnp.float32)
    for i in range(4):
        w, b, g, beta = params[4 * i: 4 * i + 4]
        y = jnp.dot(x.astype(jnp.bfloat16), w.astype(jnp.bfloat16),
                    preferred_element_type=jnp.float32) + b
        mean = jnp.mean(y, axis=0, keepdims=True)
        var = jnp.mean((y - mean) ** 2, axis=0, keepdims=True)
        x = jnp.maximum((y - mean) * (g * jax.lax.rsqrt(var + BN_EPS)) + beta, 0.0)
    w5, b5 = params[16], params[17]
    logits = jnp.dot(x.astype(jnp.bfloat16), w5.astype(jnp.bfloat16),
                     preferred_element_type=jnp.float32) + b5
    return jax.nn.sigmoid(logits)


if __name__ == "__main__":
    # Module-default feature sizes (z=64 -> 128 -> 256 -> 512 -> 1024 -> 784), small batch.
    batch, z_dim, hidden_dim, im_dim = 64, 64, 128, 784

    key = jax.random.PRNGKey(0)
    key, knoise = jax.random.split(key)
    noise = jax.random.normal(knoise, (batch, z_dim), jnp.float32)
    params = init_generator_params(key, z_dim, im_dim, hidden_dim)
    kparams = pad_and_cast_params(params)

    out = jax.block_until_ready(generator_forward(noise, kparams, im_dim))

    ref = generator_reference(noise, params)
    assert out.shape == (batch, im_dim)
    # bf16 matmuls, one-pass variance and approx reciprocal: compare against the matching bf16
    # reference with a loose absolute tolerance on the [0,1] sigmoid outputs.
    assert jnp.allclose(out, ref, atol=1e-2, rtol=0.0), "mismatch vs reference"

    print("KERNEL_OK")
</pallas_src>

<mosaic_0001>
module attributes {stable_mosaic.version = 11 : i64} {
  func.func @_generator_kernel(%arg0: i32, %arg1: memref<64x128xbf16, #tpu.memory_space<vmem>>, %arg2: memref<128x128xbf16, #tpu.memory_space<vmem>>, %arg3: memref<1x128xf32, #tpu.memory_space<vmem>>, %arg4: memref<1x128xf32, #tpu.memory_space<vmem>>, %arg5: memref<128x256xbf16, #tpu.memory_space<vmem>>, %arg6: memref<1x256xf32, #tpu.memory_space<vmem>>, %arg7: memref<1x256xf32, #tpu.memory_space<vmem>>, %arg8: memref<256x512xbf16, #tpu.memory_space<vmem>>, %arg9: memref<1x512xf32, #tpu.memory_space<vmem>>, %arg10: memref<1x512xf32, #tpu.memory_space<vmem>>, %arg11: memref<512x1024xbf16, #tpu.memory_space<vmem>>, %arg12: memref<1x1024xf32, #tpu.memory_space<vmem>>, %arg13: memref<1x1024xf32, #tpu.memory_space<vmem>>, %arg14: memref<1024x128xbf16, #tpu.memory_space<vmem>>, %arg15: memref<1x128xf32, #tpu.memory_space<vmem>>, %arg16: memref<64x128xf32, #tpu.memory_space<vmem>>, %arg17: memref<64x1024xbf16, #tpu.memory_space<vmem>>) attributes {dimension_semantics = [#tpu.dimension_semantics<arbitrary>], iteration_bounds = array<i64: 7>, scalar_prefetch = 0 : i64, scratch_operands = 1 : i64, tpu.core_type = #tpu.core_type<tc>, window_params = [{pipeline_mode = #tpu.pipeline_mode<synchronous>, transform_indices = @transform_0, window_bounds = array<i64: 64, 128>}, {pipeline_mode = #tpu.pipeline_mode<synchronous>, transform_indices = @transform_1, window_bounds = array<i64: 128, 128>}, {pipeline_mode = #tpu.pipeline_mode<synchronous>, transform_indices = @transform_2, window_bounds = array<i64: 1, 128>}, {pipeline_mode = #tpu.pipeline_mode<synchronous>, transform_indices = @transform_3, window_bounds = array<i64: 1, 128>}, {pipeline_mode = #tpu.pipeline_mode<synchronous>, transform_indices = @transform_4, window_bounds = array<i64: 128, 256>}, {pipeline_mode = #tpu.pipeline_mode<synchronous>, transform_indices = @transform_5, window_bounds = array<i64: 1, 256>}, {pipeline_mode = #tpu.pipeline_mode<synchronous>, transform_indices = @transform_6, window_bounds = array<i64: 1, 256>}, {pipeline_mode = #tpu.pipeline_mode<synchronous>, transform_indices = @transform_7, window_bounds = array<i64: 256, 512>}, {pipeline_mode = #tpu.pipeline_mode<synchronous>, transform_indices = @transform_8, window_bounds = array<i64: 1, 512>}, {pipeline_mode = #tpu.pipeline_mode<synchronous>, transform_indices = @transform_9, window_bounds = array<i64: 1, 512>}, {pipeline_mode = #tpu.pipeline_mode<synchronous>, transform_indices = @transform_10, window_bounds = array<i64: 512, 1024>}, {pipeline_mode = #tpu.pipeline_mode<synchronous>, transform_indices = @transform_11, window_bounds = array<i64: 1, 1024>}, {pipeline_mode = #tpu.pipeline_mode<synchronous>, transform_indices = @transform_12, window_bounds = array<i64: 1, 1024>}, {transform_indices = @transform_13, window_bounds = array<i64: 1024, 128>}, {transform_indices = @transform_14, window_bounds = array<i64: 1, 128>}, {transform_indices = @transform_15, window_bounds = array<i64: 64, 128>}]} {
    %c0_i32 = arith.constant 0 : i32
    %0 = arith.cmpi eq, %arg0, %c0_i32 : i32
    %1 = arith.extui %0 : i1 to i32
    %c0_i32_0 = arith.constant 0 : i32
    %2 = arith.cmpi ne, %1, %c0_i32_0 : i32
    scf.if %2 {
      %c0_11 = arith.constant 0 : index
      %c0_12 = arith.constant 0 : index
      %18 = vector.load %arg1[%c0_11, %c0_12] : memref<64x128xbf16, #tpu.memory_space<vmem>>, vector<64x128xbf16>
      %c0_13 = arith.constant 0 : index
      %c0_14 = arith.constant 0 : index
      %19 = vector.load %arg2[%c0_13, %c0_14] : memref<128x128xbf16, #tpu.memory_space<vmem>>, vector<128x128xbf16>
      %cst_15 = arith.constant dense<0.000000e+00> : vector<64x128xf32>
      %20 = tpu.matmul %18, %19, %cst_15 {dimension_numbers = #tpu.dot_dimension_numbers<[1], [0], [0], [1], [0, 0, 1, 1], [], []>} : vector<64x128xbf16>, vector<128x128xbf16>, vector<64x128xf32> -> vector<64x128xf32>
      %cst_16 = arith.constant dense<0.000000e+00> : vector<128xf32>
      %21 = vector.multi_reduction <add>, %20, %cst_16 [0] : vector<64x128xf32> to vector<128xf32>
      %22 = vector.shape_cast %21 : vector<128xf32> to vector<1x128xf32>
      %23 = arith.mulf %20, %20 : vector<64x128xf32>
      %cst_17 = arith.constant dense<0.000000e+00> : vector<128xf32>
      %24 = vector.multi_reduction <add>, %23, %cst_17 [0] : vector<64x128xf32> to vector<128xf32>
      %25 = vector.shape_cast %24 : vector<128xf32> to vector<1x128xf32>
      %cst_18 = arith.constant 1.562500e-02 : f32
      %26 = vector.broadcast %cst_18 : f32 to vector<1x128xf32>
      %27 = arith.mulf %22, %26 : vector<1x128xf32>
      %cst_19 = arith.constant 1.562500e-02 : f32
      %28 = vector.broadcast %cst_19 : f32 to vector<1x128xf32>
      %29 = arith.mulf %25, %28 : vector<1x128xf32>
      %30 = arith.mulf %27, %27 : vector<1x128xf32>
      %31 = arith.subf %29, %30 : vector<1x128xf32>
      %cst_20 = arith.constant 0.000000e+00 : f32
      %32 = vector.broadcast %cst_20 : f32 to vector<1x128xf32>
      %33 = arith.maximumf %31, %32 : vector<1x128xf32>
      %c0_21 = arith.constant 0 : index
      %c0_22 = arith.constant 0 : index
      %34 = vector.load %arg3[%c0_21, %c0_22] : memref<1x128xf32, #tpu.memory_space<vmem>>, vector<1x128xf32>
      %cst_23 = arith.constant 9.99999974E-6 : f32
      %35 = vector.broadcast %cst_23 : f32 to vector<1x128xf32>
      %36 = arith.addf %33, %35 : vector<1x128xf32>
      %37 = math.rsqrt %36 : vector<1x128xf32>
      %38 = arith.mulf %34, %37 : vector<1x128xf32>
      %c0_24 = arith.constant 0 : index
      %c0_25 = arith.constant 0 : index
      %39 = vector.load %arg4[%c0_24, %c0_25] : memref<1x128xf32, #tpu.memory_space<vmem>>, vector<1x128xf32>
      %40 = arith.mulf %27, %38 : vector<1x128xf32>
      %41 = arith.subf %39, %40 : vector<1x128xf32>
      %42 = vector.broadcast %38 : vector<1x128xf32> to vector<64x128xf32>
      %43 = arith.mulf %20, %42 : vector<64x128xf32>
      %44 = vector.broadcast %41 : vector<1x128xf32> to vector<64x128xf32>
      %45 = arith.addf %43, %44 : vector<64x128xf32>
      %cst_26 = arith.constant 0.000000e+00 : f32
      %46 = vector.broadcast %cst_26 : f32 to vector<64x128xf32>
      %47 = arith.maximumf %45, %46 : vector<64x128xf32>
      %48 = arith.truncf %47 : vector<64x128xf32> to vector<64x128xbf16>
      %c0_27 = arith.constant 0 : index
      %c0_28 = arith.constant 0 : index
      %49 = vector.load %arg5[%c0_27, %c0_28] : memref<128x256xbf16, #tpu.memory_space<vmem>>, vector<128x256xbf16>
      %cst_29 = arith.constant dense<0.000000e+00> : vector<64x256xf32>
      %50 = tpu.matmul %48, %49, %cst_29 {dimension_numbers = #tpu.dot_dimension_numbers<[1], [0], [0], [1], [0, 0, 1, 1], [], []>} : vector<64x128xbf16>, vector<128x256xbf16>, vector<64x256xf32> -> vector<64x256xf32>
      %cst_30 = arith.constant dense<0.000000e+00> : vector<256xf32>
      %51 = vector.multi_reduction <add>, %50, %cst_30 [0] : vector<64x256xf32> to vector<256xf32>
      %52 = vector.shape_cast %51 : vector<256xf32> to vector<1x256xf32>
      %53 = arith.mulf %50, %50 : vector<64x256xf32>
      %cst_31 = arith.constant dense<0.000000e+00> : vector<256xf32>
      %54 = vector.multi_reduction <add>, %53, %cst_31 [0] : vector<64x256xf32> to vector<256xf32>
      %55 = vector.shape_cast %54 : vector<256xf32> to vector<1x256xf32>
      %cst_32 = arith.constant 1.562500e-02 : f32
      %56 = vector.broadcast %cst_32 : f32 to vector<1x256xf32>
      %57 = arith.mulf %52, %56 : vector<1x256xf32>
      %cst_33 = arith.constant 1.562500e-02 : f32
      %58 = vector.broadcast %cst_33 : f32 to vector<1x256xf32>
      %59 = arith.mulf %55, %58 : vector<1x256xf32>
      %60 = arith.mulf %57, %57 : vector<1x256xf32>
      %61 = arith.subf %59, %60 : vector<1x256xf32>
      %cst_34 = arith.constant 0.000000e+00 : f32
      %62 = vector.broadcast %cst_34 : f32 to vector<1x256xf32>
      %63 = arith.maximumf %61, %62 : vector<1x256xf32>
      %c0_35 = arith.constant 0 : index
      %c0_36 = arith.constant 0 : index
      %64 = vector.load %arg6[%c0_35, %c0_36] : memref<1x256xf32, #tpu.memory_space<vmem>>, vector<1x256xf32>
      %cst_37 = arith.constant 9.99999974E-6 : f32
      %65 = vector.broadcast %cst_37 : f32 to vector<1x256xf32>
      %66 = arith.addf %63, %65 : vector<1x256xf32>
      %67 = math.rsqrt %66 : vector<1x256xf32>
      %68 = arith.mulf %64, %67 : vector<1x256xf32>
      %c0_38 = arith.constant 0 : index
      %c0_39 = arith.constant 0 : index
      %69 = vector.load %arg7[%c0_38, %c0_39] : memref<1x256xf32, #tpu.memory_space<vmem>>, vector<1x256xf32>
      %70 = arith.mulf %57, %68 : vector<1x256xf32>
      %71 = arith.subf %69, %70 : vector<1x256xf32>
      %72 = vector.broadcast %68 : vector<1x256xf32> to vector<64x256xf32>
      %73 = arith.mulf %50, %72 : vector<64x256xf32>
      %74 = vector.broadcast %71 : vector<1x256xf32> to vector<64x256xf32>
      %75 = arith.addf %73, %74 : vector<64x256xf32>
      %cst_40 = arith.constant 0.000000e+00 : f32
      %76 = vector.broadcast %cst_40 : f32 to vector<64x256xf32>
      %77 = arith.maximumf %75, %76 : vector<64x256xf32>
      %78 = arith.truncf %77 : vector<64x256xf32> to vector<64x256xbf16>
      %c0_41 = arith.constant 0 : index
      %c0_42 = arith.constant 0 : index
      %79 = vector.load %arg8[%c0_41, %c0_42] : memref<256x512xbf16, #tpu.memory_space<vmem>>, vector<256x512xbf16>
      %cst_43 = arith.constant dense<0.000000e+00> : vector<64x512xf32>
      %80 = tpu.matmul %78, %79, %cst_43 {dimension_numbers = #tpu.dot_dimension_numbers<[1], [0], [0], [1], [0, 0, 1, 1], [], []>} : vector<64x256xbf16>, vector<256x512xbf16>, vector<64x512xf32> -> vector<64x512xf32>
      %cst_44 = arith.constant dense<0.000000e+00> : vector<512xf32>
      %81 = vector.multi_reduction <add>, %80, %cst_44 [0] : vector<64x512xf32> to vector<512xf32>
      %82 = vector.shape_cast %81 : vector<512xf32> to vector<1x512xf32>
      %83 = arith.mulf %80, %80 : vector<64x512xf32>
      %cst_45 = arith.constant dense<0.000000e+00> : vector<512xf32>
      %84 = vector.multi_reduction <add>, %83, %cst_45 [0] : vector<64x512xf32> to vector<512xf32>
      %85 = vector.shape_cast %84 : vector<512xf32> to vector<1x512xf32>
      %cst_46 = arith.constant 1.562500e-02 : f32
      %86 = vector.broadcast %cst_46 : f32 to vector<1x512xf32>
      %87 = arith.mulf %82, %86 : vector<1x512xf32>
      %cst_47 = arith.constant 1.562500e-02 : f32
      %88 = vector.broadcast %cst_47 : f32 to vector<1x512xf32>
      %89 = arith.mulf %85, %88 : vector<1x512xf32>
      %90 = arith.mulf %87, %87 : vector<1x512xf32>
      %91 = arith.subf %89, %90 : vector<1x512xf32>
      %cst_48 = arith.constant 0.000000e+00 : f32
      %92 = vector.broadcast %cst_48 : f32 to vector<1x512xf32>
      %93 = arith.maximumf %91, %92 : vector<1x512xf32>
      %c0_49 = arith.constant 0 : index
      %c0_50 = arith.constant 0 : index
      %94 = vector.load %arg9[%c0_49, %c0_50] : memref<1x512xf32, #tpu.memory_space<vmem>>, vector<1x512xf32>
      %cst_51 = arith.constant 9.99999974E-6 : f32
      %95 = vector.broadcast %cst_51 : f32 to vector<1x512xf32>
      %96 = arith.addf %93, %95 : vector<1x512xf32>
      %97 = math.rsqrt %96 : vector<1x512xf32>
      %98 = arith.mulf %94, %97 : vector<1x512xf32>
      %c0_52 = arith.constant 0 : index
      %c0_53 = arith.constant 0 : index
      %99 = vector.load %arg10[%c0_52, %c0_53] : memref<1x512xf32, #tpu.memory_space<vmem>>, vector<1x512xf32>
      %100 = arith.mulf %87, %98 : vector<1x512xf32>
      %101 = arith.subf %99, %100 : vector<1x512xf32>
      %102 = vector.broadcast %98 : vector<1x512xf32> to vector<64x512xf32>
      %103 = arith.mulf %80, %102 : vector<64x512xf32>
      %104 = vector.broadcast %101 : vector<1x512xf32> to vector<64x512xf32>
      %105 = arith.addf %103, %104 : vector<64x512xf32>
      %cst_54 = arith.constant 0.000000e+00 : f32
      %106 = vector.broadcast %cst_54 : f32 to vector<64x512xf32>
      %107 = arith.maximumf %105, %106 : vector<64x512xf32>
      %108 = arith.truncf %107 : vector<64x512xf32> to vector<64x512xbf16>
      %c0_55 = arith.constant 0 : index
      %c0_56 = arith.constant 0 : index
      %109 = vector.load %arg11[%c0_55, %c0_56] : memref<512x1024xbf16, #tpu.memory_space<vmem>>, vector<512x1024xbf16>
      %cst_57 = arith.constant dense<0.000000e+00> : vector<64x1024xf32>
      %110 = tpu.matmul %108, %109, %cst_57 {dimension_numbers = #tpu.dot_dimension_numbers<[1], [0], [0], [1], [0, 0, 1, 1], [], []>} : vector<64x512xbf16>, vector<512x1024xbf16>, vector<64x1024xf32> -> vector<64x1024xf32>
      %cst_58 = arith.constant dense<0.000000e+00> : vector<1024xf32>
      %111 = vector.multi_reduction <add>, %110, %cst_58 [0] : vector<64x1024xf32> to vector<1024xf32>
      %112 = vector.shape_cast %111 : vector<1024xf32> to vector<1x1024xf32>
      %113 = arith.mulf %110, %110 : vector<64x1024xf32>
      %cst_59 = arith.constant dense<0.000000e+00> : vector<1024xf32>
      %114 = vector.multi_reduction <add>, %113, %cst_59 [0] : vector<64x1024xf32> to vector<1024xf32>
      %115 = vector.shape_cast %114 : vector<1024xf32> to vector<1x1024xf32>
      %cst_60 = arith.constant 1.562500e-02 : f32
      %116 = vector.broadcast %cst_60 : f32 to vector<1x1024xf32>
      %117 = arith.mulf %112, %116 : vector<1x1024xf32>
      %cst_61 = arith.constant 1.562500e-02 : f32
      %118 = vector.broadcast %cst_61 : f32 to vector<1x1024xf32>
      %119 = arith.mulf %115, %118 : vector<1x1024xf32>
      %120 = arith.mulf %117, %117 : vector<1x1024xf32>
      %121 = arith.subf %119, %120 : vector<1x1024xf32>
      %cst_62 = arith.constant 0.000000e+00 : f32
      %122 = vector.broadcast %cst_62 : f32 to vector<1x1024xf32>
      %123 = arith.maximumf %121, %122 : vector<1x1024xf32>
      %c0_63 = arith.constant 0 : index
      %c0_64 = arith.constant 0 : index
      %124 = vector.load %arg12[%c0_63, %c0_64] : memref<1x1024xf32, #tpu.memory_space<vmem>>, vector<1x1024xf32>
      %cst_65 = arith.constant 9.99999974E-6 : f32
      %125 = vector.broadcast %cst_65 : f32 to vector<1x1024xf32>
      %126 = arith.addf %123, %125 : vector<1x1024xf32>
      %127 = math.rsqrt %126 : vector<1x1024xf32>
      %128 = arith.mulf %124, %127 : vector<1x1024xf32>
      %c0_66 = arith.constant 0 : index
      %c0_67 = arith.constant 0 : index
      %129 = vector.load %arg13[%c0_66, %c0_67] : memref<1x1024xf32, #tpu.memory_space<vmem>>, vector<1x1024xf32>
      %130 = arith.mulf %117, %128 : vector<1x1024xf32>
      %131 = arith.subf %129, %130 : vector<1x1024xf32>
      %132 = vector.broadcast %128 : vector<1x1024xf32> to vector<64x1024xf32>
      %133 = arith.mulf %110, %132 : vector<64x1024xf32>
      %134 = vector.broadcast %131 : vector<1x1024xf32> to vector<64x1024xf32>
      %135 = arith.addf %133, %134 : vector<64x1024xf32>
      %cst_68 = arith.constant 0.000000e+00 : f32
      %136 = vector.broadcast %cst_68 : f32 to vector<64x1024xf32>
      %137 = arith.maximumf %135, %136 : vector<64x1024xf32>
      %138 = arith.truncf %137 : vector<64x1024xf32> to vector<64x1024xbf16>
      %c0_69 = arith.constant 0 : index
      %c0_70 = arith.constant 0 : index
      %139 = vector.load %arg17[%c0_69, %c0_70] : memref<64x1024xbf16, #tpu.memory_space<vmem>>, vector<64x1024xbf16>
      tpu.vector_store %arg17[%c0_69, %c0_70], %138 {strides = array<i32>} : memref<64x1024xbf16, #tpu.memory_space<vmem>>, vector<64x1024xbf16>,
    } else {
    }
    %c0 = arith.constant 0 : index
    %c0_1 = arith.constant 0 : index
    %3 = vector.load %arg17[%c0, %c0_1] : memref<64x1024xbf16, #tpu.memory_space<vmem>>, vector<64x1024xbf16>
    %c0_2 = arith.constant 0 : index
    %c0_3 = arith.constant 0 : index
    %4 = vector.load %arg14[%c0_2, %c0_3] : memref<1024x128xbf16, #tpu.memory_space<vmem>>, vector<1024x128xbf16>
    %cst = arith.constant dense<0.000000e+00> : vector<64x128xf32>
    %5 = tpu.matmul %3, %4, %cst {dimension_numbers = #tpu.dot_dimension_numbers<[1], [0], [0], [1], [0, 0, 1, 1], [], []>} : vector<64x1024xbf16>, vector<1024x128xbf16>, vector<64x128xf32> -> vector<64x128xf32>
    %c0_4 = arith.constant 0 : index
    %c0_5 = arith.constant 0 : index
    %6 = vector.load %arg15[%c0_4, %c0_5] : memref<1x128xf32, #tpu.memory_space<vmem>>, vector<1x128xf32>
    %7 = vector.broadcast %6 : vector<1x128xf32> to vector<64x128xf32>
    %8 = arith.addf %5, %7 : vector<64x128xf32>
    %cst_6 = arith.constant -3.000000e+01 : f32
    %9 = vector.broadcast %cst_6 : f32 to vector<64x128xf32>
    %10 = arith.maximumf %8, %9 : vector<64x128xf32>
    %cst_7 = arith.constant 0.000000e+00 : f32
    %11 = vector.broadcast %cst_7 : f32 to vector<64x128xf32>
    %12 = arith.subf %11, %10 : vector<64x128xf32>
    %13 = math.exp %12 : vector<64x128xf32>
    %cst_8 = arith.constant 1.000000e+00 : f32
    %14 = vector.broadcast %cst_8 : f32 to vector<64x128xf32>
    %15 = arith.addf %14, %13 : vector<64x128xf32>
    %16 = tpu.reciprocal %15 {approx = true} : vector<64x128xf32> -> vector<64x128xf32>
    %c0_9 = arith.constant 0 : index
    %c0_10 = arith.constant 0 : index
    %17 = vector.load %arg16[%c0_9, %c0_10] : memref<64x128xf32, #tpu.memory_space<vmem>>, vector<64x128xf32>
    tpu.vector_store %arg16[%c0_9, %c0_10], %16 {strides = array<i32>} : memref<64x128xf32, #tpu.memory_space<vmem>>, vector<64x128xf32>,
    return
  }
  func.func @transform_0(%arg0: i32) -> (i32, i32) {
    %c0_i32 = arith.constant 0 : i32
    %c0_i32_0 = arith.constant 0 : i32
    %c0_i32_1 = arith.constant 0 : i32
    return %c0_i32, %c0_i32_0 : i32, i32
  }
  func.func @transform_1(%arg0: i32) -> (i32, i32) {
    %c0_i32 = arith.constant 0 : i32
    %c0_i32_0 = arith.constant 0 : i32
    %c0_i32_1 = arith.constant 0 : i32
    return %c0_i32, %c0_i32_0 : i32, i32
  }
  func.func @transform_2(%arg0: i32) -> (i32, i32) {
    %c0_i32 = arith.constant 0 : i32
    %c0_i32_0 = arith.constant 0 : i32
    %c0_i32_1 = arith.constant 0 : i32
    return %c0_i32, %c0_i32_0 : i32, i32
  }
  func.func @transform_3(%arg0: i32) -> (i32, i32) {
    %c0_i32 = arith.constant 0 : i32
    %c0_i32_0 = arith.constant 0 : i32
    %c0_i32_1 = arith.constant 0 : i32
    return %c0_i32, %c0_i32_0 : i32, i32
  }
  func.func @transform_4(%arg0: i32) -> (i32, i32) {
    %c0_i32 = arith.constant 0 : i32
    %c0_i32_0 = arith.constant 0 : i32
    %c0_i32_1 = arith.constant 0 : i32
    return %c0_i32, %c0_i32_0 : i32, i32
  }
  func.func @transform_5(%arg0: i32) -> (i32, i32) {
    %c0_i32 = arith.constant 0 : i32
    %c0_i32_0 = arith.constant 0 : i32
    %c0_i32_1 = arith.constant 0 : i32
    return %c0_i32, %c0_i32_0 : i32, i32
  }
  func.func @transform_6(%arg0: i32) -> (i32, i32) {
    %c0_i32 = arith.constant 0 : i32
    %c0_i32_0 = arith.constant 0 : i32
    %c0_i32_1 = arith.constant 0 : i32
    return %c0_i32, %c0_i32_0 : i32, i32
  }
  func.func @transform_7(%arg0: i32) -> (i32, i32) {
    %c0_i32 = arith.constant 0 : i32
    %c0_i32_0 = arith.constant 0 : i32
    %c0_i32_1 = arith.constant 0 : i32
    return %c0_i32, %c0_i32_0 : i32, i32
  }
  func.func @transform_8(%arg0: i32) -> (i32, i32) {
    %c0_i32 = arith.constant 0 : i32
    %c0_i32_0 = arith.constant 0 : i32
    %c0_i32_1 = arith.constant 0 : i32
    return %c0_i32, %c0_i32_0 : i32, i32
  }
  func.func @transform_9(%arg0: i32) -> (i32, i32) {
    %c0_i32 = arith.constant 0 : i32
    %c0_i32_0 = arith.constant 0 : i32
    %c0_i32_1 = arith.constant 0 : i32
    return %c0_i32, %c0_i32_0 : i32, i32
  }
  func.func @transform_10(%arg0: i32) -> (i32, i32) {
    %c0_i32 = arith.constant 0 : i32
    %c0_i32_0 = arith.constant 0 : i32
    %c0_i32_1 = arith.constant 0 : i32
    return %c0_i32, %c0_i32_0 : i32, i32
  }
  func.func @transform_11(%arg0: i32) -> (i32, i32) {
    %c0_i32 = arith.constant 0 : i32
    %c0_i32_0 = arith.constant 0 : i32
    %c0_i32_1 = arith.constant 0 : i32
    return %c0_i32, %c0_i32_0 : i32, i32
  }
  func.func @transform_12(%arg0: i32) -> (i32, i32) {
    %c0_i32 = arith.constant 0 : i32
    %c0_i32_0 = arith.constant 0 : i32
    %c0_i32_1 = arith.constant 0 : i32
    return %c0_i32, %c0_i32_0 : i32, i32
  }
  func.func @transform_13(%arg0: i32) -> (i32, i32) {
    %c0_i32 = arith.constant 0 : i32
    %c0_i32_0 = arith.constant 0 : i32
    return %c0_i32, %arg0 : i32, i32
  }
  func.func @transform_14(%arg0: i32) -> (i32, i32) {
    %c0_i32 = arith.constant 0 : i32
    %c0_i32_0 = arith.constant 0 : i32
    return %c0_i32, %arg0 : i32, i32
  }
  func.func @transform_15(%arg0: i32) -> (i32, i32) {
    %c0_i32 = arith.constant 0 : i32
    %c0_i32_0 = arith.constant 0 : i32
    return %c0_i32, %arg0 : i32, i32
  }
}

</mosaic_0001>

<bundles_post_ra>
// kernel: tpu_custom_call.1
= control target key start
LH: loop header
LB: loop body
LE: loop exit
PB: predicated region body
PF: predicated region fallthrough
CT: control target
= control target key end

     0   :  { %s10380_s0 = inlined_call_operand.hbm [shape: bf16[64,128], index: 0, kind: input, shape index: {}]   ;;  %s10381_s1 = inlined_call_operand.hbm [shape: bf16[128,128], index: 1, kind: input, shape index: {}]   ;;  %s10382_s2 = inlined_call_operand.hbm [shape: f32[1,128], index: 2, kind: input, shape index: {}]   ;;  %s10383_s3 = inlined_call_operand.hbm [shape: f32[1,128], index: 3, kind: input, shape index: {}]   ;;  %s10384_s4 = inlined_call_operand.hbm [shape: bf16[128,256], index: 4, kind: input, shape index: {}]   ;;  %s10385_s5 = inlined_call_operand.hbm [shape: f32[1,256], index: 5, kind: input, shape index: {}]   ;;  %s10386_s6 = inlined_call_operand.hbm [shape: f32[1,256], index: 6, kind: input, shape index: {}]   ;;  %s10387_s7 = inlined_call_operand.hbm [shape: bf16[256,512], index: 7, kind: input, shape index: {}]   ;;  %s10388_s8 = inlined_call_operand.hbm [shape: f32[1,512], index: 8, kind: input, shape index: {}]   ;;  %s10389_s9 = inlined_call_operand.hbm [shape: f32[1,512], index: 9, kind: input, shape index: {}]   ;;  %s10390_s10 = inlined_call_operand.hbm [shape: bf16[512,1024], index: 10, kind: input, shape index: {}]   ;;  %s10391_s11 = inlined_call_operand.hbm [shape: f32[1,1024], index: 11, kind: input, shape index: {}]   ;;  %s10392_s12 = inlined_call_operand.hbm [shape: f32[1,1024], index: 12, kind: input, shape index: {}]   ;;  %s10393_s13 = inlined_call_operand.hbm [shape: bf16[1024,896], index: 13, kind: input, shape index: {}]   ;;  %s10394_s14 = inlined_call_operand.hbm [shape: f32[1,896], index: 14, kind: input, shape index: {}]   ;;  %s10395_s15 = inlined_call_operand.hbm [shape: f32[64,896], index: 15, kind: output, shape index: {}]  }
   0x1   :  { %10501 = sst [smem:[#allocation86_spill]] %s10380_s0 }
   0x2   :  { %10502 = sst [smem:[#allocation87_spill]] %s10381_s1 }
   0x3   :  { %10503 = sst [smem:[#allocation88_spill]] %s10382_s2 }
   0x4   :  { %10504 = sst [smem:[#allocation89_spill]] %s10383_s3 }
   0x5   :  { %10505 = sst [smem:[#allocation90_spill]] %s10384_s4 }
   0x6   :  { %10506 = sst [smem:[#allocation91_spill]] %s10385_s5 }
   0x7   :  { %10507 = sst [smem:[#allocation92_spill]] %s10386_s6 }
   0x8   :  { %10508 = sst [smem:[#allocation93_spill]] %s10387_s7 }
   0x9   :  { %10509 = sst [smem:[#allocation94_spill]] %s10388_s8 }
   0xa   :  { %10510 = sst [smem:[#allocation95_spill]] %s10389_s9 }
   0xb   :  { %10511 = sst [smem:[#allocation96_spill]] %s10390_s10 }
   0xc   :  { %10512 = sst [smem:[#allocation97_spill]] %s10391_s11 }
   0xd   :  { %10513 = sst [smem:[#allocation98_spill]] %s10392_s12 }
   0xe   :  { %10514 = sst [smem:[#allocation99_spill]] %s10393_s13 }
   0xf   :  { %10515 = sst [smem:[#allocation100_spill]] %s10394_s14 }
  0x10   :  { %10516 = sst [smem:[#allocation101_spill]] %s10395_s15 }
  0x11   :  { %20 = vsyncpa [#allocation4], 0 }
  0x12   :  { %21 = vsyncpa [#allocation7], 0 }
  0x13   :  { %22 = vsyncpa [#allocation10], 0 }
  0x14   :  { %23 = vsyncpa [#allocation13], 0 }
  0x15   :  { %24 = vsyncpa [#allocation16], 0 }
  0x16   :  { %25 = vsyncpa [#allocation19], 0 }
  0x17   :  { %26 = vsyncpa [#allocation22], 0 }
  0x18   :  { %27 = vsyncpa [#allocation25], 0 }
  0x19   :  { %29 = vsyncpa [#allocation25 + $0x1], 0 }
  0x1a   :  { %30 = vsyncpa [#allocation5], 0 }
  0x1b   :  { %32 = vsyncpa [#allocation5 + $0x1], 0  ;;  %s8060_s18 = smov 0   ;;  %s8062_s19 = smov 0  }
  0x1c   :  { %s8064_s20 = smov 0   ;;  %s8066_s21 = smov 0  }
  0x1d LB: > { %s8081_s22 = sadd.s32 4294967295, %s7948_s21   ;;  %p6264_p0 = scmp.ge.s32.totalorder %s7948_s21, 1  ;;  %s7948_s21 = sphi %s8066_s21, %s10801_s21   ;;  %s7944_s20 = sphi %s8064_s20, %s10805_s20   ;;  %s7940_s19 = sphi %s8062_s19, %s10804_s19   ;;  %s7936_s18 = sphi %s8060_s18, %s10803_s18  }
  0x1e   : > { %p10403_p1 = scmp.eq.s32.totalorder %s8081_s22, 0  ;;  %p394_p2 = scmp.lt.s32.totalorder %s7948_s21, 8 }
  0x1f   : > { %s7950_s24 = smov [#allocation6]   ;;  %s7951_s26 = smov [#allocation9]  }
  0x20   : > { %p8087_p4 = pnand %p6264_p0, %p394_p2  ;;  %s419_s25 = sshll.u32 %s7950_s24, 4  ;;  %s8091_s25 = int_to_ptr.vmem [resolvable:$true] %s419_s25 }
  0x21   : > { %s444_s27 = sshll.u32 %s7951_s26, 4  ;;  %s7952_s29 = smov [#allocation12]   ;;  %s8101_s27 = int_to_ptr.vmem [resolvable:$true] %s444_s27 }
  0x22   : > { %s10517_s23 = scalar_select %p8087_p4, 1, 0 }
  0x23   : > { %p7034_p5 = pneg %p8087_p4  ;;  %s468_s30 = sshll.u32 %s7952_s29, 4  ;;  %s8103_s30 = int_to_ptr.vmem [resolvable:$true] %s468_s30 }
  0x24   : > { %10518 = sst [smem:[#allocation37_spill]] %s10517_s23  ;;  %s10520_s1 = sld [smem:[#allocation87_spill]] }
  0x25   : > { %p8097_p6 = pnand %p7034_p5, %p10403_p1 }
  0x27   : > { %s10519_s28 = scalar_select %p8097_p6, 1, 0 }
  0x28   : > { %p8113_p8 = pneg %p8097_p6 }
  0x2a   : > { %s7430_s24 = scalar_lea.hbm %s10520_s1, 1024 }
  0x2b   : > { %p7431_p7 = scmp.ne.s32.totalorder %s10520_s1, %s7430_s24  ;;  %p7437_p11 = scmp.lt.u32.totalorder %s7430_s24, %s10520_s1 }
  0x2d   : > { %p7433_p9 = pnand %p8113_p8, %p7431_p7 }
  0x2f   : > { %p7434_p10 = pneg %p7433_p9 }
  0x31   : > { %p7439_p12 = pnand %p7437_p11, %p7434_p10 }
  0x33   : > { %7442 = shalt.err (!%p7439_p12)
}
  0x34   : > { %s7443_s15 = scalar_lea.vmem %s8091_s25, 1024  ;;  %p7451_p5 = scmp.lt.s32.totalorder %s8091_s25, %s8091_s25 }
  0x35   : > { %p7444_p13 = scmp.ne.s32.totalorder %s8091_s25, %s7443_s15  ;;  %p7452_p3 = scmp.lt.s32.totalorder %s7443_s15, %s7443_s15 }
  0x37   : > { %p7446_p0 = pnand %p7444_p13, %p8113_p8  ;;  %p7453_p7 = por %p7452_p3, %p7451_p5 }
  0x39   : > { %p7447_p2 = pneg %p7446_p0 }
  0x3b   : > { %p7454_p9 = pnand %p7453_p7, %p7447_p2 }
  0x3d   : > { %7457 = shalt.err (!%p7454_p9)
}
  0x3e   : > { %s10405_s23 = smov 64   ;;  %s10407_s14 = smov 4  }
  0x3f   : > { %7040 = dma.hbm_to_vmem [thread:$0]  (!%p8097_p6), %s10520_s1, 1024, %s8091_s25, [#allocation7], %s10405_s23, %s10405_s23, %s10407_s14  }
  0x40   : > { %s10522_s3 = sld [smem:[#allocation89_spill]] }
  0x46   : > { %s7458_s15 = scalar_lea.hbm %s10522_s3, 16 }
  0x47   : > { %p7459_p3 = scmp.ne.s32.totalorder %s10522_s3, %s7458_s15  ;;  %p7465_p12 = scmp.lt.u32.totalorder %s7458_s15, %s10522_s3 }
  0x49   : > { %p7461_p10 = pnand %p7459_p3, %p8113_p8 }
  0x4b   : > { %p7462_p11 = pneg %p7461_p10 }
  0x4d   : > { %p7467_p13 = pnand %p7465_p12, %p7462_p11 }
  0x4f   : > { %7470 = shalt.err (!%p7467_p13)
}
  0x50   : > { %s7471_s25 = scalar_lea.vmem %s8101_s27, 16  ;;  %s7478_s10 = scalar_lea.vmem %s8101_s27, 32 }
  0x51   : > { %p7472_p0 = scmp.ne.s32.totalorder %s8101_s27, %s7471_s25  ;;  %p7479_p7 = scmp.lt.s32.totalorder %s8101_s27, %s8101_s27 }
  0x52   : > { %p7480_p9 = scmp.lt.s32.totalorder %s7478_s10, %s7471_s25 }
  0x53   : > { %p7474_p2 = pnand %p7472_p0, %p8113_p8 }
  0x54   : > { %p7481_p3 = por %p7480_p9, %p7479_p7 }
  0x55   : > { %p7475_p5 = pneg %p7474_p2 }
  0x57   : > { %p7482_p10 = pnand %p7481_p3, %p7475_p5 }
  0x59   : > { %7485 = shalt.err (!%p7482_p10)
}
  0x5a   : > { %7046 = dma.hbm_to_vmem [thread:$0]  (!%p8097_p6), %s10522_s3, 16, %s8101_s27, [#allocation10]  }
  0x5b   : > { %s10523_s5 = sld [smem:[#allocation91_spill]] }
  0x61   : > { %s7486_s17 = scalar_lea.hbm %s10523_s5, 32 }
  0x62   : > { %p7487_p11 = scmp.ne.s32.totalorder %s10523_s5, %s7486_s17  ;;  %p7493_p0 = scmp.lt.u32.totalorder %s7486_s17, %s10523_s5 }
  0x64   : > { %p7489_p12 = pnand %p7487_p11, %p8113_p8 }
  0x66   : > { %p7490_p13 = pneg %p7489_p12 }
  0x68   : > { %p7495_p2 = pnand %p7493_p0, %p7490_p13 }
  0x6a   : > { %7498 = shalt.err (!%p7495_p2)
}
  0x6b   : > { %s7499_s27 = scalar_lea.vmem %s8103_s30, 32  ;;  %p7507_p3 = scmp.lt.s32.totalorder %s8103_s30, %s8103_s30 }
  0x6c   : > { %p7500_p5 = scmp.ne.s32.totalorder %s8103_s30, %s7499_s27  ;;  %p7508_p10 = scmp.lt.s32.totalorder %s7499_s27, %s7499_s27 }
  0x6e   : > { %p7502_p7 = pnand %p7500_p5, %p8113_p8  ;;  %p7509_p11 = por %p7508_p10, %p7507_p3 }
  0x70   : > { %p7503_p9 = pneg %p7502_p7 }
  0x72   : > { %p7510_p12 = pnand %p7509_p11, %p7503_p9 }
  0x74   : > { %7513 = shalt.err (!%p7510_p12)
}
  0x75   : > { %7052 = dma.hbm_to_vmem [thread:$0]  (!%p8097_p6), %s10523_s5, 32, %s8103_s30, [#allocation13]  }
  0x76   : > { %s7955_s8 = smov [#allocation15]   ;;  %s10524_s7 = sld [smem:[#allocation93_spill]] }
  0x77   : > { %s489_s12 = sshll.u32 %s7955_s8, 4  ;;  %s490_s12 = int_to_ptr.vmem [resolvable:$true] %s489_s12 }
  0x7c   : > { %s7514_s24 = scalar_lea.hbm %s10524_s7, 8192 }
  0x7d   : > { %p7515_p13 = scmp.ne.s32.totalorder %s10524_s7, %s7514_s24  ;;  %p7521_p5 = scmp.lt.u32.totalorder %s7514_s24, %s10524_s7 }
  0x7f   : > { %p7517_p0 = pnand %p7515_p13, %p8113_p8 }
  0x81   : > { %p7518_p2 = pneg %p7517_p0 }
  0x83   : > { %p7523_p7 = pnand %p7521_p5, %p7518_p2 }
  0x85   : > { %7526 = shalt.err (!%p7523_p7)
}
  0x86   : > { %s7527_s30 = scalar_lea.vmem %s490_s12, 8192  ;;  %p7535_p11 = scmp.lt.s32.totalorder %s490_s12, %s490_s12 }
  0x87   : > { %p7528_p9 = scmp.ne.s32.totalorder %s490_s12, %s7527_s30  ;;  %p7536_p12 = scmp.lt.s32.totalorder %s7527_s30, %s7527_s30 }
  0x89   : > { %p7530_p3 = pnand %p7528_p9, %p8113_p8  ;;  %p7537_p1 = por %p7536_p12, %p7535_p11 }
  0x8b   : > { %p7531_p10 = pneg %p7530_p3 }
  0x8d   : > { %p7538_p4 = pnand %p7537_p1, %p7531_p10 }
  0x8f   : > { %7541 = shalt.err (!%p7538_p4)
}
  0x90   : > { %s7956_s10 = smov 256   ;;  %s7957_s6 = smov 16  }
  0x91   : > { %7058 = dma.hbm_to_vmem [thread:$0]  (!%p8097_p6), %s10524_s7, 8192, %s490_s12, [#allocation16], %s7956_s10, %s7956_s10, %s7957_s6  }
  0x92   : > { %s7958_s17 = smov [#allocation18]   ;;  %s7959_s29 = smov [#allocation21]  }
  0x93   : > { %s514_s24 = sshll.u32 %s7958_s17, 4  ;;  %s538_s15 = sshll.u32 %s7959_s29, 4  ;;  %s515_s24 = int_to_ptr.vmem [resolvable:$true] %s514_s24  ;;  %s8202_s15 = int_to_ptr.vmem [resolvable:$true] %s538_s15 }
  0x94   : > { %s10525_s9 = sld [smem:[#allocation95_spill]] }
  0x9a   : > { %s7542_s30 = scalar_lea.hbm %s10525_s9, 64 }
  0x9b   : > { %p7543_p1 = scmp.ne.s32.totalorder %s10525_s9, %s7542_s30  ;;  %p7549_p0 = scmp.lt.u32.totalorder %s7542_s30, %s10525_s9 }
  0x9d   : > { %p7545_p4 = pnand %p7543_p1, %p8113_p8 }
  0x9f   : > { %p7546_p13 = pneg %p7545_p4 }
  0xa1   : > { %p7551_p2 = pnand %p7549_p0, %p7546_p13 }
  0xa3   : > { %7554 = shalt.err (!%p7551_p2)
}
  0xa4   : > { %s7555_s10 = scalar_lea.vmem %s515_s24, 64  ;;  %p7563_p3 = scmp.lt.s32.totalorder %s515_s24, %s515_s24 }
  0xa5   : > { %p7556_p5 = scmp.ne.s32.totalorder %s515_s24, %s7555_s10  ;;  %p7564_p10 = scmp.lt.s32.totalorder %s7555_s10, %s7555_s10 }
  0xa7   : > { %p7558_p7 = pnand %p7556_p5, %p8113_p8  ;;  %p7565_p11 = por %p7564_p10, %p7563_p3 }
  0xa9   : > { %p7559_p9 = pneg %p7558_p7 }
  0xab   : > { %p7566_p12 = pnand %p7565_p11, %p7559_p9 }
  0xad   : > { %7569 = shalt.err (!%p7566_p12)
}
  0xae   : > { %7064 = dma.hbm_to_vmem [thread:$0]  (!%p8097_p6), %s10525_s9, 64, %s515_s24, [#allocation19]  }
  0xaf   : > { %s10526_s11 = sld [smem:[#allocation97_spill]] }
  0xb5   : > { %s7570_s17 = scalar_lea.hbm %s10526_s11, 128 }
  0xb6   : > { %p7571_p1 = scmp.ne.s32.totalorder %s10526_s11, %s7570_s17  ;;  %p7577_p0 = scmp.lt.u32.totalorder %s7570_s17, %s10526_s11 }
  0xb8   : > { %p7573_p4 = pnand %p7571_p1, %p8113_p8 }
  0xba   : > { %p7574_p13 = pneg %p7573_p4 }
  0xbc   : > { %p7579_p2 = pnand %p7577_p0, %p7574_p13 }
  0xbe   : > { %7582 = shalt.err (!%p7579_p2)
}
  0xbf   : > { %s7583_s24 = scalar_lea.vmem %s8202_s15, 128  ;;  %p7591_p3 = scmp.lt.s32.totalorder %s8202_s15, %s8202_s15 }
  0xc0   : > { %p7584_p5 = scmp.ne.s32.totalorder %s8202_s15, %s7583_s24  ;;  %p7592_p10 = scmp.lt.s32.totalorder %s7583_s24, %s7583_s24 }
  0xc2   : > { %p7586_p7 = pnand %p7584_p5, %p8113_p8  ;;  %p7593_p11 = por %p7592_p10, %p7591_p3 }
  0xc4   : > { %p7587_p9 = pneg %p7586_p7 }
  0xc6   : > { %p7594_p12 = pnand %p7593_p11, %p7587_p9 }
  0xc8   : > { %7597 = shalt.err (!%p7594_p12)
}
  0xc9   : > { %7070 = dma.hbm_to_vmem [thread:$0]  (!%p8097_p6), %s10526_s11, 128, %s8202_s15, [#allocation22]  }
  0xca   : > { %s6263_s10 = sadd.s32 4294967294, %s7948_s21   ;;  %s8247_s23 = sadd.s32 1, %s7948_s21  }
  0xcb   : > { %10527 = sst [smem:[#allocation38_spill]] %s8247_s23  ;;  %s315_s14 = ssub.s32 %s7948_s21, %s8247_s23 }
  0xcc   : > { %s318_s6 = sadd.s32 1, %s7944_s20  ;;  %p316_p1 = scmp.eq.s32.totalorder %s315_s14, 0 }
  0xcd   : > { %p325_p4 = scmp.ne.s32.totalorder %s7944_s20, %s7940_s19  ;;  %p326_p13 = scmp.eq.s32.totalorder %s7948_s21, 0 }
  0xce   : > { %p331_p0 = scmp.ne.s32.totalorder %s7940_s19, %s7936_s18  ;;  %p10530_p5 = scmp.eq.s32.totalorder %s8081_s22, 0 }
  0xcf   : > { %s8258_s16 = scalar_select %p316_p1, %s7944_s20, %s318_s6  }
  0xd0   : > { %p8260_p2 = por %p326_p13, %p325_p4  ;;  %p8266_p7 = por %p10530_p5, %p331_p0 }
  0xd1   : > { %10528 = sst [smem:[#allocation39_spill]] %s8258_s16  ;;  %p381_p9 = scmp.eq.s32.totalorder %s8081_s22, 6 }
  0xd2   : > { %s10531_s15 = scalar_select %p8266_p7, 1, 0 }
  0xd3   : > { %p387_p3 = scmp.eq.s32.totalorder %s6263_s10, 6  ;;  %p7098_p10 = scmp.lt.s32.totalorder %s7948_s21, 7 }
  0xd4   : > { %s560_s29 = sand.u32 1, %s7948_s21   ;;  %p8273_p11 = por %p381_p9, %p325_p4 }
  0xd5   : > { %p8277_p12 = por %p387_p3, %p331_p0  ;;  %s10409_s30 = sand.u32 1, %s7944_s20  }
  0xd6   : > { %s10532_s25 = scalar_select %p8273_p11, 1, 0 }
  0xd7   : > { %s10533_s27 = scalar_select %p8277_p12, 1, 0 }
  0xd8   : > { %s6279_s24 = sshll.u32 %s10409_s30, 9  ;;  %s6280_s8 = sshll.u32 %s7948_s21, 6 }
  0xd9   : > { %s10534_s13 = sld [smem:[#allocation99_spill]]  ;;  %s564_s10 = scalar_lea.vmem [#allocation24], %s6279_s24 }
  0xda   : > { %s570_s1 = sshll.u32 %s564_s10, 4  ;;  %p8292_p1 = pnand %p7098_p10, %p8260_p2  ;;  %s8296_s1 = int_to_ptr.vmem [resolvable:$true] %s570_s1 }
  0xdb   : > { %s8298_s30 = scalar_lea.sflag [#allocation25], %s560_s29 }
  0xdc   : > { %s10535_s3 = scalar_select %p8292_p1, 1, 0 }
  0xdd   : > { %p10416_p13 = pneg %p8292_p1 }
  0xdf   : > { %s8288_s6 = scalar_lea.hbm %s10534_s13, %s6280_s8  ;;  %s7603_s8 = scalar_lea.hbm %s10534_s13, 57344 }
  0xe0   : > { %s7598_s12 = scalar_lea.hbm %s8288_s6, 8192  ;;  %p7604_p2 = scmp.lt.u32.totalorder %s8288_s6, %s10534_s13 }
  0xe1   : > { %p7599_p4 = scmp.ne.s32.totalorder %s8288_s6, %s7598_s12  ;;  %p7605_p9 = scmp.lt.u32.totalorder %s7603_s8, %s7598_s12 }
  0xe2   : > { %p7607_p10 = scmp.lt.u32.totalorder %s7598_s12, %s8288_s6 }
  0xe3   : > { %p7601_p0 = pnand %p10416_p13, %p7599_p4  ;;  %p7606_p3 = por %p7605_p9, %p7604_p2 }
  0xe5   : > { %p7602_p5 = pneg %p7601_p0  ;;  %p7608_p12 = por %p7607_p10, %p7606_p3 }
  0xe7   : > { %p7609_p11 = pnand %p7608_p12, %p7602_p5 }
  0xe9   : > { %7612 = shalt.err (!%p7609_p11)
}
  0xea   : > { %s7613_s29 = scalar_lea.vmem %s8296_s1, 8192  ;;  %s7960_s24 = smov [#allocation24]  }
  0xeb   : > { %p7614_p4 = scmp.ne.s32.totalorder %s8296_s1, %s7613_s29  ;;  %s7618_s17 = sshll.u32 %s7960_s24, 4  ;;  %s7619_s17 = int_to_ptr.vmem [resolvable:$false] %s7618_s17 }
  0xec   : > { %s7620_s14 = scalar_lea.vmem %s7619_s17, 16384  ;;  %p7621_p6 = scmp.lt.s32.totalorder %s8296_s1, %s7619_s17 }
  0xed   : > { %p7616_p0 = pnand %p7614_p4, %p10416_p13  ;;  %p7622_p2 = scmp.lt.s32.totalorder %s7620_s14, %s7613_s29 }
  0xef   : > { %p7617_p7 = pneg %p7616_p0  ;;  %p7623_p9 = por %p7622_p2, %p7621_p6 }
  0xf1   : > { %p7624_p3 = pnand %p7623_p9, %p7617_p7 }
  0xf3   : > { %7627 = shalt.err (!%p7624_p3)
}
  0xf4   : > { %s7961_s12 = smov 448   ;;  %s10536_s8 = smov 4  }
  0xf5   : > { %s10537_s10 = smov 64   ;;  %s7962_s5 = smov [#allocation3]  }
  0xf6   : > { %7077 = dma.hbm_to_vmem [thread:$0]  (!%p8292_p1), %s8288_s6, 8192, %s8296_s1, %s8298_s30, %s7961_s12, %s10537_s10, %s10536_s8  }
  0xf7   : > { %s406_s7 = sshll.u32 %s7962_s5, 4  ;;  %s7963_s24 = smov [#allocation8]   ;;  %s407_s7 = int_to_ptr.vmem [resolvable:$true] %s406_s7 }
  0xf8   : > { %s433_s9 = sshll.u32 %s7963_s24, 4  ;;  %s10538_s0 = sld [smem:[#allocation86_spill]]  ;;  %s434_s9 = int_to_ptr.vmem [resolvable:$true] %s433_s9 }
  0xfe   : > { %s7628_s14 = scalar_lea.hbm %s10538_s0, 512 }
  0xff   : > { %p7629_p6 = scmp.ne.s32.totalorder %s10538_s0, %s7628_s14  ;;  %p7635_p12 = scmp.lt.u32.totalorder %s7628_s14, %s10538_s0 }
 0x101   : > { %p7631_p7 = pnand %p7629_p6, %p8113_p8 }
 0x103   : > { %p7632_p11 = pneg %p7631_p7 }
 0x105   : > { %p7637_p5 = pnand %p7635_p12, %p7632_p11 }
 0x107   : > { %7640 = shalt.err (!%p7637_p5)
}
 0x108   : > { %s7641_s1 = scalar_lea.vmem %s407_s7, 512  ;;  %p7649_p2 = scmp.lt.s32.totalorder %s407_s7, %s407_s7 }
 0x109   : > { %p7642_p10 = scmp.ne.s32.totalorder %s407_s7, %s7641_s1  ;;  %p7650_p9 = scmp.lt.s32.totalorder %s7641_s1, %s7641_s1 }
 0x10b   : > { %p7644_p4 = pnand %p7642_p10, %p8113_p8  ;;  %p7651_p3 = por %p7650_p9, %p7649_p2 }
 0x10d   : > { %p7645_p0 = pneg %p7644_p4 }
 0x10f   : > { %p7652_p13 = pnand %p7651_p3, %p7645_p0 }
 0x111   : > { %7655 = shalt.err (!%p7652_p13)
}
 0x112   : > { %p10539_p6 = scmp.ne.s32.totalorder %s10519_s28, 0  ;;  %s10540_s2 = sld [smem:[#allocation88_spill]] }
 0x114   : > { %7037 = dma.hbm_to_vmem [thread:$0]  (!%p10539_p6), %s10538_s0, 512, %s407_s7, [#allocation4], %s10537_s10, %s10537_s10, %s10536_s8  }
 0x118   : > { %s7656_s16 = scalar_lea.hbm %s10540_s2, 16 }
 0x119   : > { %p7657_p7 = scmp.ne.s32.totalorder %s10540_s2, %s7656_s16  ;;  %p7663_p12 = scmp.lt.u32.totalorder %s7656_s16, %s10540_s2 }
 0x11b   : > { %p7659_p13 = pnand %p7657_p7, %p8113_p8 }
 0x11d   : > { %p7660_p11 = pneg %p7659_p13 }
 0x11f   : > { %p7665_p5 = pnand %p7663_p12, %p7660_p11 }
 0x121   : > { %7668 = shalt.err (!%p7665_p5)
}
 0x122   : > { %s7669_s29 = scalar_lea.vmem %s434_s9, 16  ;;  %s7676_s7 = scalar_lea.vmem %s434_s9, 32 }
 0x123   : > { %p7670_p10 = scmp.ne.s32.totalorder %s434_s9, %s7669_s29  ;;  %p7677_p2 = scmp.lt.s32.totalorder %s434_s9, %s434_s9 }
 0x124   : > { %p7678_p9 = scmp.lt.s32.totalorder %s7676_s7, %s7669_s29 }
 0x125   : > { %p7672_p4 = pnand %p7670_p10, %p8113_p8 }
 0x126   : > { %p7679_p3 = por %p7678_p9, %p7677_p2 }
 0x127   : > { %p7673_p0 = pneg %p7672_p4 }
 0x129   : > { %p7680_p1 = pnand %p7679_p3, %p7673_p0 }
 0x12b   : > { %7683 = shalt.err (!%p7680_p1)
}
 0x12c   : > { %7043 = dma.hbm_to_vmem [thread:$0]  (!%p10539_p6), %s10540_s2, 16, %s434_s9, [#allocation7]  }
 0x12d   : > { %s7964_s14 = smov [#allocation11]   ;;  %s10541_s4 = sld [smem:[#allocation90_spill]] }
 0x12e   : > { %s454_s1 = sshll.u32 %s7964_s14, 4  ;;  %s455_s1 = int_to_ptr.vmem [resolvable:$true] %s454_s1 }
 0x133   : > { %s7684_s13 = scalar_lea.hbm %s10541_s4, 2048 }
 0x134   : > { %p7685_p7 = scmp.ne.s32.totalorder %s10541_s4, %s7684_s13  ;;  %p7691_p11 = scmp.lt.u32.totalorder %s7684_s13, %s10541_s4 }
 0x136   : > { %p7687_p1 = pnand %p7685_p7, %p8113_p8 }
 0x138   : > { %p7688_p13 = pneg %p7687_p1 }
 0x13a   : > { %p7693_p12 = pnand %p7691_p11, %p7688_p13 }
 0x13c   : > { %7696 = shalt.err (!%p7693_p12)
}
 0x13d   : > { %s7697_s9 = scalar_lea.vmem %s455_s1, 2048  ;;  %p7705_p0 = scmp.lt.s32.totalorder %s455_s1, %s455_s1 }
 0x13e   : > { %p7698_p5 = scmp.ne.s32.totalorder %s455_s1, %s7697_s9  ;;  %p7706_p2 = scmp.lt.s32.totalorder %s7697_s9, %s7697_s9 }
 0x140   : > { %p7700_p10 = pnand %p7698_p5, %p8113_p8  ;;  %p7707_p9 = por %p7706_p2, %p7705_p0 }
 0x142   : > { %p7701_p4 = pneg %p7700_p10 }
 0x144   : > { %p7708_p3 = pnand %p7707_p9, %p7701_p4 }
 0x146   : > { %7711 = shalt.err (!%p7708_p3)
}
 0x147   : > { %s7965_s24 = smov 128   ;;  %s7966_s17 = smov 8  }
 0x148   : > { %7049 = dma.hbm_to_vmem [thread:$0]  (!%p10539_p6), %s10541_s4, 2048, %s455_s1, [#allocation10], %s7965_s24, %s7965_s24, %s7966_s17  }
 0x149   : > { %s7967_s8 = smov [#allocation14]   ;;  %s7968_s14 = smov [#allocation17]  }
 0x14a   : > { %s479_s10 = sshll.u32 %s7967_s8, 4  ;;  %s503_s5 = sshll.u32 %s7968_s14, 4  ;;  %s480_s10 = int_to_ptr.vmem [resolvable:$true] %s479_s10  ;;  %s8385_s5 = int_to_ptr.vmem [resolvable:$true] %s503_s5 }
 0x14b   : > { %s10542_s23 = sld [smem:[#allocation92_spill]] }
 0x151   : > { %s7712_s16 = scalar_lea.hbm %s10542_s23, 32 }
 0x152   : > { %p7713_p7 = scmp.ne.s32.totalorder %s10542_s23, %s7712_s16  ;;  %p7719_p11 = scmp.lt.u32.totalorder %s7712_s16, %s10542_s23 }
 0x154   : > { %p7715_p1 = pnand %p7713_p7, %p8113_p8 }
 0x156   : > { %p7716_p13 = pneg %p7715_p1 }
 0x158   : > { %p7721_p12 = pnand %p7719_p11, %p7716_p13 }
 0x15a   : > { %7724 = shalt.err (!%p7721_p12)
}
 0x15b   : > { %s7725_s24 = scalar_lea.vmem %s480_s10, 32  ;;  %p7733_p0 = scmp.lt.s32.totalorder %s480_s10, %s480_s10 }
 0x15c   : > { %p7726_p5 = scmp.ne.s32.totalorder %s480_s10, %s7725_s24  ;;  %p7734_p2 = scmp.lt.s32.totalorder %s7725_s24, %s7725_s24 }
 0x15e   : > { %p7728_p10 = pnand %p7726_p5, %p8113_p8  ;;  %p7735_p9 = por %p7734_p2, %p7733_p0 }
 0x160   : > { %p7729_p4 = pneg %p7728_p10 }
 0x162   : > { %p7736_p3 = pnand %p7735_p9, %p7729_p4 }
 0x164   : > { %7739 = shalt.err (!%p7736_p3)
}
 0x165   : > { %7055 = dma.hbm_to_vmem [thread:$0]  (!%p10539_p6), %s10542_s23, 32, %s480_s10, [#allocation13]  }
 0x166   : > { %s10543_s14 = sld [smem:[#allocation94_spill]] }
 0x16c   : > { %s7740_s11 = scalar_lea.hbm %s10543_s14, 64 }
 0x16d   : > { %p7741_p7 = scmp.ne.s32.totalorder %s10543_s14, %s7740_s11  ;;  %p7747_p11 = scmp.lt.u32.totalorder %s7740_s11, %s10543_s14 }
 0x16f   : > { %p7743_p1 = pnand %p7741_p7, %p8113_p8 }
 0x171   : > { %p7744_p13 = pneg %p7743_p1 }
 0x173   : > { %p7749_p12 = pnand %p7747_p11, %p7744_p13 }
 0x175   : > { %7752 = shalt.err (!%p7749_p12)
}
 0x176   : > { %s7753_s10 = scalar_lea.vmem %s8385_s5, 64  ;;  %p7761_p0 = scmp.lt.s32.totalorder %s8385_s5, %s8385_s5 }
 0x177   : > { %p7754_p5 = scmp.ne.s32.totalorder %s8385_s5, %s7753_s10  ;;  %p7762_p2 = scmp.lt.s32.totalorder %s7753_s10, %s7753_s10 }
 0x179   : > { %p7756_p10 = pnand %p7754_p5, %p8113_p8  ;;  %p7763_p9 = por %p7762_p2, %p7761_p0 }
 0x17b   : > { %p7757_p4 = pneg %p7756_p10 }
 0x17d   : > { %p7764_p3 = pnand %p7763_p9, %p7757_p4 }
 0x17f   : > { %7767 = shalt.err (!%p7764_p3)
}
 0x180   : > { %7061 = dma.hbm_to_vmem [thread:$0]  (!%p10539_p6), %s10543_s14, 64, %s8385_s5, [#allocation16]  }
 0x181   : > { %s7969_s24 = smov [#allocation20]   ;;  %s10544_s8 = sld [smem:[#allocation96_spill]] }
 0x182   : > { %s524_s17 = sshll.u32 %s7969_s24, 4  ;;  %s525_s17 = int_to_ptr.vmem [resolvable:$true] %s524_s17 }
 0x187   : > { %s7768_s11 = scalar_lea.hbm %s10544_s8, 32768 }
 0x188   : > { %p7769_p7 = scmp.ne.s32.totalorder %s10544_s8, %s7768_s11  ;;  %p7775_p11 = scmp.lt.u32.totalorder %s7768_s11, %s10544_s8 }
 0x18a   : > { %p7771_p1 = pnand %p7769_p7, %p8113_p8 }
 0x18c   : > { %p7772_p13 = pneg %p7771_p1 }
 0x18e   : > { %p7777_p12 = pnand %p7775_p11, %p7772_p13 }
 0x190   : > { %7780 = shalt.err (!%p7777_p12)
}
 0x191   : > { %s7781_s5 = scalar_lea.vmem %s525_s17, 32768  ;;  %p7789_p0 = scmp.lt.s32.totalorder %s525_s17, %s525_s17 }
 0x192   : > { %p7782_p5 = scmp.ne.s32.totalorder %s525_s17, %s7781_s5  ;;  %p7790_p2 = scmp.lt.s32.totalorder %s7781_s5, %s7781_s5 }
 0x194   : > { %p7784_p10 = pnand %p7782_p5, %p8113_p8  ;;  %p7791_p9 = por %p7790_p2, %p7789_p0 }
 0x196   : > { %p7785_p4 = pneg %p7784_p10 }
 0x198   : > { %p7792_p3 = pnand %p7791_p9, %p7785_p4 }
 0x19a   : > { %7795 = shalt.err (!%p7792_p3)
}
 0x19b   : > { %s7970_s10 = smov 512   ;;  %s7971_s9 = smov 32  }
 0x19c   : > { %7067 = dma.hbm_to_vmem [thread:$0]  (!%p10539_p6), %s10544_s8, 32768, %s525_s17, [#allocation19], %s7970_s10, %s7970_s10, %s7971_s9  }
 0x19d   : > { %s7972_s29 = smov [#allocation23]   ;;  %s6281_s11 = sshll.u32 %s7948_s21, 4 }
 0x19e   : > { %s549_s7 = sshll.u32 %s7972_s29, 4  ;;  %s10545_s6 = sld [smem:[#allocation98_spill]]  ;;  %s550_s7 = int_to_ptr.vmem [resolvable:$true] %s549_s7 }
 0x1a4   : > { %s7796_s12 = scalar_lea.hbm %s10545_s6, 128 }
 0x1a5   : > { %p7797_p7 = scmp.ne.s32.totalorder %s10545_s6, %s7796_s12  ;;  %p7803_p11 = scmp.lt.u32.totalorder %s7796_s12, %s10545_s6 }
 0x1a7   : > { %p7799_p1 = pnand %p7797_p7, %p8113_p8 }
 0x1a9   : > { %p7800_p13 = pneg %p7799_p1 }
 0x1ab   : > { %p7805_p12 = pnand %p7803_p11, %p7800_p13 }
 0x1ad   : > { %7808 = shalt.err (!%p7805_p12)
}
 0x1ae   : > { %s7809_s17 = scalar_lea.vmem %s550_s7, 128  ;;  %p7817_p0 = scmp.lt.s32.totalorder %s550_s7, %s550_s7 }
 0x1af   : > { %p7810_p5 = scmp.ne.s32.totalorder %s550_s7, %s7809_s17  ;;  %p7818_p2 = scmp.lt.s32.totalorder %s7809_s17, %s7809_s17 }
 0x1b1   : > { %p7812_p10 = pnand %p7810_p5, %p8113_p8  ;;  %p7819_p9 = por %p7818_p2, %p7817_p0 }
 0x1b3   : > { %p7813_p4 = pneg %p7812_p10 }
 0x1b5   : > { %p7820_p3 = pnand %p7819_p9, %p7813_p4 }
 0x1b7   : > { %7823 = shalt.err (!%p7820_p3)
}
 0x1b8   : > { %7073 = dma.hbm_to_vmem [thread:$0]  (!%p10539_p6), %s10545_s6, 128, %s550_s7, [#allocation22]  }
 0x1b9   : > { %s10546_s9 = sld [smem:[#allocation100_spill]]  ;;  %s10547_s26 = sand.u32 1, %s7944_s20  }
 0x1ba   : > { %s583_s24 = scalar_lea.vmem [#allocation26], %s10547_s26  ;;  %p10548_p7 = scmp.ne.s32.totalorder %s10535_s3, 0 }
 0x1bb   : > { %s590_s29 = sshll.u32 %s583_s24, 4  ;;  %s591_s29 = int_to_ptr.vmem [resolvable:$true] %s590_s29 }
 0x1bc   : > { %p10549_p1 = pneg %p10548_p7 }
 0x1bf   : > { %s8468_s1 = scalar_lea.hbm %s10546_s9, %s6281_s11  ;;  %s7829_s16 = scalar_lea.hbm %s10546_s9, 112 }
 0x1c0   : > { %s7824_s28 = scalar_lea.hbm %s8468_s1, 16  ;;  %p7830_p6 = scmp.lt.u32.totalorder %s8468_s1, %s10546_s9 }
 0x1c1   : > { %p7825_p8 = scmp.ne.s32.totalorder %s8468_s1, %s7824_s28  ;;  %p7831_p12 = scmp.lt.u32.totalorder %s7829_s16, %s7824_s28 }
 0x1c2   : > { %p7833_p10 = scmp.lt.u32.totalorder %s7824_s28, %s8468_s1 }
 0x1c3   : > { %p7827_p13 = pnand %p7825_p8, %p10549_p1  ;;  %p7832_p5 = por %p7831_p12, %p7830_p6 }
 0x1c5   : > { %p7828_p11 = pneg %p7827_p13  ;;  %p7834_p4 = por %p7833_p10, %p7832_p5 }
 0x1c7   : > { %p7835_p0 = pnand %p7834_p4, %p7828_p11 }
 0x1c9   : > { %7838 = shalt.err (!%p7835_p0)
}
 0x1ca   : > { %s7839_s5 = scalar_lea.vmem %s591_s29, 16  ;;  %p10550_p9 = pmov %p10549_p1 }
 0x1cb   : > { %p7840_p2 = scmp.ne.s32.totalorder %s591_s29, %s7839_s5  ;;  %s7973_s17 = smov [#allocation26]  }
 0x1cc   : > { %s7844_s0 = sshll.u32 %s7973_s17, 4  ;;  %s7845_s0 = int_to_ptr.vmem [resolvable:$false] %s7844_s0 }
 0x1cd   : > { %p7842_p3 = pnand %p7840_p2, %p10550_p9  ;;  %s7846_s10 = scalar_lea.vmem %s7845_s0, 32 }
 0x1ce   : > { %p7847_p1 = scmp.lt.s32.totalorder %s591_s29, %s7845_s0  ;;  %p7848_p13 = scmp.lt.s32.totalorder %s7846_s10, %s7839_s5 }
 0x1cf   : > { %p7843_p8 = pneg %p7842_p3 }
 0x1d0   : > { %p7849_p6 = por %p7848_p13, %p7847_p1 }
 0x1d2   : > { %p7850_p12 = pnand %p7849_p6, %p7843_p8 }
 0x1d4   : > { %7853 = shalt.err (!%p7850_p12)
}
 0x1d5   : > { %7080 = dma.hbm_to_vmem [thread:$0]  (!%p10548_p7), %s8468_s1, 16, %s591_s29, %s8298_s30  }
 0x1d6   : > { %s10551_s2 = sld [smem:[#allocation37_spill]] }
 0x1dc   : > { %p10552_p11 = scmp.ne.s32.totalorder %s10551_s2, 0 }
 0x1dd   : > { %p10553_p5 = scmp.eq.s32.totalorder (!%p10552_p11), %s8081_s22, 0 }
 0x1de   : > { %599 = sbr.rel (%p10552_p11) target bundleno = 2374 (0x946), region = 80 }
 0x1e5   : > { %7899 = dma.done.wait (%p10553_p5), [#allocation4], 512   ;;  %p10554_p10 = pmov %p10553_p5 }
 0x1e6   : > { %p10555_p4 = pmov %p10553_p5 }
 0x1e7   : > { %7901 = vsyncadd (%p10554_p10), [#allocation4], 4294966784 }
 0x1e8   : > { %7903 = dma.done.wait (%p10555_p4), [#allocation7], 1040   ;;  %p10556_p0 = pmov %p10555_p4 }
 0x1ea   : > { %7905 = vsyncadd (%p10556_p0), [#allocation7], 4294966256  ;;  %p10557_p2 = pmov %p10556_p0 }
 0x1eb   : > { %p10558_p7 = pmov %p10556_p0 }
 0x1ec   : > { %7907 = dma.done.wait (%p10557_p2), [#allocation10], 2064  }
 0x1ed   : > { %7909 = vsyncadd (%p10558_p7), [#allocation10], 4294965232  ;;  %p10559_p9 = pmov %p10556_p0 }
 0x1ee   : > { %p10560_p3 = pmov %p10556_p0 }
 0x1ef   : > { %7911 = dma.done.wait (%p10559_p9), [#allocation13], 64  }
 0x1f0   : > { %7913 = vsyncadd (%p10560_p3), [#allocation13], 4294967232  ;;  %p10561_p8 = pmov %p10556_p0 }
 0x1f1   : > { %p10562_p1 = pmov %p10556_p0 }
 0x1f2   : > { %7915 = dma.done.wait (%p10561_p8), [#allocation16], 8256  }
 0x1f3   : > { %7917 = vsyncadd (%p10562_p1), [#allocation16], 4294959040  ;;  %p10563_p13 = pmov %p10556_p0 }
 0x1f4   : > { %p10564_p6 = pmov %p10556_p0 }
 0x1f5   : > { %7919 = dma.done.wait (%p10563_p13), [#allocation19], 32832  }
 0x1f6   : > { %7921 = vsyncadd (%p10564_p6), [#allocation19], 4294934464  ;;  %p10565_p12 = pmov %p10556_p0 }
 0x1f7   : > { %p10566_p11 = pmov %p10556_p0 }
 0x1f8   : > { %7923 = dma.done.wait (%p10565_p12), [#allocation22], 256  }
 0x1f9   : > { %7925 = vsyncadd (%p10566_p11), [#allocation22], 4294967040  ;;  %s653_s3 = sand.u32 1, %s8081_s22   ;;  %s8524_s30 = sand.u32 1, %s7940_s19  }
 0x1fa   : > { %s6296_s4 = sshll.u32 %s8524_s30, 9  ;;  %s654_s1 = scalar_lea.sflag [#allocation25], %s653_s3 }
 0x1fb   : > { %s8527_s26 = scalar_lea.vmem [#allocation24], %s6296_s4  ;;  %p10567_p5 = scmp.ne.s32.totalorder %s10531_s15, 0 }
 0x1fd   : > { %7927 = dma.done.wait (%p10567_p5), %s654_s1, 8208  }
 0x1fe   : > { %7929 = vsyncadd (%p10567_p5), %s654_s1, 4294959088  ;;  %s6297_s24 = sshll.u32 %s8524_s30, 6  ;;  %s665_s29 = scalar_lea.vmem [#allocation26], %s8524_s30 }
 0x1ff   : > { %s8535_s28 = scalar_lea.vmem [#allocation27], %s6297_s24  ;;  %p10568_p10 = scmp.ne.s32.totalorder %s8081_s22, 0 }
 0x201   : > { %720 = sbr.rel (%p10568_p10) target bundleno = 2016 (0x7e0), region = 144 }
 0x208   : > { %v7172_v0 = vld [vmem:[#allocation6] sm:$0xff]   ;;  %v7173_v1 = vld [vmem:[#allocation6 + $0x8] sm:$0xff]   ;;  %v7174_v2 = vld [vmem:[#allocation6 + $0x10] sm:$0xff]   ;;  %v7974_v28 = vmov 0  }
 0x209   : > { %6888 = vmatprep.subr.bf16.mxu0 %v7172_v0  ;;  %v7175_v3 = vld [vmem:[#allocation6 + $0x18] sm:$0xff]   ;;  %v7180_v4 = vld [vmem:[#allocation3] sm:$0xff]   ;;  %v7177_v6 = vld [vmem:[#allocation6 + $0x28] sm:$0xff]   ;;  %1096 = vmatprep.mubr.bf16.mxu1 %v7974_v28 }
 0x20a   : > { %6889 = vmatpush3.bf16.msra.mxu0 %v7172_v0  ;;  %6904 = vmatprep.mubr.bf16.mxu0 %v7180_v4  ;;  %v7176_v5 = vld [vmem:[#allocation6 + $0x20] sm:$0xff]   ;;  %v7178_v7 = vld [vmem:[#allocation6 + $0x30] sm:$0xff]   ;;  %v7179_v8 = vld [vmem:[#allocation6 + $0x38] sm:$0xff]  }
 0x20b   : > { %6890 = vmatprep.subr.bf16.mxu0 %v7173_v1  ;;  %v7181_v9 = vld [vmem:[#allocation3 + $0x8] sm:$0xff]   ;;  %v7182_v10 = vld [vmem:[#allocation3 + $0x10] sm:$0xff]   ;;  %v7183_v11 = vld [vmem:[#allocation3 + $0x18] sm:$0xff]  }
 0x20c   : > { %v7184_v12 = vld [vmem:[#allocation11 + $0x4] ss:$8 sps:$4 sm:$0xff]   ;;  %v7186_v13 = vld [vmem:[#allocation11] ss:$8 sps:$4 sm:$0xff]   ;;  %v7187_v14 = vld [vmem:[#allocation11 + $0x14] ss:$8 sps:$4 sm:$0xff]  }
 0x20d   : > { %1064 = vmatprep.subr.bf16.mxu1 %v7184_v12  ;;  %v7189_v15 = vld [vmem:[#allocation11 + $0x10] ss:$8 sps:$4 sm:$0xff]   ;;  %v7190_v16 = vld [vmem:[#allocation11 + $0x24] ss:$8 sps:$4 sm:$0xff]   ;;  %v7192_v17 = vld [vmem:[#allocation11 + $0x20] ss:$8 sps:$4 sm:$0xff]  }
 0x20e   : > { %6891 = vmatpush3.bf16.msra.mxu0 %v7173_v1  ;;  %1065 = vmatpush1.bf16.msra.mxu1 %v7186_v13  ;;  %v7193_v18 = vld [vmem:[#allocation11 + $0x34] ss:$8 sps:$4 sm:$0xff]   ;;  %v7195_v19 = vld [vmem:[#allocation11 + $0x30] ss:$8 sps:$4 sm:$0xff]   ;;  %v7196_v20 = vld [vmem:[#allocation11 + $0x44] ss:$8 sps:$4 sm:$0xff]   ;;  %v929_v13 = vlaneseq }
 0x20f   : > { %6892 = vmatprep.subr.bf16.mxu0 %v7174_v2  ;;  %1066 = vmatprep.subr.bf16.mxu1 %v7187_v14  ;;  %v7198_v21 = vld [vmem:[#allocation11 + $0x40] ss:$8 sps:$4 sm:$0xff]   ;;  %v7199_v22 = vld [vmem:[#allocation11 + $0x54] ss:$8 sps:$4 sm:$0xff]   ;;  %v7201_v23 = vld [vmem:[#allocation11 + $0x50] ss:$8 sps:$4 sm:$0xff]  }
 0x210   : > { %v7202_v24 = vld [vmem:[#allocation11 + $0x64] ss:$8 sps:$4 sm:$0xff]   ;;  %v7204_v25 = vld [vmem:[#allocation11 + $0x60] ss:$8 sps:$4 sm:$0xff]   ;;  %v7205_v26 = vld [vmem:[#allocation11 + $0x74] ss:$8 sps:$4 sm:$0xff]  }
 0x211   : > { %v7207_v27 = vld [vmem:[#allocation11 + $0x70] ss:$8 sps:$4 sm:$0xff]   ;;  %v8540_v14 = vshrl.u32 %v929_v13, 7 }
 0x212   : > { %6893 = vmatpush3.bf16.msra.mxu0 %v7174_v2  ;;  %1067 = vmatpush1.bf16.msra.mxu1 %v7189_v15  ;;  %v921_v15 = vld [vmem:[#allocation8] sm:$0x1]  ;;  %v7249_v13 = vld [vmem:[#allocation15 + $0xcc] ss:$16 sps:$4 sm:$0xff]  }
 0x213   : > { %6894 = vmatprep.subr.bf16.mxu0 %v7175_v3  ;;  %1068 = vmatprep.subr.bf16.mxu1 %v7190_v16  ;;  %10569 = vst [vmem:[#allocation40_spill] sm:$0xff] %v8540_v14  ;;  %v8543_v16 = vsub.s32 0, %v8540_v14 }
 0x215   : > { %10570 = vst [vmem:[#allocation41_spill] sm:$0xff] %v8543_v16 }
 0x216   : > { %6895 = vmatpush3.bf16.msra.mxu0 %v7175_v3  ;;  %1069 = vmatpush1.bf16.msra.mxu1 %v7192_v17 }
 0x217   : > { %6896 = vmatprep.subr.bf16.mxu0 %v7176_v5  ;;  %1070 = vmatprep.subr.bf16.mxu1 %v7193_v18 }
 0x21a   : > { %6897 = vmatpush3.bf16.msra.mxu0 %v7176_v5  ;;  %1071 = vmatpush1.bf16.msra.mxu1 %v7195_v19  ;;  %v925_v19 = vld [vmem:[#allocation9] sm:$0x1] }
 0x21b   : > { %6898 = vmatprep.subr.bf16.mxu0 %v7177_v6  ;;  %1072 = vmatprep.subr.bf16.mxu1 %v7196_v20 }
 0x21e   : > { %6899 = vmatpush3.bf16.msra.mxu0 %v7177_v6  ;;  %1073 = vmatpush1.bf16.msra.mxu1 %v7198_v21 }
 0x21f   : > { %6900 = vmatprep.subr.bf16.mxu0 %v7178_v7  ;;  %1074 = vmatprep.subr.bf16.mxu1 %v7199_v22 }
 0x222   : > { %6901 = vmatpush3.bf16.msra.mxu0 %v7178_v7  ;;  %1075 = vmatpush1.bf16.msra.mxu1 %v7201_v23 }
 0x223   : > { %6902 = vmatprep.subr.bf16.mxu0 %v7179_v8  ;;  %1076 = vmatprep.subr.bf16.mxu1 %v7202_v24 }
 0x226   : > { %6903 = vmatpush3.bf16.msra.mxu0 %v7179_v8  ;;  %1077 = vmatpush1.bf16.msra.mxu1 %v7204_v25 }
 0x227   : > { %1078 = vmatprep.subr.bf16.mxu1 %v7205_v26 }
 0x229   : > { %6905 = vmatmul.mubr.bf16.vlgmr.msra.gmra.mrb[0].mxu0 %v7181_v9 }
 0x22a   : > { %6908 = vmatprep.mubr.bf16.mxu0 %v7182_v10  ;;  %1079 = vmatpush1.bf16.msra.mxu1 %v7207_v27 }
 0x231   : > { %6909 = vmatmul.mubr.bf16.gmra.mrb[4].mxu0 %v7183_v11 }
 0x2fc   : > { %v6906_v29 = vpop.f32.mrb[0].mxu0 }
 0x2fd   : > { %v851_v30 = vpop.f32.mrb[1].mxu0  ;;  %v897_v36 = vmul.f32 %v6906_v29, %v6906_v29 }
 0x2fe   : > { %v6907_v31 = vpop.f32.mrb[2].mxu0  ;;  %v895_v33 = vmul.f32 %v851_v30, %v851_v30 }
 0x2ff   : > { %v854_v32 = vpop.f32.mrb[3].mxu0  ;;  %v898_v39 = vmul.f32 %v6907_v31, %v6907_v31 }
 0x300   : > { %v882_v34 = vadd.f32 %v854_v32, %v851_v30  ;;  %v896_v35 = vmul.f32 %v854_v32, %v854_v32 }
 0x302   : > { %v883_v37 = vadd.f32 %v6906_v29, %v882_v34  ;;  %v903_v38 = vadd.f32 %v896_v35, %v895_v33 }
 0x304   : > { %v904_v40 = vadd.f32 %v903_v38, %v897_v36  ;;  %v6910_v41 = vpop.f32.mrb[4].mxu0  ;;  %v884_v42 = vadd.f32 %v6907_v31, %v883_v37 }
 0x305   : > { %v867_v43 = vpop.f32.mrb[5].mxu0  ;;  %v901_v52 = vmul.f32 %v6910_v41, %v6910_v41 }
 0x306   : > { %v885_v44 = vadd.f32 %v884_v42, %v867_v43  ;;  %v899_v45 = vmul.f32 %v867_v43, %v867_v43  ;;  %v905_v46 = vadd.f32 %v904_v40, %v898_v39  ;;  %v6911_v47 = vpop.f32.mrb[6].mxu0 }
 0x307   : > { %v870_v48 = vpop.f32.mrb[7].mxu0  ;;  %v902_v55 = vmul.f32 %v6911_v47, %v6911_v47 }
 0x308   : > { %v906_v49 = vadd.f32 %v905_v46, %v899_v45  ;;  %v886_v50 = vadd.f32 %v885_v44, %v870_v48  ;;  %v900_v51 = vmul.f32 %v870_v48, %v870_v48 }
 0x30a   : > { %v887_v53 = vadd.f32 %v6910_v41, %v886_v50  ;;  %v907_v54 = vadd.f32 %v906_v49, %v900_v51 }
 0x30c   : > { %v888_v56 = vadd.f32 %v6911_v47, %v887_v53  ;;  %v908_v57 = vadd.f32 %v907_v54, %v901_v52  ;;  %v7210_v53 = vld [vmem:[#allocation15 + $0x4] ss:$16 sps:$4 sm:$0xff]   ;;  %v7213_v54 = vld [vmem:[#allocation15 + $0xc] ss:$16 sps:$4 sm:$0xff]  }
 0x30d   : > { %1723 = vmatprep.subr.bf16.mxu0 %v7210_v53  ;;  %1796 = vmatprep.subr.bf16.mxu1 %v7213_v54  ;;  %v7298_v53 = vld [vmem:[#allocation15 + $0x1e0] ss:$16 sps:$4 sm:$0xff]   ;;  %v7301_v54 = vld [vmem:[#allocation15 + $0x1e8] ss:$16 sps:$4 sm:$0xff]  }
 0x30e   : > { %v889_v58 = vrot.slane %v888_v56, 4  ;;  %v909_v59 = vadd.f32 %v908_v57, %v902_v55  ;;  %v7208_v55 = vld [vmem:[#allocation15] ss:$16 sps:$4 sm:$0xff]   ;;  %v7216_v57 = vld [vmem:[#allocation15 + $0x24] ss:$16 sps:$4 sm:$0xff]  }
 0x30f   : > { %1724 = vmatpush1.bf16.msra.mxu0 %v7208_v55 }
 0x310   : > { %v890_v60 = vadd.f32 %v889_v58, %v888_v56  ;;  %v910_v61 = vrot.slane %v909_v59, 4  ;;  %v7211_v56 = vld [vmem:[#allocation15 + $0x8] ss:$16 sps:$4 sm:$0xff]   ;;  %v7219_v58 = vld [vmem:[#allocation15 + $0x2c] ss:$16 sps:$4 sm:$0xff]   ;;  %1725 = vmatprep.subr.bf16.mxu0 %v7216_v57 }
 0x312   : > { %v891_v62 = vrot.slane %v890_v60, 2  ;;  %v911_v63 = vadd.f32 %v910_v61, %v909_v59  ;;  %v7214_v59 = vld [vmem:[#allocation15 + $0x20] ss:$16 sps:$4 sm:$0xff]   ;;  %v7222_v61 = vld [vmem:[#allocation15 + $0x44] ss:$16 sps:$4 sm:$0xff]  }
 0x313   : > { %1726 = vmatpush1.bf16.msra.mxu0 %v7214_v59 }
 0x314   : > { %v892_v0 = vadd.f32 %v891_v62, %v890_v60  ;;  %v912_v1 = vrot.slane %v911_v63, 2  ;;  %v7217_v60 = vld [vmem:[#allocation15 + $0x28] ss:$16 sps:$4 sm:$0xff]   ;;  %v7225_v62 = vld [vmem:[#allocation15 + $0x4c] ss:$16 sps:$4 sm:$0xff]   ;;  %1727 = vmatprep.subr.bf16.mxu0 %v7222_v61 }
 0x316   : > { %v893_v2 = vrot.slane %v892_v0, 1  ;;  %v913_v3 = vadd.f32 %v912_v1, %v911_v63  ;;  %v7223_v63 = vld [vmem:[#allocation15 + $0x48] ss:$16 sps:$4 sm:$0xff]   ;;  %v7231_v1 = vld [vmem:[#allocation15 + $0x6c] ss:$16 sps:$4 sm:$0xff]  }
 0x318   : > { %v894_v4 = vadd.f32 %v893_v2, %v892_v0  ;;  %v914_v5 = vrot.slane %v913_v3, 1  ;;  %v7228_v0 = vld [vmem:[#allocation15 + $0x64] ss:$16 sps:$4 sm:$0xff]   ;;  %v7226_v2 = vld [vmem:[#allocation15 + $0x60] ss:$16 sps:$4 sm:$0xff]  }
 0x31a   : > { %v915_v6 = vadd.f32 %v914_v5, %v913_v3  ;;  %v916_v7 = vmul.f32 0.015625, %v894_v4  ;;  %v7229_v3 = vld [vmem:[#allocation15 + $0x68] ss:$16 sps:$4 sm:$0xff]   ;;  %v7234_v4 = vld [vmem:[#allocation15 + $0x84] ss:$16 sps:$4 sm:$0xff]  }
 0x31b   : > { %v7237_v5 = vld [vmem:[#allocation15 + $0x8c] ss:$16 sps:$4 sm:$0xff]  }
 0x31c   : > { %v917_v8 = vmul.f32 0.015625, %v915_v6  ;;  %v918_v9 = vmul.f32 %v916_v7, %v916_v7  ;;  %v7232_v6 = vld [vmem:[#allocation15 + $0x80] ss:$16 sps:$4 sm:$0xff]  }
 0x31e   : > { %v919_v10 = vsub.f32 %v917_v8, %v918_v9  ;;  %v7240_v8 = vld [vmem:[#allocation15 + $0xa4] ss:$16 sps:$4 sm:$0xff]   ;;  %v7243_v9 = vld [vmem:[#allocation15 + $0xac] ss:$16 sps:$4 sm:$0xff]  }
 0x320   : > { %v920_v11 = vmax.f32 %v919_v10, 0.0  ;;  %v7238_v10 = vld [vmem:[#allocation15 + $0xa0] ss:$16 sps:$4 sm:$0xff]  }
 0x322   : > { %v922_v12 = vadd.f32 1e-05, %v920_v11  ;;  %v7241_v11 = vld [vmem:[#allocation15 + $0xa8] ss:$16 sps:$4 sm:$0xff]  }
 0x324   : > { %7304 = vrsqrt.f32 %v922_v12  ;;  %v7246_v12 = vld [vmem:[#allocation15 + $0xc4] ss:$16 sps:$4 sm:$0xff]  }
 0x32e   : > { %v7305_v17 = vpop.eup %7304 }
 0x32f   : > { %v924_v18 = vmul.f32 %v7305_v17, %v921_v15  ;;  %v7244_v15 = vld [vmem:[#allocation15 + $0xc0] ss:$16 sps:$4 sm:$0xff]   ;;  %v7247_v17 = vld [vmem:[#allocation15 + $0xc8] ss:$16 sps:$4 sm:$0xff]  }
 0x331   : > { %v926_v20 = vmul.f32 %v924_v18, %v916_v7  ;;  %v932_v21 = vrot.slane %v924_v18, %v8543_v16  ;;  %v7235_v7 = vld [vmem:[#allocation15 + $0x88] ss:$16 sps:$4 sm:$0xff]   ;;  %v7252_v18 = vld [vmem:[#allocation15 + $0xe4] ss:$16 sps:$4 sm:$0xff]  }
 0x333   : > { %v927_v22 = vsub.f32 %v925_v19, %v926_v20  ;;  %v939_v23 = vmul.f32 %v932_v21, %v870_v48  ;;  %v934_v24 = vmul.f32 %v932_v21, %v851_v30  ;;  %v935_v25 = vmul.f32 %v932_v21, %v854_v32  ;;  %v7255_v19 = vld [vmem:[#allocation15 + $0xec] ss:$16 sps:$4 sm:$0xff]   ;;  %v7250_v20 = vld [vmem:[#allocation15 + $0xe0] ss:$16 sps:$4 sm:$0xff]  }
 0x334   : > { %v936_v26 = vmul.f32 %v6906_v29, %v932_v21  ;;  %v937_v27 = vmul.f32 %v6907_v31, %v932_v21  ;;  %v938_v33 = vmul.f32 %v932_v21, %v867_v43  ;;  %v940_v34 = vmul.f32 %v6910_v41, %v932_v21 }
 0x335   : > { %v946_v35 = vrot.slane %v927_v22, %v8543_v16  ;;  %v941_v36 = vmul.f32 %v6911_v47, %v932_v21  ;;  %v7253_v21 = vld [vmem:[#allocation15 + $0xe8] ss:$16 sps:$4 sm:$0xff]   ;;  %v7258_v22 = vld [vmem:[#allocation15 + $0x104] ss:$16 sps:$4 sm:$0xff]  }
 0x337   : > { %v953_v37 = vadd.f32 %v946_v35, %v939_v23  ;;  %v948_v38 = vadd.f32 %v946_v35, %v934_v24  ;;  %v949_v39 = vadd.f32 %v946_v35, %v935_v25  ;;  %v950_v40 = vadd.f32 %v946_v35, %v936_v26  ;;  %v7261_v23 = vld [vmem:[#allocation15 + $0x10c] ss:$16 sps:$4 sm:$0xff]   ;;  %v7256_v24 = vld [vmem:[#allocation15 + $0x100] ss:$16 sps:$4 sm:$0xff]   ;;  %v7259_v25 = vld [vmem:[#allocation15 + $0x108] ss:$16 sps:$4 sm:$0xff]  }
 0x338   : > { %v951_v42 = vadd.f32 %v946_v35, %v937_v27  ;;  %v952_v44 = vadd.f32 %v946_v35, %v938_v33  ;;  %v954_v45 = vadd.f32 %v946_v35, %v940_v34  ;;  %v955_v46 = vadd.f32 %v946_v35, %v941_v36  ;;  %v7264_v26 = vld [vmem:[#allocation15 + $0x124] ss:$16 sps:$4 sm:$0xff]   ;;  %v7267_v27 = vld [vmem:[#allocation15 + $0x12c] ss:$16 sps:$4 sm:$0xff]   ;;  %v7262_v33 = vld [vmem:[#allocation15 + $0x120] ss:$16 sps:$4 sm:$0xff]  }
 0x339   : > { %v956_v49 = vmax.f32 %v948_v38, 0.0  ;;  %v957_v50 = vmax.f32 %v949_v39, 0.0  ;;  %v958_v48 = vmax.f32 %v950_v40, 0.0  ;;  %v961_v30 = vmax.f32 %v953_v37, 0.0  ;;  %v7265_v34 = vld [vmem:[#allocation15 + $0x128] ss:$16 sps:$4 sm:$0xff]  }
 0x33a   : > { %v959_v32 = vmax.f32 %v951_v42, 0.0  ;;  %v960_v29 = vmax.f32 %v952_v44, 0.0  ;;  %v962_v31 = vmax.f32 %v954_v45, 0.0  ;;  %v963_v43 = vmax.f32 %v955_v46, 0.0  ;;  %v7270_v35 = vld [vmem:[#allocation15 + $0x144] ss:$16 sps:$4 sm:$0xff]  }
 0x33b   : > { %v964_v41 = vpack.c.bf16 %v957_v50, %v956_v49  ;;  %v7273_v36 = vld [vmem:[#allocation15 + $0x14c] ss:$16 sps:$4 sm:$0xff]   ;;  %v7268_v37 = vld [vmem:[#allocation15 + $0x140] ss:$16 sps:$4 sm:$0xff]   ;;  %v7271_v38 = vld [vmem:[#allocation15 + $0x148] ss:$16 sps:$4 sm:$0xff]  }
 0x33c   : > { %v965_v51 = vpack.c.bf16 %v959_v32, %v958_v48  ;;  %v966_v52 = vpack.c.bf16 %v961_v30, %v960_v29  ;;  %v967_v47 = vpack.c.bf16 %v963_v43, %v962_v31  ;;  %v7276_v39 = vld [vmem:[#allocation15 + $0x164] ss:$16 sps:$4 sm:$0xff]   ;;  %v7279_v40 = vld [vmem:[#allocation15 + $0x16c] ss:$16 sps:$4 sm:$0xff]   ;;  %v7274_v42 = vld [vmem:[#allocation15 + $0x160] ss:$16 sps:$4 sm:$0xff]  }
 0x33d   : > { %1097 = vmatmul.mubr.bf16.vlgmr.msra.gmra.mrb[0].mxu1 %v964_v41  ;;  %v7277_v44 = vld [vmem:[#allocation15 + $0x168] ss:$16 sps:$4 sm:$0xff]   ;;  %v7282_v45 = vld [vmem:[#allocation15 + $0x184] ss:$16 sps:$4 sm:$0xff]   ;;  %v7285_v46 = vld [vmem:[#allocation15 + $0x18c] ss:$16 sps:$4 sm:$0xff]  }
 0x33e   : > { %1106 = vmatprep.mubr.bf16.mxu1 %v7974_v28  ;;  %1797 = vmatpush1.bf16.msra.mxu1 %v7211_v56  ;;  %v7280_v49 = vld [vmem:[#allocation15 + $0x180] ss:$16 sps:$4 sm:$0xff]   ;;  %v7283_v50 = vld [vmem:[#allocation15 + $0x188] ss:$16 sps:$4 sm:$0xff]   ;;  %v7288_v48 = vld [vmem:[#allocation15 + $0x1a4] ss:$16 sps:$4 sm:$0xff]  }
 0x33f   : > { %1798 = vmatprep.subr.bf16.mxu1 %v7219_v58  ;;  %v7291_v30 = vld [vmem:[#allocation15 + $0x1ac] ss:$16 sps:$4 sm:$0xff]   ;;  %v7286_v32 = vld [vmem:[#allocation15 + $0x1a0] ss:$16 sps:$4 sm:$0xff]   ;;  %v7289_v29 = vld [vmem:[#allocation15 + $0x1a8] ss:$16 sps:$4 sm:$0xff]  }
 0x340   : > { %v7294_v31 = vld [vmem:[#allocation15 + $0x1c4] ss:$16 sps:$4 sm:$0xff]   ;;  %v7297_v43 = vld [vmem:[#allocation15 + $0x1cc] ss:$16 sps:$4 sm:$0xff]   ;;  %v7292_v41 = vld [vmem:[#allocation15 + $0x1c0] ss:$16 sps:$4 sm:$0xff]  }
 0x342   : > { %1799 = vmatpush1.bf16.msra.mxu1 %v7217_v60 }
 0x343   : > { %1800 = vmatprep.subr.bf16.mxu1 %v7225_v62 }
 0x345   : > { %1107 = vmatmul.mubr.bf16.gmra.mrb[4].mxu1 %v965_v51  ;;  %v7295_v51 = vld [vmem:[#allocation15 + $0x1c8] ss:$16 sps:$4 sm:$0xff]  }
 0x346   : > { %1116 = vmatprep.mubr.bf16.mxu1 %v7974_v28  ;;  %1801 = vmatpush1.bf16.msra.mxu1 %v7223_v63 }
 0x347   : > { %1802 = vmatprep.subr.bf16.mxu1 %v7231_v1 }
 0x34a   : > { %1803 = vmatpush1.bf16.msra.mxu1 %v7229_v3 }
 0x34b   : > { %1804 = vmatprep.subr.bf16.mxu1 %v7237_v5 }
 0x34d   : > { %1117 = vmatmul.mubr.bf16.gmra.mrb[8].mxu1 %v966_v52  ;;  %v7300_v52 = vld [vmem:[#allocation15 + $0x1e4] ss:$16 sps:$4 sm:$0xff]  }
 0x34e   : > { %1126 = vmatprep.mubr.bf16.mxu1 %v7974_v28  ;;  %v7220_v28 = vld [vmem:[#allocation15 + $0x40] ss:$16 sps:$4 sm:$0xff]   ;;  %1805 = vmatpush1.bf16.msra.mxu1 %v7235_v7 }
 0x34f   : > { %1728 = vmatpush1.bf16.msra.mxu0 %v7220_v28  ;;  %1806 = vmatprep.subr.bf16.mxu1 %v7243_v9 }
 0x350   : > { %1729 = vmatprep.subr.bf16.mxu0 %v7228_v0 }
 0x352   : > { %1807 = vmatpush1.bf16.msra.mxu1 %v7241_v11 }
 0x353   : > { %1730 = vmatpush1.bf16.msra.mxu0 %v7226_v2  ;;  %1808 = vmatprep.subr.bf16.mxu1 %v7249_v13 }
 0x354   : > { %1731 = vmatprep.subr.bf16.mxu0 %v7234_v4 }
 0x355   : > { %1127 = vmatmul.mubr.bf16.gmra.mrb[12].mxu1 %v967_v47  ;;  %v7303_v47 = vld [vmem:[#allocation15 + $0x1ec] ss:$16 sps:$4 sm:$0xff]  }
 0x356   : > { %1809 = vmatpush1.bf16.msra.mxu1 %v7247_v17 }
 0x357   : > { %1732 = vmatpush1.bf16.msra.mxu0 %v7232_v6  ;;  %1810 = vmatprep.subr.bf16.mxu1 %v7255_v19 }
 0x358   : > { %1733 = vmatprep.subr.bf16.mxu0 %v7240_v8 }
 0x35a   : > { %1811 = vmatpush1.bf16.msra.mxu1 %v7253_v21 }
 0x35b   : > { %1734 = vmatpush1.bf16.msra.mxu0 %v7238_v10  ;;  %1812 = vmatprep.subr.bf16.mxu1 %v7261_v23 }
 0x35c   : > { %1735 = vmatprep.subr.bf16.mxu0 %v7246_v12 }
 0x35e   : > { %1813 = vmatpush1.bf16.msra.mxu1 %v7259_v25 }
 0x35f   : > { %1736 = vmatpush1.bf16.msra.mxu0 %v7244_v15  ;;  %1814 = vmatprep.subr.bf16.mxu1 %v7267_v27 }
 0x360   : > { %1737 = vmatprep.subr.bf16.mxu0 %v7252_v18 }
 0x362   : > { %1815 = vmatpush1.bf16.msra.mxu1 %v7265_v34 }
 0x363   : > { %1738 = vmatpush1.bf16.msra.mxu0 %v7250_v20  ;;  %1816 = vmatprep.subr.bf16.mxu1 %v7273_v36 }
 0x364   : > { %1739 = vmatprep.subr.bf16.mxu0 %v7258_v22 }
 0x366   : > { %1817 = vmatpush1.bf16.msra.mxu1 %v7271_v38 }
 0x367   : > { %1740 = vmatpush1.bf16.msra.mxu0 %v7256_v24  ;;  %1818 = vmatprep.subr.bf16.mxu1 %v7279_v40 }
 0x368   : > { %1741 = vmatprep.subr.bf16.mxu0 %v7264_v26 }
 0x36a   : > { %1819 = vmatpush1.bf16.msra.mxu1 %v7277_v44 }
 0x36b   : > { %1742 = vmatpush1.bf16.msra.mxu0 %v7262_v33  ;;  %1820 = vmatprep.subr.bf16.mxu1 %v7285_v46 }
 0x36c   : > { %1743 = vmatprep.subr.bf16.mxu0 %v7270_v35 }
 0x36e   : > { %1821 = vmatpush1.bf16.msra.mxu1 %v7283_v50 }
 0x36f   : > { %1744 = vmatpush1.bf16.msra.mxu0 %v7268_v37  ;;  %1822 = vmatprep.subr.bf16.mxu1 %v7291_v30 }
 0x370   : > { %1745 = vmatprep.subr.bf16.mxu0 %v7276_v39 }
 0x372   : > { %1823 = vmatpush1.bf16.msra.mxu1 %v7289_v29 }
 0x373   : > { %1746 = vmatpush1.bf16.msra.mxu0 %v7274_v42  ;;  %1824 = vmatprep.subr.bf16.mxu1 %v7297_v43 }
 0x374   : > { %1747 = vmatprep.subr.bf16.mxu0 %v7282_v45 }
 0x376   : > { %1825 = vmatpush1.bf16.msra.mxu1 %v7295_v51 }
 0x377   : > { %1748 = vmatpush1.bf16.msra.mxu0 %v7280_v49  ;;  %1826 = vmatprep.subr.bf16.mxu1 %v7303_v47 }
 0x378   : > { %1749 = vmatprep.subr.bf16.mxu0 %v7288_v48 }
 0x37a   : > { %1827 = vmatpush1.bf16.msra.mxu1 %v7301_v54 }
 0x37b   : > { %1750 = vmatpush1.bf16.msra.mxu0 %v7286_v32 }
 0x37c   : > { %1751 = vmatprep.subr.bf16.mxu0 %v7294_v31 }
 0x37f   : > { %1752 = vmatpush1.bf16.msra.mxu0 %v7292_v41 }
 0x380   : > { %1753 = vmatprep.subr.bf16.mxu0 %v7300_v52 }
 0x383   : > { %1754 = vmatpush1.bf16.msra.mxu0 %v7298_v53 }
 0x410   : > { %v8550_v55 = vpop.f32.mrb[0].mxu1 }
 0x411   : > { %v8552_v56 = vpop.f32.mrb[1].mxu1  ;;  %v1163_v58 = vmul.f32 %v8550_v55, %v8550_v55 }
 0x412   : > { %v8554_v57 = vpop.f32.mrb[2].mxu1  ;;  %v1164_v62 = vmul.f32 %v8552_v56, %v8552_v56 }
 0x413   : > { %v1137_v59 = vadd.f32 %v8554_v57, %v8550_v55  ;;  %v1165_v60 = vmul.f32 %v8554_v57, %v8554_v57  ;;  %v8562_v61 = vpop.f32.mrb[3].mxu1 }
 0x414   : > { %v1150_v28 = vadd.f32 %v8562_v61, %v8552_v56  ;;  %v1166_v63 = vmul.f32 %v8562_v61, %v8562_v61 }
 0x415   : > { %v1179_v0 = vadd.f32 %v1165_v60, %v1163_v58 }
 0x416   : > { %v1192_v1 = vadd.f32 %v1166_v63, %v1164_v62 }
 0x418   : > { %v8570_v2 = vpop.f32.mrb[4].mxu1 }
 0x419   : > { %v1138_v3 = vadd.f32 %v1137_v59, %v8570_v2  ;;  %v1167_v4 = vmul.f32 %v8570_v2, %v8570_v2  ;;  %v8575_v5 = vpop.f32.mrb[5].mxu1 }
 0x41a   : > { %v1151_v6 = vadd.f32 %v1150_v28, %v8575_v5  ;;  %v1168_v7 = vmul.f32 %v8575_v5, %v8575_v5  ;;  %v8580_v8 = vpop.f32.mrb[6].mxu1 }
 0x41b   : > { %v1180_v9 = vadd.f32 %v1179_v0, %v1167_v4  ;;  %v1139_v10 = vadd.f32 %v1138_v3, %v8580_v8  ;;  %v1169_v11 = vmul.f32 %v8580_v8, %v8580_v8  ;;  %v8585_v12 = vpop.f32.mrb[7].mxu1 }
 0x41c   : > { %v1193_v13 = vadd.f32 %v1192_v1, %v1168_v7  ;;  %v1152_v15 = vadd.f32 %v1151_v6, %v8585_v12  ;;  %v1170_v17 = vmul.f32 %v8585_v12, %v8585_v12 }
 0x41d   : > { %v1181_v18 = vadd.f32 %v1180_v9, %v1169_v11 }
 0x41e   : > { %v1194_v19 = vadd.f32 %v1193_v13, %v1170_v17 }
 0x420   : > { %v8590_v20 = vpop.f32.mrb[8].mxu1 }
 0x421   : > { %v1140_v21 = vadd.f32 %v1139_v10, %v8590_v20  ;;  %v1171_v22 = vmul.f32 %v8590_v20, %v8590_v20  ;;  %v8595_v23 = vpop.f32.mrb[9].mxu1 }
 0x422   : > { %v1153_v24 = vadd.f32 %v1152_v15, %v8595_v23  ;;  %v1172_v25 = vmul.f32 %v8595_v23, %v8595_v23  ;;  %v8600_v26 = vpop.f32.mrb[10].mxu1 }
 0x423   : > { %v1182_v27 = vadd.f32 %v1181_v18, %v1171_v22  ;;  %v1141_v33 = vadd.f32 %v1140_v21, %v8600_v26  ;;  %v1173_v34 = vmul.f32 %v8600_v26, %v8600_v26  ;;  %v8605_v35 = vpop.f32.mrb[11].mxu1 }
 0x424   : > { %v1195_v36 = vadd.f32 %v1194_v19, %v1172_v25  ;;  %v1154_v37 = vadd.f32 %v1153_v24, %v8605_v35  ;;  %v1174_v38 = vmul.f32 %v8605_v35, %v8605_v35 }
 0x425   : > { %v1183_v39 = vadd.f32 %v1182_v27, %v1173_v34 }
 0x426   : > { %v1196_v40 = vadd.f32 %v1195_v36, %v1174_v38 }
 0x428   : > { %v8610_v42 = vpop.f32.mrb[12].mxu1 }
 0x429   : > { %v1142_v44 = vadd.f32 %v1141_v33, %v8610_v42  ;;  %v1175_v45 = vmul.f32 %v8610_v42, %v8610_v42  ;;  %v8615_v46 = vpop.f32.mrb[13].mxu1 }
 0x42a   : > { %v1155_v49 = vadd.f32 %v1154_v37, %v8615_v46  ;;  %v1176_v50 = vmul.f32 %v8615_v46, %v8615_v46  ;;  %v8620_v48 = vpop.f32.mrb[14].mxu1 }
 0x42b   : > { %v1184_v30 = vadd.f32 %v1183_v39, %v1175_v45  ;;  %v1143_v32 = vadd.f32 %v1142_v44, %v8620_v48  ;;  %v1177_v29 = vmul.f32 %v8620_v48, %v8620_v48  ;;  %v1134_v31 = vpop.f32.mrb[15].mxu1 }
 0x42c   : > { %v1197_v43 = vadd.f32 %v1196_v40, %v1176_v50  ;;  %v1156_v41 = vadd.f32 %v1155_v49, %v1134_v31  ;;  %v1178_v51 = vmul.f32 %v1134_v31, %v1134_v31  ;;  %v7975_v49 = vmov 1966171168  }
 0x42d   : > { %v1144_v52 = vrot.slane %v1143_v32, 4  ;;  %v1185_v47 = vadd.f32 %v1184_v30, %v1177_v29  ;;  %v1224_v50 = vunpack.c.l.s4 %v7975_v49 }
 0x42e   : > { %v1157_v53 = vrot.slane %v1156_v41, 4  ;;  %v1198_v54 = vadd.f32 %v1197_v43, %v1178_v51 }
 0x42f   : > { %v1145_v58 = vadd.f32 %v1144_v52, %v1143_v32  ;;  %v1186_v59 = vrot.slane %v1185_v47, 4  ;;  %v1225_v30 = vunpack.c.0.s8 %v1224_v50  ;;  %v1215_v52 = vld [vmem:[#allocation12] sm:$0x3] }
 0x430   : > { %v1158_v60 = vadd.f32 %v1157_v53, %v1156_v41  ;;  %v1199_v62 = vrot.slane %v1198_v54, 4  ;;  %v8631_v53 = vsub.s32 1, %v8540_v14 }
 0x431   : > { %v1146_v28 = vrot.slane %v1145_v58, 2  ;;  %v1187_v63 = vadd.f32 %v1186_v59, %v1185_v47  ;;  %v8626_v29 = vsub.s32 %v1225_v30, %v8540_v14 }
 0x432   : > { %v1159_v0 = vrot.slane %v1158_v60, 2  ;;  %v1200_v1 = vadd.f32 %v1199_v62, %v1198_v54  ;;  %10572 = vst [vmem:[#allocation43_spill] sm:$0xff] %v8631_v53 }
 0x433   : > { %v1147_v3 = vadd.f32 %v1146_v28, %v1145_v58  ;;  %v1188_v4 = vrot.slane %v1187_v63, 2  ;;  %10571 = vst [vmem:[#allocation42_spill] sm:$0xff] %v8626_v29 }
 0x434   : > { %v1160_v6 = vadd.f32 %v1159_v0, %v1158_v60  ;;  %v1201_v7 = vrot.slane %v1200_v1, 2 }
 0x435   : > { %v1148_v9 = vrot.slane %v1147_v3, 1  ;;  %v1189_v10 = vadd.f32 %v1188_v4, %v1187_v63 }
 0x436   : > { %v1161_v11 = vrot.slane %v1160_v6, 1  ;;  %v1202_v13 = vadd.f32 %v1201_v7, %v1200_v1 }
 0x437   : > { %v1149_v15 = vadd.f32 %v1148_v9, %v1147_v3  ;;  %v1190_v17 = vrot.slane %v1189_v10, 1 }
 0x438   : > { %v1162_v18 = vadd.f32 %v1161_v11, %v1160_v6  ;;  %v1203_v19 = vrot.slane %v1202_v13, 1 }
 0x439   : > { %v1191_v21 = vadd.f32 %v1190_v17, %v1189_v10  ;;  %v1205_v22 = vmul.f32 0.015625, %v1149_v15 }
 0x43a   : > { %v1204_v24 = vadd.f32 %v1203_v19, %v1202_v13  ;;  %v1206_v25 = vmul.f32 0.015625, %v1162_v18  ;;  %v1239_v13 = vld [vmem:[#allocation14] sm:$0x3] }
 0x43b   : > { %v1207_v27 = vmul.f32 0.015625, %v1191_v21  ;;  %v1209_v33 = vmul.f32 %v1205_v22, %v1205_v22 }
 0x43c   : > { %v1208_v34 = vmul.f32 0.015625, %v1204_v24  ;;  %v1210_v36 = vmul.f32 %v1206_v25, %v1206_v25 }
 0x43d   : > { %v1211_v37 = vsub.f32 %v1207_v27, %v1209_v33 }
 0x43e   : > { %v1212_v38 = vsub.f32 %v1208_v34, %v1210_v36 }
 0x43f   : > { %v1213_v39 = vmax.f32 %v1211_v37, 0.0 }
 0x440   : > { %v1214_v40 = vmax.f32 %v1212_v38, 0.0 }
 0x441   : > { %v1216_v44 = vadd.f32 1e-05, %v1213_v39 }
 0x442   : > { %v1217_v45 = vadd.f32 1e-05, %v1214_v40 }
 0x443   : > { %7306 = vrsqrt.f32 %v1216_v44 }
 0x444   : > { %7308 = vrsqrt.f32 %v1217_v45 }
 0x44d   : > { %v7307_v32 = vpop.eup %7306 }
 0x44e   : > { %v7309_v43 = vpop.eup %7308 }
 0x44f   : > { %v1222_v41 = vcombine.low %v7307_v32, %v7309_v43 }
 0x451   : > { %v1229_v51 = vrot.slane %v1222_v41, %v8626_v29 }
 0x453   : > { %v1236_v47 = vrot.slane %v1229_v51, %v8626_v29 }
 0x455   : > { %v1238_v54 = vmul.f32 %v1236_v47, %v1215_v52 }
 0x457   : > { %v1244_v58 = vrot.slane %v1238_v54, %v8543_v16  ;;  %v1248_v59 = vrot.slane %v1238_v54, %v8631_v53 }
 0x459   : > { %v1251_v60 = vmul.f32 %v1244_v58, %v1205_v22  ;;  %v1252_v62 = vmul.f32 %v1248_v59, %v1206_v25  ;;  %v1287_v28 = vmul.f32 %v1248_v59, %v1134_v31  ;;  %v1273_v63 = vmul.f32 %v1248_v59, %v8552_v56 }
 0x45a   : > { %v1275_v0 = vmul.f32 %v1248_v59, %v8562_v61  ;;  %v1272_v1 = vmul.f32 %v1244_v58, %v8550_v55  ;;  %v1274_v3 = vmul.f32 %v1244_v58, %v8554_v57  ;;  %v1277_v4 = vmul.f32 %v1248_v59, %v8575_v5 }
 0x45b   : > { %v1255_v6 = vcombine.low %v1251_v60, %v1252_v62  ;;  %v1279_v7 = vmul.f32 %v1248_v59, %v8585_v12  ;;  %v1276_v9 = vmul.f32 %v1244_v58, %v8570_v2  ;;  %v1278_v10 = vmul.f32 %v1244_v58, %v8580_v8 }
 0x45c   : > { %v1281_v11 = vmul.f32 %v1248_v59, %v8595_v23  ;;  %v1283_v31 = vmul.f32 %v1248_v59, %v8605_v35  ;;  %v1280_v56 = vmul.f32 %v1244_v58, %v8590_v20  ;;  %v1282_v61 = vmul.f32 %v1244_v58, %v8600_v26 }
 0x45d   : > { %v1262_v55 = vrot.slane %v1255_v6, %v8626_v29  ;;  %v1285_v57 = vmul.f32 %v1248_v59, %v8615_v46  ;;  %v1284_v5 = vmul.f32 %v1244_v58, %v8610_v42  ;;  %v1286_v12 = vmul.f32 %v1244_v58, %v8620_v48 }
 0x45f   : > { %v1269_v2 = vrot.slane %v1262_v55, %v8626_v29 }
 0x461   : > { %v1271_v8 = vsub.f32 %v1239_v13, %v1269_v2  ;;  %v2269_v2 = vld [vmem:[#allocation20 + $0x80] sm:$0xff] }
 0x463   : > { %v1292_v23 = vrot.slane %v1271_v8, %v8543_v16  ;;  %v1296_v35 = vrot.slane %v1271_v8, %v8631_v53  ;;  %v2273_v8 = vld [vmem:[#allocation20 + $0xa0] sm:$0xff] }
 0x465   : > { %v1314_v15 = vadd.f32 %v1296_v35, %v1287_v28  ;;  %v1300_v20 = vadd.f32 %v1296_v35, %v1273_v63  ;;  %v1302_v17 = vadd.f32 %v1296_v35, %v1275_v0  ;;  %v1299_v26 = vadd.f32 %v1292_v23, %v1272_v1  ;;  %v2253_v1 = vld [vmem:[#allocation20] sm:$0xff] }
 0x466   : > { %v1301_v18 = vadd.f32 %v1292_v23, %v1274_v3  ;;  %v1304_v19 = vadd.f32 %v1296_v35, %v1277_v4  ;;  %v1306_v21 = vadd.f32 %v1296_v35, %v1279_v7  ;;  %v1303_v46 = vadd.f32 %v1292_v23, %v1276_v9  ;;  %v2257_v3 = vld [vmem:[#allocation20 + $0x20] sm:$0xff]  ;;  %v2254_v4 = vld [vmem:[#allocation20 + $0x8] sm:$0xff] }
 0x467   : > { %v1316_v22 = vmax.f32 %v1300_v20, 0.0  ;;  %v1318_v42 = vmax.f32 %v1302_v17, 0.0  ;;  %v1315_v24 = vmax.f32 %v1299_v26, 0.0  ;;  %v1305_v48 = vadd.f32 %v1292_v23, %v1278_v10  ;;  %v2258_v7 = vld [vmem:[#allocation20 + $0x28] sm:$0xff] }
 0x468   : > { %v1317_v25 = vmax.f32 %v1301_v18, 0.0  ;;  %v1320_v27 = vmax.f32 %v1304_v19, 0.0  ;;  %v1322_v33 = vmax.f32 %v1306_v21, 0.0  ;;  %v1319_v34 = vmax.f32 %v1303_v46, 0.0  ;;  %v2277_v18 = vld [vmem:[#allocation20 + $0xc0] sm:$0xff]  ;;  %v2278_v21 = vld [vmem:[#allocation20 + $0xc8] sm:$0xff] }
 0x469   : > { %v1332_v36 = vpack.c.bf16 %v1318_v42, %v1316_v22  ;;  %v1321_v37 = vmax.f32 %v1305_v48, 0.0  ;;  %v1308_v38 = vadd.f32 %v1296_v35, %v1281_v11  ;;  %v1310_v39 = vadd.f32 %v1296_v35, %v1283_v31  ;;  %v2261_v31 = vld [vmem:[#allocation20 + $0x40] sm:$0xff]  ;;  %v2282_v22 = vld [vmem:[#allocation20 + $0xe8] sm:$0xff] }
 0x46a   : > { %v1331_v40 = vpack.c.bf16 %v1317_v25, %v1315_v24  ;;  %v1334_v44 = vpack.c.bf16 %v1322_v33, %v1320_v27  ;;  %v1307_v45 = vadd.f32 %v1292_v23, %v1280_v56  ;;  %v1309_v49 = vadd.f32 %v1292_v23, %v1282_v61  ;;  %v2265_v56 = vld [vmem:[#allocation20 + $0x60] sm:$0xff]  ;;  %v2262_v61 = vld [vmem:[#allocation20 + $0x48] sm:$0xff] }
 0x46b   : > { %1755 = vmatprep.mubr.bf16.mxu0 %v1332_v36  ;;  %1828 = vmatprep.mubr.bf16.mxu1 %v1332_v36  ;;  %v1333_v50 = vpack.c.bf16 %v1321_v37, %v1319_v34  ;;  %v1324_v30 = vmax.f32 %v1308_v38, 0.0  ;;  %v1326_v32 = vmax.f32 %v1310_v39, 0.0  ;;  %v1312_v43 = vadd.f32 %v1296_v35, %v1285_v57  ;;  %v2266_v57 = vld [vmem:[#allocation20 + $0x68] sm:$0xff]  ;;  %v2281_v19 = vld [vmem:[#allocation20 + $0xe0] sm:$0xff] }
 0x46c   : > { %1756 = vmatmul.mubr.bf16.vlgmr.msra.gmra.mrb[8].mxu0 %v1331_v40  ;;  %1829 = vmatmul.mubr.bf16.vlgmr.msra.gmra.mrb[16].mxu1 %v1331_v40  ;;  %v1323_v41 = vmax.f32 %v1307_v45, 0.0  ;;  %v1325_v51 = vmax.f32 %v1309_v49, 0.0  ;;  %v1330_v52 = vmax.f32 %v1314_v15, 0.0  ;;  %v1311_v47 = vadd.f32 %v1292_v23, %v1284_v5  ;;  %v2274_v15 = vld [vmem:[#allocation20 + $0xa8] sm:$0xff]  ;;  %v2285_v25 = vld [vmem:[#allocation20 + $0x100] sm:$0xff] }
 0x46d   : > { %1765 = vmatprep.mubr.bf16.mxu0 %v1334_v44  ;;  %1838 = vmatprep.mubr.bf16.mxu1 %v1334_v44  ;;  %v1336_v54 = vpack.c.bf16 %v1326_v32, %v1324_v30  ;;  %v1328_v58 = vmax.f32 %v1312_v43, 0.0  ;;  %v1313_v59 = vadd.f32 %v1292_v23, %v1286_v12  ;;  %v6392_v6 = vcombine.high %v2253_v1, %v2257_v3  ;;  %v2270_v23 = vld [vmem:[#allocation20 + $0x88] sm:$0xff]  ;;  %v2289_v27 = vld [vmem:[#allocation20 + $0x120] sm:$0xff] }
 0x46e   : > { %v1335_v60 = vpack.c.bf16 %v1325_v51, %v1323_v41  ;;  %v1327_v62 = vmax.f32 %v1311_v47, 0.0  ;;  %v6391_v9 = vcombine.low %v2253_v1, %v2257_v3  ;;  %v6393_v10 = vcombine.low %v2254_v4, %v2258_v7  ;;  %v2286_v33 = vld [vmem:[#allocation20 + $0x108] sm:$0xff]  ;;  %v2293_v40 = vld [vmem:[#allocation20 + $0x140] sm:$0xff] }
 0x46f   : > { %v1338_v28 = vpack.c.bf16 %v1330_v52, %v1328_v58  ;;  %v1329_v63 = vmax.f32 %v1313_v59, 0.0  ;;  %v6394_v11 = vcombine.high %v2254_v4, %v2258_v7  ;;  %3789 = vmatprep.subr.bf16.mxu0 %v6392_v6  ;;  %v6400_v55 = vcombine.high %v2261_v31, %v2265_v56  ;;  %v2290_v36 = vld [vmem:[#allocation20 + $0x128] sm:$0xff]  ;;  %v2297_v44 = vld [vmem:[#allocation20 + $0x160] sm:$0xff] }
 0x470   : > { %3790 = vmatpush1.bf16.msra.mxu0 %v6391_v9  ;;  %v6399_v5 = vcombine.low %v2261_v31, %v2265_v56  ;;  %v6401_v12 = vcombine.low %v2262_v61, %v2266_v57  ;;  %v6402_v13 = vcombine.high %v2262_v61, %v2266_v57  ;;  %v6408_v35 = vcombine.high %v2269_v2, %v2273_v8  ;;  %v2294_v45 = vld [vmem:[#allocation20 + $0x148] sm:$0xff]  ;;  %v2301_v41 = vld [vmem:[#allocation20 + $0x180] sm:$0xff] }
 0x471   : > { %v1337_v0 = vpack.c.bf16 %v1329_v63, %v1327_v62  ;;  %3935 = vmatprep.subr.bf16.mxu1 %v6394_v11  ;;  %3791 = vmatprep.subr.bf16.mxu0 %v6400_v55  ;;  %v6407_v20 = vcombine.low %v2269_v2, %v2273_v8  ;;  %v6409_v17 = vcombine.low %v2270_v23, %v2274_v15  ;;  %v2305_v51 = vld [vmem:[#allocation20 + $0x1a0] sm:$0xff]  ;;  %v2302_v52 = vld [vmem:[#allocation20 + $0x188] sm:$0xff] }
 0x472   : > { %3936 = vmatpush1.bf16.msra.mxu1 %v6393_v10  ;;  %v6410_v26 = vcombine.high %v2270_v23, %v2274_v15  ;;  %v6416_v46 = vcombine.high %v2277_v18, %v2281_v19  ;;  %v6415_v42 = vcombine.low %v2277_v18, %v2281_v19  ;;  %v6417_v24 = vcombine.low %v2278_v21, %v2282_v22  ;;  %v2309_v62 = vld [vmem:[#allocation20 + $0x1c0] sm:$0xff]  ;;  %v2310_v63 = vld [vmem:[#allocation20 + $0x1c8] sm:$0xff] }
 0x473   : > { %3937 = vmatprep.subr.bf16.mxu1 %v6402_v13  ;;  %v6418_v48 = vcombine.high %v2278_v21, %v2282_v22  ;;  %v6424_v34 = vcombine.high %v2285_v25, %v2289_v27  ;;  %v6423_v37 = vcombine.low %v2285_v25, %v2289_v27  ;;  %v6425_v38 = vcombine.low %v2286_v33, %v2290_v36  ;;  %v2314_v1 = vld [vmem:[#allocation20 + $0x1e8] sm:$0xff]  ;;  %v2317_v7 = vld [vmem:[#allocation20 + $0x200] sm:$0xff] }
 0x474   : > { %1766 = vmatmul.mubr.bf16.gmra.mrb[12].mxu0 %v1333_v50  ;;  %1839 = vmatmul.mubr.bf16.gmra.mrb[20].mxu1 %v1333_v50  ;;  %v6426_v39 = vcombine.high %v2286_v33, %v2290_v36  ;;  %v6432_v49 = vcombine.high %v2293_v40, %v2297_v44  ;;  %v2298_v50 = vld [vmem:[#allocation20 + $0x168] sm:$0xff]  ;;  %v6431_v30 = vcombine.low %v2293_v40, %v2297_v44  ;;  %v2321_v9 = vld [vmem:[#allocation20 + $0x220] sm:$0xff] }
 0x475   : > { %1775 = vmatprep.mubr.bf16.mxu0 %v1336_v54  ;;  %1848 = vmatprep.mubr.bf16.mxu1 %v1336_v54  ;;  %v6433_v32 = vcombine.low %v2294_v45, %v2298_v50  ;;  %v6434_v43 = vcombine.high %v2294_v45, %v2298_v50  ;;  %v6440_v47 = vcombine.high %v2301_v41, %v2305_v51  ;;  %v2306_v54 = vld [vmem:[#allocation20 + $0x1a8] sm:$0xff]  ;;  %v2325_v57 = vld [vmem:[#allocation20 + $0x240] sm:$0xff] }
 0x476   : > { %3792 = vmatpush1.bf16.msra.mxu0 %v6399_v5  ;;  %3938 = vmatpush1.bf16.msra.mxu1 %v6401_v12  ;;  %v6439_v58 = vcombine.low %v2301_v41, %v2305_v51  ;;  %v6441_v59 = vcombine.low %v2302_v52, %v2306_v54  ;;  %v6449_v4 = vcombine.low %v2310_v63, %v2314_v1  ;;  %v2318_v10 = vld [vmem:[#allocation20 + $0x208] sm:$0xff]  ;;  %v2329_v5 = vld [vmem:[#allocation20 + $0x260] sm:$0xff] }
 0x477   : > { %3793 = vmatprep.subr.bf16.mxu0 %v6408_v35  ;;  %3939 = vmatprep.subr.bf16.mxu1 %v6410_v26  ;;  %v6450_v6 = vcombine.high %v2310_v63, %v2314_v1  ;;  %v6456_v11 = vcombine.high %v2317_v7, %v2321_v9  ;;  %v2322_v31 = vld [vmem:[#allocation20 + $0x228] sm:$0xff]  ;;  %v6455_v56 = vcombine.low %v2317_v7, %v2321_v9  ;;  %v2333_v15 = vld [vmem:[#allocation20 + $0x280] sm:$0xff] }
 0x478   : > { %v6457_v61 = vcombine.low %v2318_v10, %v2322_v31  ;;  %v6458_v55 = vcombine.high %v2318_v10, %v2322_v31  ;;  %v2326_v12 = vld [vmem:[#allocation20 + $0x248] sm:$0xff]  ;;  %v6464_v13 = vcombine.high %v2325_v57, %v2329_v5  ;;  %v6463_v8 = vcombine.low %v2325_v57, %v2329_v5  ;;  %v2341_v22 = vld [vmem:[#allocation20 + $0x2c0] sm:$0xff] }
 0x479   : > { %v2330_v2 = vld [vmem:[#allocation20 + $0x268] sm:$0xff]  ;;  %v2349_v36 = vld [vmem:[#allocation20 + $0x300] sm:$0xff] }
 0x47a   : > { %3794 = vmatpush1.bf16.msra.mxu0 %v6407_v20  ;;  %3940 = vmatpush1.bf16.msra.mxu1 %v6409_v17  ;;  %v6465_v23 = vcombine.low %v2326_v12, %v2330_v2  ;;  %v6466_v35 = vcombine.high %v2326_v12, %v2330_v2  ;;  %v2337_v20 = vld [vmem:[#allocation20 + $0x2a0] sm:$0xff]  ;;  %v2334_v17 = vld [vmem:[#allocation20 + $0x288] sm:$0xff] }
 0x47b   : > { %3795 = vmatprep.subr.bf16.mxu0 %v6416_v46  ;;  %3941 = vmatprep.subr.bf16.mxu1 %v6418_v48  ;;  %v6472_v26 = vcombine.high %v2333_v15, %v2337_v20  ;;  %v2338_v18 = vld [vmem:[#allocation20 + $0x2a8] sm:$0xff]  ;;  %v6471_v19 = vcombine.low %v2333_v15, %v2337_v20  ;;  %v2357_v50 = vld [vmem:[#allocation20 + $0x340] sm:$0xff] }
 0x47c   : > { %1776 = vmatmul.mubr.bf16.gmra.mrb[16].mxu0 %v1335_v60  ;;  %1849 = vmatmul.mubr.bf16.gmra.mrb[24].mxu1 %v1335_v60  ;;  %v6442_v60 = vcombine.high %v2302_v52, %v2306_v54  ;;  %v6473_v21 = vcombine.low %v2334_v17, %v2338_v18  ;;  %v6474_v46 = vcombine.high %v2334_v17, %v2338_v18  ;;  %v2346_v25 = vld [vmem:[#allocation20 + $0x2e8] sm:$0xff]  ;;  %v2365_v54 = vld [vmem:[#allocation20 + $0x380] sm:$0xff] }
 0x47d   : > { %1785 = vmatprep.mubr.bf16.mxu0 %v1338_v28  ;;  %1858 = vmatprep.mubr.bf16.mxu1 %v1338_v28  ;;  %v2313_v28 = vld [vmem:[#allocation20 + $0x1e0] sm:$0xff]  ;;  %v2354_v40 = vld [vmem:[#allocation20 + $0x328] sm:$0xff] }
 0x47e   : > { %3796 = vmatpush1.bf16.msra.mxu0 %v6415_v42  ;;  %3942 = vmatpush1.bf16.msra.mxu1 %v6417_v24  ;;  %v6447_v3 = vcombine.low %v2309_v62, %v2313_v28  ;;  %v2345_v42 = vld [vmem:[#allocation20 + $0x2e0] sm:$0xff]  ;;  %v2342_v24 = vld [vmem:[#allocation20 + $0x2c8] sm:$0xff] }
 0x47f   : > { %3797 = vmatprep.subr.bf16.mxu0 %v6424_v34  ;;  %3943 = vmatprep.subr.bf16.mxu1 %v6426_v39  ;;  %v6480_v48 = vcombine.high %v2341_v22, %v2345_v42  ;;  %v6479_v27 = vcombine.low %v2341_v22, %v2345_v42  ;;  %v6481_v33 = vcombine.low %v2342_v24, %v2346_v25  ;;  %v2362_v41 = vld [vmem:[#allocation20 + $0x368] sm:$0xff]  ;;  %v2373_v63 = vld [vmem:[#allocation20 + $0x3c0] sm:$0xff] }
 0x480   : > { %v6482_v34 = vcombine.high %v2342_v24, %v2346_v25  ;;  %v2378_v7 = vld [vmem:[#allocation20 + $0x3e8] sm:$0xff]  ;;  %v8654_v31 = vld [vmem:[#allocation20 + $0x400] sm:$0xff] }
 0x481   : > { %10573 = vst [vmem:[#allocation44_spill] sm:$0xff] %v8654_v31  ;;  %v8664_v5 = vld [vmem:[#allocation20 + $0x428] sm:$0xff] }
 0x482   : > { %3798 = vmatpush1.bf16.msra.mxu0 %v6423_v37  ;;  %3944 = vmatpush1.bf16.msra.mxu1 %v6425_v38  ;;  %v2353_v37 = vld [vmem:[#allocation20 + $0x320] sm:$0xff]  ;;  %v2350_v38 = vld [vmem:[#allocation20 + $0x308] sm:$0xff]  ;;  %10576 = vst [vmem:[#allocation47_spill] sm:$0xff] %v8664_v5 }
 0x483   : > { %3799 = vmatprep.subr.bf16.mxu0 %v6432_v49  ;;  %3945 = vmatprep.subr.bf16.mxu1 %v6434_v43  ;;  %v6488_v39 = vcombine.high %v2349_v36, %v2353_v37  ;;  %v6487_v44 = vcombine.low %v2349_v36, %v2353_v37  ;;  %v6489_v45 = vcombine.low %v2350_v38, %v2354_v40 }
 0x484   : > { %1786 = vmatmul.mubr.bf16.gmra.mrb[20].mxu0 %v1337_v0  ;;  %1859 = vmatmul.mubr.bf16.gmra.mrb[28].mxu1 %v1337_v0  ;;  %v6448_v0 = vcombine.high %v2309_v62, %v2313_v28  ;;  %v6490_v49 = vcombine.high %v2350_v38, %v2354_v40  ;;  %v2370_v28 = vld [vmem:[#allocation20 + $0x3a8] sm:$0xff] }
 0x486   : > { %3800 = vmatpush1.bf16.msra.mxu0 %v6431_v30  ;;  %3946 = vmatpush1.bf16.msra.mxu1 %v6433_v32  ;;  %v2361_v30 = vld [vmem:[#allocation20 + $0x360] sm:$0xff]  ;;  %v2358_v32 = vld [vmem:[#allocation20 + $0x348] sm:$0xff] }
 0x487   : > { %3801 = vmatprep.subr.bf16.mxu0 %v6440_v47  ;;  %3947 = vmatprep.subr.bf16.mxu1 %v6442_v60  ;;  %v6496_v43 = vcombine.high %v2357_v50, %v2361_v30  ;;  %v6495_v51 = vcombine.low %v2357_v50, %v2361_v30  ;;  %v6497_v52 = vcombine.low %v2358_v32, %v2362_v41 }
 0x488   : > { %v6498_v47 = vcombine.high %v2358_v32, %v2362_v41 }
 0x48a   : > { %3802 = vmatpush1.bf16.msra.mxu0 %v6439_v58  ;;  %3948 = vmatpush1.bf16.msra.mxu1 %v6441_v59  ;;  %v2369_v58 = vld [vmem:[#allocation20 + $0x3a0] sm:$0xff]  ;;  %v2366_v59 = vld [vmem:[#allocation20 + $0x388] sm:$0xff] }
 0x48b   : > { %3803 = vmatprep.subr.bf16.mxu0 %v6448_v0  ;;  %3949 = vmatprep.subr.bf16.mxu1 %v6450_v6  ;;  %v6503_v60 = vcombine.low %v2365_v54, %v2369_v58  ;;  %v6504_v62 = vcombine.high %v2365_v54, %v2369_v58  ;;  %v2377_v0 = vld [vmem:[#allocation20 + $0x3e0] sm:$0xff]  ;;  %v6505_v1 = vcombine.low %v2366_v59, %v2370_v28  ;;  %v2374_v6 = vld [vmem:[#allocation20 + $0x3c8] sm:$0xff] }
 0x48c   : > { %v6514_v9 = vcombine.high %v2374_v6, %v2378_v7  ;;  %v6511_v10 = vcombine.low %v2373_v63, %v2377_v0 }
 0x48e   : > { %3804 = vmatpush1.bf16.msra.mxu0 %v6447_v3  ;;  %3950 = vmatpush1.bf16.msra.mxu1 %v6449_v4  ;;  %v6506_v3 = vcombine.high %v2366_v59, %v2370_v28  ;;  %v6512_v4 = vcombine.high %v2373_v63, %v2377_v0 }
 0x48f   : > { %3805 = vmatprep.subr.bf16.mxu0 %v6456_v11  ;;  %3951 = vmatprep.subr.bf16.mxu1 %v6458_v55  ;;  %v6513_v11 = vcombine.low %v2374_v6, %v2378_v7 }
 0x492   : > { %3806 = vmatpush1.bf16.msra.mxu0 %v6455_v56  ;;  %3952 = vmatpush1.bf16.msra.mxu1 %v6457_v61  ;;  %v8656_v56 = vld [vmem:[#allocation20 + $0x420] sm:$0xff]  ;;  %v8658_v61 = vld [vmem:[#allocation20 + $0x408] sm:$0xff] }
 0x493   : > { %3807 = vmatprep.subr.bf16.mxu0 %v6464_v13  ;;  %3953 = vmatprep.subr.bf16.mxu1 %v6466_v35  ;;  %10574 = vst [vmem:[#allocation45_spill] sm:$0xff] %v8656_v56  ;;  %10575 = vst [vmem:[#allocation46_spill] sm:$0xff] %v8658_v61  ;;  %v6520_v57 = vcombine.high %v8654_v31, %v8656_v56  ;;  %v6522_v13 = vcombine.high %v8658_v61, %v8664_v5 }
 0x496   : > { %3808 = vmatpush1.bf16.msra.mxu0 %v6463_v8  ;;  %3954 = vmatpush1.bf16.msra.mxu1 %v6465_v23 }
 0x497   : > { %3809 = vmatprep.subr.bf16.mxu0 %v6472_v26  ;;  %3955 = vmatprep.subr.bf16.mxu1 %v6474_v46 }
 0x49a   : > { %3810 = vmatpush1.bf16.msra.mxu0 %v6471_v19  ;;  %3956 = vmatpush1.bf16.msra.mxu1 %v6473_v21 }
 0x49b   : > { %3811 = vmatprep.subr.bf16.mxu0 %v6480_v48  ;;  %3957 = vmatprep.subr.bf16.mxu1 %v6482_v34 }
 0x49e   : > { %3812 = vmatpush1.bf16.msra.mxu0 %v6479_v27  ;;  %3958 = vmatpush1.bf16.msra.mxu1 %v6481_v33 }
 0x49f   : > { %3813 = vmatprep.subr.bf16.mxu0 %v6488_v39  ;;  %3959 = vmatprep.subr.bf16.mxu1 %v6490_v49 }
 0x4a2   : > { %3814 = vmatpush1.bf16.msra.mxu0 %v6487_v44  ;;  %3960 = vmatpush1.bf16.msra.mxu1 %v6489_v45 }
 0x4a3   : > { %3815 = vmatprep.subr.bf16.mxu0 %v6496_v43  ;;  %3961 = vmatprep.subr.bf16.mxu1 %v6498_v47 }
 0x4a6   : > { %3816 = vmatpush1.bf16.msra.mxu0 %v6495_v51  ;;  %3962 = vmatpush1.bf16.msra.mxu1 %v6497_v52 }
 0x4a7   : > { %3817 = vmatprep.subr.bf16.mxu0 %v6504_v62  ;;  %3963 = vmatprep.subr.bf16.mxu1 %v6506_v3 }
 0x4aa   : > { %3818 = vmatpush1.bf16.msra.mxu0 %v6503_v60  ;;  %3964 = vmatpush1.bf16.msra.mxu1 %v6505_v1 }
 0x4ab   : > { %3819 = vmatprep.subr.bf16.mxu0 %v6512_v4  ;;  %3965 = vmatprep.subr.bf16.mxu1 %v6514_v9 }
 0x4ae   : > { %3820 = vmatpush1.bf16.msra.mxu0 %v6511_v10  ;;  %3966 = vmatpush1.bf16.msra.mxu1 %v6513_v11 }
 0x4af   : > { %3862 = vmatprep.subr.bf16.mxu0 %v6520_v57  ;;  %4008 = vmatprep.subr.bf16.mxu1 %v6522_v13 }
 0x53f   : > { %v8670_v2 = vpop.f32.mrb[8].mxu0  ;;  %v8672_v8 = vpop.f32.mrb[16].mxu1 }
 0x540   : > { %v8674_v23 = vpop.f32.mrb[9].mxu0  ;;  %v8676_v35 = vpop.f32.mrb[17].mxu1  ;;  %v1921_v15 = vmul.f32 %v8670_v2, %v8670_v2  ;;  %v1923_v20 = vmul.f32 %v8672_v8, %v8672_v8 }
 0x541   : > { %v1922_v17 = vmul.f32 %v8674_v23, %v8674_v23  ;;  %v1924_v26 = vmul.f32 %v8676_v35, %v8676_v35  ;;  %v8686_v18 = vpop.f32.mrb[10].mxu0  ;;  %v8688_v19 = vpop.f32.mrb[18].mxu1 }
 0x542   : > { %v1869_v21 = vadd.f32 %v8686_v18, %v8670_v2  ;;  %v1925_v46 = vmul.f32 %v8686_v18, %v8686_v18  ;;  %v1895_v22 = vadd.f32 %v8688_v19, %v8672_v8  ;;  %v1927_v42 = vmul.f32 %v8688_v19, %v8688_v19  ;;  %v8698_v24 = vpop.f32.mrb[11].mxu0  ;;  %v8700_v48 = vpop.f32.mrb[19].mxu1 }
 0x543   : > { %v1882_v25 = vadd.f32 %v8698_v24, %v8674_v23  ;;  %v1926_v27 = vmul.f32 %v8698_v24, %v8698_v24  ;;  %v1908_v33 = vadd.f32 %v8700_v48, %v8676_v35  ;;  %v1928_v34 = vmul.f32 %v8700_v48, %v8700_v48 }
 0x544   : > { %v1953_v36 = vadd.f32 %v1925_v46, %v1921_v15  ;;  %v1979_v37 = vadd.f32 %v1927_v42, %v1923_v20 }
 0x545   : > { %v1966_v38 = vadd.f32 %v1926_v27, %v1922_v17  ;;  %v1992_v39 = vadd.f32 %v1928_v34, %v1924_v26 }
 0x547   : > { %v8710_v40 = vpop.f32.mrb[12].mxu0  ;;  %v8712_v44 = vpop.f32.mrb[20].mxu1 }
 0x548   : > { %v1870_v45 = vadd.f32 %v1869_v21, %v8710_v40  ;;  %v1929_v49 = vmul.f32 %v8710_v40, %v8710_v40  ;;  %v1896_v50 = vadd.f32 %v1895_v22, %v8712_v44  ;;  %v1931_v30 = vmul.f32 %v8712_v44, %v8712_v44  ;;  %v8720_v32 = vpop.f32.mrb[13].mxu0  ;;  %v8722_v43 = vpop.f32.mrb[21].mxu1 }
 0x549   : > { %v1883_v41 = vadd.f32 %v1882_v25, %v8720_v32  ;;  %v1930_v51 = vmul.f32 %v8720_v32, %v8720_v32  ;;  %v1909_v52 = vadd.f32 %v1908_v33, %v8722_v43  ;;  %v1932_v47 = vmul.f32 %v8722_v43, %v8722_v43  ;;  %v8730_v54 = vpop.f32.mrb[14].mxu0  ;;  %v8732_v58 = vpop.f32.mrb[22].mxu1 }
 0x54a   : > { %v1954_v59 = vadd.f32 %v1953_v36, %v1929_v49  ;;  %v1980_v60 = vadd.f32 %v1979_v37, %v1931_v30  ;;  %v1871_v62 = vadd.f32 %v1870_v45, %v8730_v54  ;;  %v1933_v28 = vmul.f32 %v8730_v54, %v8730_v54  ;;  %v8737_v63 = vpop.f32.mrb[15].mxu0  ;;  %v8739_v0 = vpop.f32.mrb[23].mxu1 }
 0x54b   : > { %v1967_v1 = vadd.f32 %v1966_v38, %v1930_v51  ;;  %v1993_v3 = vadd.f32 %v1992_v39, %v1932_v47  ;;  %v1897_v4 = vadd.f32 %v1896_v50, %v8732_v58  ;;  %v1935_v6 = vmul.f32 %v8732_v58, %v8732_v58 }
 0x54c   : > { %v1955_v7 = vadd.f32 %v1954_v59, %v1933_v28  ;;  %v1884_v9 = vadd.f32 %v1883_v41, %v8737_v63  ;;  %v1934_v10 = vmul.f32 %v8737_v63, %v8737_v63  ;;  %v1910_v11 = vadd.f32 %v1909_v52, %v8739_v0 }
 0x54d   : > { %v1981_v57 = vadd.f32 %v1980_v60, %v1935_v6  ;;  %v1936_v13 = vmul.f32 %v8739_v0, %v8739_v0 }
 0x54e   : > { %v1968_v15 = vadd.f32 %v1967_v1, %v1934_v10 }
 0x54f   : > { %v1994_v20 = vadd.f32 %v1993_v3, %v1936_v13  ;;  %v8750_v17 = vpop.f32.mrb[16].mxu0  ;;  %v8752_v26 = vpop.f32.mrb[24].mxu1 }
 0x550   : > { %10577 = vst [vmem:[#allocation48_spill] sm:$0xff] %v8752_v26  ;;  %v1872_v21 = vadd.f32 %v1871_v62, %v8750_v17  ;;  %v1937_v46 = vmul.f32 %v8750_v17, %v8750_v17  ;;  %v1898_v22 = vadd.f32 %v1897_v4, %v8752_v26  ;;  %v1939_v42 = vmul.f32 %v8752_v26, %v8752_v26  ;;  %v8760_v25 = vpop.f32.mrb[17].mxu0  ;;  %v8762_v27 = vpop.f32.mrb[25].mxu1 }
 0x551   : > { %v1885_v33 = vadd.f32 %v1884_v9, %v8760_v25  ;;  %v1938_v34 = vmul.f32 %v8760_v25, %v8760_v25  ;;  %v1911_v36 = vadd.f32 %v1910_v11, %v8762_v27  ;;  %v1940_v37 = vmul.f32 %v8762_v27, %v8762_v27  ;;  %v8770_v38 = vpop.f32.mrb[18].mxu0  ;;  %v8772_v39 = vpop.f32.mrb[26].mxu1 }
 0x552   : > { %10578 = vst [vmem:[#allocation49_spill] sm:$0xff] %v8772_v39  ;;  %v1956_v45 = vadd.f32 %v1955_v7, %v1937_v46  ;;  %v1982_v49 = vadd.f32 %v1981_v57, %v1939_v42  ;;  %v1873_v50 = vadd.f32 %v1872_v21, %v8770_v38  ;;  %v1941_v30 = vmul.f32 %v8770_v38, %v8770_v38  ;;  %v8777_v41 = vpop.f32.mrb[19].mxu0  ;;  %v8779_v51 = vpop.f32.mrb[27].mxu1 }
 0x553   : > { %v1969_v52 = vadd.f32 %v1968_v15, %v1938_v34  ;;  %v1995_v47 = vadd.f32 %v1994_v20, %v1940_v37  ;;  %v1899_v59 = vadd.f32 %v1898_v22, %v8772_v39  ;;  %v1943_v60 = vmul.f32 %v8772_v39, %v8772_v39 }
 0x554   : > { %v1957_v62 = vadd.f32 %v1956_v45, %v1941_v30  ;;  %v1886_v28 = vadd.f32 %v1885_v33, %v8777_v41  ;;  %v1942_v1 = vmul.f32 %v8777_v41, %v8777_v41  ;;  %v1912_v3 = vadd.f32 %v1911_v36, %v8779_v51 }
 0x555   : > { %v1983_v4 = vadd.f32 %v1982_v49, %v1943_v60  ;;  %v1944_v6 = vmul.f32 %v8779_v51, %v8779_v51 }
 0x556   : > { %v1970_v7 = vadd.f32 %v1969_v52, %v1942_v1 }
 0x557   : > { %v1996_v9 = vadd.f32 %v1995_v47, %v1944_v6  ;;  %v8790_v10 = vpop.f32.mrb[20].mxu0  ;;  %v8792_v11 = vpop.f32.mrb[28].mxu1 }
 0x558   : > { %10579 = vst [vmem:[#allocation50_spill] sm:$0xff] %v8792_v11  ;;  %v1874_v57 = vadd.f32 %v1873_v50, %v8790_v10  ;;  %v1945_v13 = vmul.f32 %v8790_v10, %v8790_v10  ;;  %v1900_v15 = vadd.f32 %v1899_v59, %v8792_v11  ;;  %v1947_v20 = vmul.f32 %v8792_v11, %v8792_v11  ;;  %v8800_v21 = vpop.f32.mrb[21].mxu0  ;;  %v8802_v46 = vpop.f32.mrb[29].mxu1 }
 0x559   : > { %10580 = vst [vmem:[#allocation51_spill] sm:$0xff] %v8802_v46  ;;  %v1887_v22 = vadd.f32 %v1886_v28, %v8800_v21  ;;  %v1946_v42 = vmul.f32 %v8800_v21, %v8800_v21  ;;  %v1913_v33 = vadd.f32 %v1912_v3, %v8802_v46  ;;  %v1948_v34 = vmul.f32 %v8802_v46, %v8802_v46  ;;  %v8810_v36 = vpop.f32.mrb[22].mxu0  ;;  %v8812_v37 = vpop.f32.mrb[30].mxu1 }
 0x55a   : > { %10581 = vst [vmem:[#allocation52_spill] sm:$0xff] %v8812_v37  ;;  %v1958_v45 = vadd.f32 %v1957_v62, %v1945_v13  ;;  %v1984_v49 = vadd.f32 %v1983_v4, %v1947_v20  ;;  %v1875_v50 = vadd.f32 %v1874_v57, %v8810_v36  ;;  %v1949_v30 = vmul.f32 %v8810_v36, %v8810_v36  ;;  %v8817_v52 = vpop.f32.mrb[23].mxu0  ;;  %v8819_v47 = vpop.f32.mrb[31].mxu1 }
 0x55b   : > { %v1971_v59 = vadd.f32 %v1970_v7, %v1946_v42  ;;  %v1997_v60 = vadd.f32 %v1996_v9, %v1948_v34  ;;  %v1901_v28 = vadd.f32 %v1900_v15, %v8812_v37  ;;  %v1951_v1 = vmul.f32 %v8812_v37, %v8812_v37 }
 0x55c   : > { %v1876_v3 = vrot.slane %v1875_v50, 4  ;;  %v1959_v6 = vadd.f32 %v1958_v45, %v1949_v30  ;;  %v1888_v62 = vadd.f32 %v1887_v22, %v8817_v52  ;;  %v1950_v4 = vmul.f32 %v8817_v52, %v8817_v52 }
 0x55d   : > { %v1902_v57 = vrot.slane %v1901_v28, 4  ;;  %v1985_v13 = vadd.f32 %v1984_v49, %v1951_v1  ;;  %v1914_v20 = vadd.f32 %v1913_v33, %v8819_v47  ;;  %v1952_v7 = vmul.f32 %v8819_v47, %v8819_v47 }
 0x55e   : > { %v1877_v9 = vadd.f32 %v1876_v3, %v1875_v50  ;;  %v1960_v42 = vrot.slane %v1959_v6, 4  ;;  %v1889_v15 = vrot.slane %v1888_v62, 4  ;;  %v1972_v34 = vadd.f32 %v1971_v59, %v1950_v4 }
 0x55f   : > { %v1903_v12 = vadd.f32 %v1902_v57, %v1901_v28  ;;  %v1986_v55 = vrot.slane %v1985_v13, 4  ;;  %v1915_v5 = vrot.slane %v1914_v20, 4  ;;  %v1998_v45 = vadd.f32 %v1997_v60, %v1952_v7 }
 0x560   : > { %v1878_v30 = vrot.slane %v1877_v9, 2  ;;  %v1961_v22 = vadd.f32 %v1960_v42, %v1959_v6  ;;  %v1890_v61 = vadd.f32 %v1889_v15, %v1888_v62  ;;  %v1973_v56 = vrot.slane %v1972_v34, 4 }
 0x561   : > { %v1904_v31 = vrot.slane %v1903_v12, 2  ;;  %v1987_v37 = vadd.f32 %v1986_v55, %v1985_v13  ;;  %v1916_v49 = vadd.f32 %v1915_v5, %v1914_v20  ;;  %v1999_v1 = vrot.slane %v1998_v45, 4 }
 0x562   : > { %v1879_v33 = vadd.f32 %v1878_v30, %v1877_v9  ;;  %v1962_v11 = vrot.slane %v1961_v22, 2  ;;  %v1891_v46 = vrot.slane %v1890_v61, 2  ;;  %v1974_v39 = vadd.f32 %v1973_v56, %v1972_v34 }
 0x563   : > { %v1905_v50 = vadd.f32 %v1904_v31, %v1903_v12  ;;  %v1988_v3 = vrot.slane %v1987_v37, 2  ;;  %v1917_v26 = vrot.slane %v1916_v49, 2  ;;  %v2000_v59 = vadd.f32 %v1999_v1, %v1998_v45 }
 0x564   : > { %v1880_v28 = vrot.slane %v1879_v33, 1  ;;  %v1963_v4 = vadd.f32 %v1962_v11, %v1961_v22  ;;  %v1892_v57 = vadd.f32 %v1891_v46, %v1890_v61  ;;  %v1975_v60 = vrot.slane %v1974_v39, 2 }
 0x565   : > { %v1906_v7 = vrot.slane %v1905_v50, 1  ;;  %v1989_v6 = vadd.f32 %v1988_v3, %v1987_v37  ;;  %v1918_v62 = vadd.f32 %v1917_v26, %v1916_v49  ;;  %v2001_v42 = vrot.slane %v2000_v59, 2 }
 0x566   : > { %v1881_v15 = vadd.f32 %v1880_v28, %v1879_v33  ;;  %v1964_v55 = vrot.slane %v1963_v4, 1  ;;  %v1893_v5 = vrot.slane %v1892_v57, 1  ;;  %v1976_v13 = vadd.f32 %v1975_v60, %v1974_v39 }
 0x567   : > { %v1907_v20 = vadd.f32 %v1906_v7, %v1905_v50  ;;  %v1990_v9 = vrot.slane %v1989_v6, 1  ;;  %v1919_v30 = vrot.slane %v1918_v62, 1  ;;  %v2002_v56 = vadd.f32 %v2001_v42, %v2000_v59 }
 0x568   : > { %v1965_v31 = vadd.f32 %v1964_v55, %v1963_v4  ;;  %v8830_v12 = vmul.f32 0.015625, %v1881_v15  ;;  %v1894_v34 = vadd.f32 %v1893_v5, %v1892_v57  ;;  %v1977_v45 = vrot.slane %v1976_v13, 1 }
 0x569   : > { %v1991_v11 = vadd.f32 %v1990_v9, %v1989_v6  ;;  %v2007_v61 = vmul.f32 0.015625, %v1907_v20  ;;  %v1920_v46 = vadd.f32 %v1919_v30, %v1918_v62  ;;  %v2003_v22 = vrot.slane %v2002_v56, 1 }
 0x56a   : > { %v2009_v37 = vmul.f32 0.015625, %v1965_v31  ;;  %v2013_v26 = vmul.f32 %v8830_v12, %v8830_v12  ;;  %v1978_v49 = vadd.f32 %v1977_v45, %v1976_v13  ;;  %v2006_v1 = vmul.f32 0.015625, %v1894_v34 }
 0x56b   : > { %v2011_v39 = vmul.f32 0.015625, %v1991_v11  ;;  %v2015_v33 = vmul.f32 %v2007_v61, %v2007_v61  ;;  %v2004_v50 = vadd.f32 %v2003_v22, %v2002_v56  ;;  %v2008_v3 = vmul.f32 0.015625, %v1920_v46 }
 0x56c   : > { %v2017_v59 = vsub.f32 %v2009_v37, %v2013_v26  ;;  %v2010_v28 = vmul.f32 0.015625, %v1978_v49  ;;  %v2014_v4 = vmul.f32 %v2006_v1, %v2006_v1  ;;  %v2025_v49 = vld [vmem:[#allocation17] sm:$0xf] }
 0x56d   : > { %v2019_v60 = vsub.f32 %v2011_v39, %v2015_v33  ;;  %v2012_v57 = vmul.f32 0.015625, %v2004_v50  ;;  %v2016_v7 = vmul.f32 %v2008_v3, %v2008_v3  ;;  %v8838_v33 = vsub.s32 2, %v8540_v14 }
 0x56e   : > { %v2021_v6 = vmax.f32 %v2017_v59, 0.0  ;;  %v2018_v42 = vsub.f32 %v2010_v28, %v2014_v4  ;;  %v8841_v50 = vsub.s32 3, %v8540_v14  ;;  %v8843_v59 = vld [vmem:[#allocation20 + $0x440] sm:$0xff]  ;;  %v8847_v4 = vld [vmem:[#allocation20 + $0x448] sm:$0xff] }
 0x56f   : > { %v2023_v62 = vmax.f32 %v2019_v60, 0.0  ;;  %v2020_v15 = vsub.f32 %v2012_v57, %v2016_v7  ;;  %10582 = vst [vmem:[#allocation53_spill] sm:$0xff] %v8838_v33  ;;  %v8845_v28 = vld [vmem:[#allocation20 + $0x460] sm:$0xff]  ;;  %v8849_v57 = vld [vmem:[#allocation20 + $0x468] sm:$0xff] }
 0x570   : > { %v2026_v55 = vadd.f32 1e-05, %v2021_v6  ;;  %v2022_v5 = vmax.f32 %v2018_v42, 0.0  ;;  %10583 = vst [vmem:[#allocation54_spill] sm:$0xff] %v8841_v50  ;;  %v8851_v7 = vld [vmem:[#allocation20 + $0x480] sm:$0xff]  ;;  %v8975_v42 = vld [vmem:[#allocation20 + $0x528] sm:$0xff] }
 0x571   : > { %v2028_v20 = vadd.f32 1e-05, %v2023_v62  ;;  %v2024_v9 = vmax.f32 %v2020_v15, 0.0  ;;  %v8853_v6 = vld [vmem:[#allocation20 + $0x4a0] sm:$0xff] }
 0x572   : > { %7310 = vrsqrt.f32 %v2026_v55  ;;  %v2027_v13 = vadd.f32 1e-05, %v2022_v5 }
 0x573   : > { %7312 = vrsqrt.f32 %v2028_v20  ;;  %v2029_v30 = vadd.f32 1e-05, %v2024_v9  ;;  %v8973_v9 = vld [vmem:[#allocation20 + $0x508] sm:$0xff] }
 0x574   : > { %7314 = vrsqrt.f32 %v2027_v13 }
 0x575   : > { %7316 = vrsqrt.f32 %v2029_v30  ;;  %v8971_v30 = vld [vmem:[#allocation20 + $0x520] sm:$0xff] }
 0x57c   : > { %v7311_v56 = vpop.eup %7310 }
 0x57d   : > { %v7313_v31 = vpop.eup %7312 }
 0x57e   : > { %v7315_v34 = vpop.eup %7314 }
 0x57f   : > { %v7317_v45 = vpop.eup %7316  ;;  %v2038_v11 = vcombine.low %v7311_v56, %v7315_v34 }
 0x580   : > { %v2039_v46 = vcombine.low %v7313_v31, %v7317_v45 }
 0x581   : > { %v2046_v22 = vrot.slane %v2038_v11, %v8626_v29 }
 0x582   : > { %v2053_v37 = vrot.slane %v2039_v46, %v8626_v29 }
 0x584   : > { %v2054_v26 = vcombine.low %v2046_v22, %v2053_v37 }
 0x586   : > { %v2061_v39 = vrot.slane %v2054_v26, %v8626_v29 }
 0x588   : > { %v2063_v60 = vmul.f32 %v2061_v39, %v2025_v49 }
 0x58a   : > { %v2069_v62 = vrot.slane %v2063_v60, %v8543_v16  ;;  %v2073_v15 = vrot.slane %v2063_v60, %v8631_v53  ;;  %v2077_v55 = vrot.slane %v2063_v60, %v8838_v33  ;;  %v2081_v5 = vrot.slane %v2063_v60, %v8841_v50 }
 0x58c   : > { %v2086_v56 = vmul.f32 %v2069_v62, %v8830_v12  ;;  %v2087_v31 = vmul.f32 %v2073_v15, %v2006_v1  ;;  %v2088_v34 = vmul.f32 %v2077_v55, %v2007_v61  ;;  %v2089_v45 = vmul.f32 %v2081_v5, %v2008_v3 }
 0x58d   : > { %v8871_v11 = vmul.f32 %v2081_v5, %v8819_v47  ;;  %v8874_v46 = vmul.f32 %v2073_v15, %v8674_v23  ;;  %v8877_v22 = vmul.f32 %v2073_v15, %v8698_v24  ;;  %v8880_v37 = vmul.f32 %v2069_v62, %v8670_v2 }
 0x58e   : > { %v2094_v26 = vcombine.low %v2086_v56, %v2087_v31  ;;  %v2095_v49 = vcombine.low %v2088_v34, %v2089_v45  ;;  %v2124_v39 = vmul.f32 %v2069_v62, %v8686_v18  ;;  %v2129_v12 = vmul.f32 %v2073_v15, %v8720_v32  ;;  %v8921_v56 = vld [vmem:[#allocation20 + $0x488] sm:$0xff]  ;;  %v8955_v34 = vld [vmem:[#allocation20 + $0x500] sm:$0xff] }
 0x58f   : > { %v2133_v61 = vmul.f32 %v2073_v15, %v8737_v63  ;;  %v2128_v47 = vmul.f32 %v2069_v62, %v8710_v40  ;;  %v8887_v1 = vmul.f32 %v2069_v62, %v8730_v54  ;;  %v8890_v23 = vmul.f32 %v2073_v15, %v8760_v25  ;;  %v8951_v31 = vld [vmem:[#allocation20 + $0x4c8] sm:$0xff]  ;;  %10584 = vst [vmem:[#allocation55_spill] sm:$0xff] %v8955_v34 }
 0x590   : > { %v2102_v24 = vrot.slane %v2094_v26, %v8626_v29  ;;  %v2109_v2 = vrot.slane %v2095_v49, %v8626_v29  ;;  %v8895_v3 = vmul.f32 %v2073_v15, %v8777_v41  ;;  %v8898_v18 = vmul.f32 %v2069_v62, %v8750_v17  ;;  %v10585_v26 = vld [vmem:[#allocation48_spill] sm:$0xff] }
 0x591   : > { %v8901_v32 = vmul.f32 %v2069_v62, %v8770_v38  ;;  %v8904_v40 = vmul.f32 %v2073_v15, %v8800_v21  ;;  %v8907_v54 = vmul.f32 %v2073_v15, %v8817_v52  ;;  %v8910_v63 = vmul.f32 %v2069_v62, %v8790_v10  ;;  %v2064_v38 = vld [vmem:[#allocation18] sm:$0xf]  ;;  %v8940_v15 = vld [vmem:[#allocation20 + $0x4e0] sm:$0xff]  ;;  %10588 = vst [vmem:[#allocation48_spill] sm:$0xff] %v8971_v30 }
 0x592   : > { %v2110_v25 = vcombine.low %v2102_v24, %v2109_v2  ;;  %v8913_v60 = vmul.f32 %v2069_v62, %v8810_v36  ;;  %v8916_v41 = vmul.f32 %v2081_v5, %v8676_v35  ;;  %v8919_v17 = vmul.f32 %v2081_v5, %v8700_v48  ;;  %v8936_v62 = vld [vmem:[#allocation20 + $0x4a8] sm:$0xff]  ;;  %v8938_v48 = vld [vmem:[#allocation20 + $0x4c0] sm:$0xff] }
 0x593   : > { %v8924_v21 = vmul.f32 %v2077_v55, %v8672_v8  ;;  %v8927_v52 = vmul.f32 %v2077_v55, %v8688_v19  ;;  %v8930_v10 = vmul.f32 %v2081_v5, %v8722_v43  ;;  %v8933_v36 = vmul.f32 %v2081_v5, %v8739_v0  ;;  %v8953_v0 = vld [vmem:[#allocation20 + $0x4e8] sm:$0xff] }
 0x594   : > { %v2117_v35 = vrot.slane %v2110_v25, %v8626_v29  ;;  %v8943_v8 = vmul.f32 %v2077_v55, %v8712_v44  ;;  %v8946_v19 = vmul.f32 %v2077_v55, %v8732_v58  ;;  %v8949_v43 = vmul.f32 %v2081_v5, %v8762_v27  ;;  %v10586_v44 = vld [vmem:[#allocation49_spill] sm:$0xff]  ;;  %v10587_v58 = vld [vmem:[#allocation51_spill] sm:$0xff] }
 0x595   : > { %v8958_v45 = vmul.f32 %v2081_v5, %v8779_v51  ;;  %v8961_v49 = vmul.f32 %v2077_v55, %v10585_v26  ;;  %v8964_v24 = vmul.f32 %v2077_v55, %v10586_v44  ;;  %v8967_v2 = vmul.f32 %v2081_v5, %v10587_v58  ;;  %10589 = vst [vmem:[#allocation49_spill] sm:$0xff] %v8973_v9  ;;  %v10591_v51 = vld [vmem:[#allocation50_spill] sm:$0xff]  ;;  %v10592_v26 = vld [vmem:[#allocation52_spill] sm:$0xff] }
 0x596   : > { %v2119_v27 = vsub.f32 %v2064_v38, %v2117_v35  ;;  %10590 = vst [vmem:[#allocation51_spill] sm:$0xff] %v8975_v42  ;;  %v8978_v13 = vmul.f32 %v2077_v55, %v10591_v51  ;;  %v8981_v20 = vmul.f32 %v2077_v55, %v10592_v26 }
 0x598   : > { %v2156_v58 = vrot.slane %v2119_v27, %v8543_v16  ;;  %v2160_v51 = vrot.slane %v2119_v27, %v8631_v53  ;;  %v8994_v25 = vrot.slane %v2119_v27, %v8841_v50  ;;  %v8999_v26 = vrot.slane %v2119_v27, %v8838_v33 }
 0x59a   : > { %v9009_v38 = vadd.f32 %v8994_v25, %v8871_v11  ;;  %v2174_v50 = vadd.f32 %v2160_v51, %v8874_v46  ;;  %v2178_v55 = vadd.f32 %v2160_v51, %v8877_v22  ;;  %v2173_v27 = vadd.f32 %v2156_v58, %v8880_v37 }
 0x59b   : > { %v2177_v33 = vadd.f32 %v2156_v58, %v2124_v39  ;;  %v2182_v53 = vadd.f32 %v2160_v51, %v2129_v12  ;;  %v2186_v16 = vadd.f32 %v2160_v51, %v2133_v61  ;;  %v2181_v5 = vadd.f32 %v2156_v58, %v2128_v47 }
 0x59c   : > { %v2236_v14 = vmax.f32 %v9009_v38, 0.0  ;;  %v2206_v35 = vmax.f32 %v2174_v50, 0.0  ;;  %v2210_v29 = vmax.f32 %v2178_v55, 0.0  ;;  %v2205_v34 = vmax.f32 %v2173_v27, 0.0 }
 0x59d   : > { %v2209_v44 = vmax.f32 %v2177_v33, 0.0  ;;  %v2214_v9 = vmax.f32 %v2182_v53, 0.0  ;;  %v2218_v42 = vmax.f32 %v2186_v16, 0.0  ;;  %v2185_v11 = vadd.f32 %v2156_v58, %v8887_v1 }
 0x59e   : > { %v9016_v30 = vpack.c.bf16 %v2210_v29, %v2206_v35  ;;  %v2213_v46 = vmax.f32 %v2181_v5, 0.0  ;;  %v2190_v22 = vadd.f32 %v2160_v51, %v8890_v23  ;;  %v2194_v37 = vadd.f32 %v2160_v51, %v8895_v3  ;;  %v10593_v23 = vld [vmem:[#allocation44_spill] sm:$0xff]  ;;  %v10594_v3 = vld [vmem:[#allocation45_spill] sm:$0xff]  ;;  %v10597_v5 = vld [vmem:[#allocation47_spill] sm:$0xff] }
 0x59f   : > { %v9020_v39 = vpack.c.bf16 %v2209_v44, %v2205_v34  ;;  %v9022_v12 = vpack.c.bf16 %v2218_v42, %v2214_v9  ;;  %v2217_v61 = vmax.f32 %v2185_v11, 0.0  ;;  %v2189_v50 = vadd.f32 %v2156_v58, %v8898_v18  ;;  %v10596_v34 = vld [vmem:[#allocation46_spill] sm:$0xff] }
 0x5a0   : > { %3821 = vmatprep.mubr.bf16.mxu0 %v9016_v30  ;;  %3967 = vmatprep.mubr.bf16.mxu1 %v9016_v30  ;;  %v2222_v16 = vmax.f32 %v2190_v22, 0.0  ;;  %v2226_v53 = vmax.f32 %v2194_v37, 0.0  ;;  %v2193_v29 = vadd.f32 %v2156_v58, %v8901_v32  ;;  %v2198_v33 = vadd.f32 %v2160_v51, %v8904_v40 }
 0x5a1   : > { %3822 = vmatmul.mubr.bf16.vlgmr.msra.gmra.mrb[24].mxu0 %v9020_v39  ;;  %3968 = vmatmul.mubr.bf16.vlgmr.msra.gmra.mrb[32].mxu1 %v9020_v39  ;;  %v9031_v47 = vpack.c.bf16 %v2217_v61, %v2213_v46  ;;  %v2221_v42 = vmax.f32 %v2189_v50, 0.0  ;;  %v2202_v9 = vadd.f32 %v2160_v51, %v8907_v54  ;;  %v2197_v1 = vadd.f32 %v2156_v58, %v8910_v63 }
 0x5a2   : > { %v10595_v18 = vcombine.low %v10593_v23, %v10594_v3  ;;  %v10598_v32 = vcombine.low %v10596_v34, %v10597_v5  ;;  %v9041_v40 = vpack.c.bf16 %v2226_v53, %v2222_v16  ;;  %v2225_v35 = vmax.f32 %v2193_v29, 0.0  ;;  %3831 = vmatprep.mubr.bf16.mxu0 %v9022_v12  ;;  %3977 = vmatprep.mubr.bf16.mxu1 %v9022_v12 }
 0x5a3   : > { %v2230_v44 = vmax.f32 %v2198_v33, 0.0  ;;  %v2201_v55 = vadd.f32 %v2156_v58, %v8913_v60  ;;  %v2234_v54 = vmax.f32 %v2202_v9, 0.0  ;;  %v2229_v63 = vmax.f32 %v2197_v1, 0.0 }
 0x5a4   : > { %3863 = vmatpush1.bf16.msra.mxu0 %v10595_v18  ;;  %4009 = vmatpush1.bf16.msra.mxu1 %v10598_v32  ;;  %v2176_v51 = vadd.f32 %v8994_v25, %v8916_v41  ;;  %v2180_v27 = vadd.f32 %v8994_v25, %v8919_v17  ;;  %v10599_v11 = vcombine.high %v8843_v59, %v8845_v28 }
 0x5a5   : > { %v10600_v46 = vcombine.high %v8847_v4, %v8849_v57  ;;  %v9056_v60 = vpack.c.bf16 %v2225_v35, %v2221_v42  ;;  %v2233_v58 = vmax.f32 %v2201_v55, 0.0  ;;  %v2175_v22 = vadd.f32 %v8999_v26, %v8924_v21 }
 0x5a6   : > { %3864 = vmatprep.subr.bf16.mxu0 %v10599_v11  ;;  %v2179_v41 = vadd.f32 %v8999_v26, %v8927_v52  ;;  %v9062_v37 = vpack.c.bf16 %v2234_v54, %v2230_v44  ;;  %v2208_v17 = vmax.f32 %v2176_v51, 0.0  ;;  %v2212_v61 = vmax.f32 %v2180_v27, 0.0  ;;  %v2425_v54 = vld [vmem:[#allocation20 + $0x560] sm:$0xff]  ;;  %v2426_v51 = vld [vmem:[#allocation20 + $0x568] sm:$0xff] }
 0x5a7   : > { %4010 = vmatprep.subr.bf16.mxu1 %v10600_v46  ;;  %v2184_v50 = vadd.f32 %v8994_v25, %v8930_v10  ;;  %v10601_v16 = vcombine.low %v8843_v59, %v8845_v28  ;;  %v10602_v53 = vcombine.low %v8847_v4, %v8849_v57  ;;  %v9072_v29 = vpack.c.bf16 %v2233_v58, %v2229_v63  ;;  %v2422_v63 = vld [vmem:[#allocation20 + $0x548] sm:$0xff]  ;;  %v10611_v58 = vld [vmem:[#allocation48_spill] sm:$0xff] }
 0x5a8   : > { %v2207_v21 = vmax.f32 %v2175_v22, 0.0  ;;  %v2211_v33 = vmax.f32 %v2179_v41, 0.0  ;;  %v2188_v52 = vadd.f32 %v8994_v25, %v8933_v36  ;;  %v10603_v42 = vcombine.high %v8851_v7, %v8853_v6  ;;  %v10612_v22 = vld [vmem:[#allocation55_spill] sm:$0xff] }
 0x5a9   : > { %3865 = vmatpush1.bf16.msra.mxu0 %v10601_v16  ;;  %4011 = vmatpush1.bf16.msra.mxu1 %v10602_v53  ;;  %v10604_v10 = vcombine.high %v8921_v56, %v8936_v62  ;;  %v9082_v59 = vpack.c.bf16 %v2212_v61, %v2208_v17  ;;  %v2216_v28 = vmax.f32 %v2184_v50, 0.0  ;;  %v2183_v4 = vadd.f32 %v8999_v26, %v8943_v8  ;;  %v10613_v17 = vld [vmem:[#allocation51_spill] sm:$0xff]  ;;  %v10614_v61 = vld [vmem:[#allocation49_spill] sm:$0xff] }
 0x5aa   : > { %3866 = vmatprep.subr.bf16.mxu0 %v10603_v42  ;;  %v2187_v57 = vadd.f32 %v8999_v26, %v8946_v19  ;;  %v9088_v9 = vpack.c.bf16 %v2211_v33, %v2207_v21  ;;  %v2220_v36 = vmax.f32 %v2188_v52, 0.0  ;;  %v2192_v1 = vadd.f32 %v8994_v25, %v8949_v43  ;;  %3832 = vmatmul.mubr.bf16.gmra.mrb[28].mxu0 %v9031_v47  ;;  %v2433_v53 = vld [vmem:[#allocation20 + $0x5a0] sm:$0xff]  ;;  %v2430_v21 = vld [vmem:[#allocation20 + $0x588] sm:$0xff] }
 0x5ab   : > { %4012 = vmatprep.subr.bf16.mxu1 %v10604_v10  ;;  %v2196_v23 = vadd.f32 %v8994_v25, %v8958_v45  ;;  %3978 = vmatmul.mubr.bf16.gmra.mrb[36].mxu1 %v9031_v47  ;;  %v2215_v3 = vmax.f32 %v2183_v4, 0.0  ;;  %v2191_v8 = vadd.f32 %v8999_v26, %v8961_v49  ;;  %v2195_v19 = vadd.f32 %v8999_v26, %v8964_v24  ;;  %v2434_v33 = vld [vmem:[#allocation20 + $0x5a8] sm:$0xff]  ;;  %v2441_v4 = vld [vmem:[#allocation20 + $0x5e0] sm:$0xff] }
 0x5ac   : > { %v2219_v18 = vmax.f32 %v2187_v57, 0.0  ;;  %v10605_v34 = vcombine.low %v8851_v7, %v8853_v6  ;;  %v10606_v43 = vcombine.low %v8921_v56, %v8936_v62  ;;  %v9106_v45 = vpack.c.bf16 %v2220_v36, %v2216_v28  ;;  %3841 = vmatprep.mubr.bf16.mxu0 %v9041_v40  ;;  %3987 = vmatprep.mubr.bf16.mxu1 %v9041_v40  ;;  %v2437_v28 = vld [vmem:[#allocation20 + $0x5c0] sm:$0xff]  ;;  %v2438_v57 = vld [vmem:[#allocation20 + $0x5c8] sm:$0xff] }
 0x5ad   : > { %v2224_v5 = vmax.f32 %v2192_v1, 0.0  ;;  %v2228_v32 = vmax.f32 %v2196_v23, 0.0  ;;  %v2200_v35 = vadd.f32 %v8994_v25, %v8967_v2  ;;  %v2223_v24 = vmax.f32 %v2191_v8, 0.0  ;;  %v2421_v2 = vld [vmem:[#allocation20 + $0x540] sm:$0xff]  ;;  %v2442_v36 = vld [vmem:[#allocation20 + $0x5e8] sm:$0xff] }
 0x5ae   : > { %3867 = vmatpush1.bf16.msra.mxu0 %v10605_v34  ;;  %4013 = vmatpush1.bf16.msra.mxu1 %v10606_v43  ;;  %v9112_v49 = vpack.c.bf16 %v2219_v18, %v2215_v3  ;;  %v2227_v7 = vmax.f32 %v2195_v19, 0.0  ;;  %v2199_v6 = vadd.f32 %v8999_v26, %v8978_v13  ;;  %v10607_v56 = vcombine.high %v8938_v48, %v8940_v15  ;;  %v2445_v3 = vld [vmem:[#allocation20 + $0x600] sm:$0xff]  ;;  %v2446_v34 = vld [vmem:[#allocation20 + $0x608] sm:$0xff] }
 0x5af   : > { %v10608_v62 = vcombine.high %v8951_v31, %v8953_v0  ;;  %v9122_v25 = vpack.c.bf16 %v2228_v32, %v2224_v5  ;;  %v2232_v44 = vmax.f32 %v2200_v35, 0.0  ;;  %v2203_v55 = vadd.f32 %v8999_v26, %v8981_v20  ;;  %v2449_v19 = vld [vmem:[#allocation20 + $0x620] sm:$0xff]  ;;  %v2450_v43 = vld [vmem:[#allocation20 + $0x628] sm:$0xff] }
 0x5b0   : > { %3868 = vmatprep.subr.bf16.mxu0 %v10607_v56  ;;  %v9126_v27 = vpack.c.bf16 %v2227_v7, %v2223_v24  ;;  %v2231_v13 = vmax.f32 %v2199_v6, 0.0  ;;  %v10609_v11 = vcombine.low %v8938_v48, %v8940_v15  ;;  %v10610_v46 = vcombine.low %v8951_v31, %v8953_v0  ;;  %v2429_v15 = vld [vmem:[#allocation20 + $0x580] sm:$0xff]  ;;  %v2454_v56 = vld [vmem:[#allocation20 + $0x648] sm:$0xff] }
 0x5b1   : > { %4014 = vmatprep.subr.bf16.mxu1 %v10608_v62  ;;  %v6551_v41 = vcombine.low %v10612_v22, %v10611_v58  ;;  %v6553_v20 = vcombine.low %v10614_v61, %v10613_v17  ;;  %v9140_v26 = vpack.c.bf16 %v2236_v14, %v2232_v44  ;;  %v2235_v50 = vmax.f32 %v2203_v55, 0.0  ;;  %v2453_v7 = vld [vmem:[#allocation20 + $0x640] sm:$0xff]  ;;  %v2458_v62 = vld [vmem:[#allocation20 + $0x668] sm:$0xff] }
 0x5b2   : > { %3869 = vmatpush1.bf16.msra.mxu0 %v10609_v11  ;;  %4015 = vmatpush1.bf16.msra.mxu1 %v10610_v46  ;;  %v10615_v16 = vcombine.high %v10612_v22, %v10611_v58  ;;  %v10616_v48 = vcombine.high %v10614_v61, %v10613_v17  ;;  %v6560_v31 = vcombine.high %v2421_v2, %v2425_v54  ;;  %v2457_v6 = vld [vmem:[#allocation20 + $0x660] sm:$0xff]  ;;  %v2466_v11 = vld [vmem:[#allocation20 + $0x6a8] sm:$0xff] }
 0x5b3   : > { %v6562_v0 = vcombine.high %v2422_v63, %v2426_v51  ;;  %v9148_v52 = vpack.c.bf16 %v2235_v50, %v2231_v13  ;;  %3842 = vmatmul.mubr.bf16.gmra.mrb[32].mxu0 %v9056_v60  ;;  %3988 = vmatmul.mubr.bf16.gmra.mrb[40].mxu1 %v9056_v60  ;;  %v6559_v14 = vcombine.low %v2421_v2, %v2425_v54  ;;  %v2462_v13 = vld [vmem:[#allocation20 + $0x688] sm:$0xff]  ;;  %v2469_v17 = vld [vmem:[#allocation20 + $0x6c0] sm:$0xff] }
 0x5b4   : > { %3870 = vmatprep.subr.bf16.mxu0 %v10615_v16  ;;  %4016 = vmatprep.subr.bf16.mxu1 %v10616_v48  ;;  %v6561_v38 = vcombine.low %v2422_v63, %v2426_v51  ;;  %v6568_v42 = vcombine.high %v2429_v15, %v2433_v53  ;;  %v6570_v10 = vcombine.high %v2430_v21, %v2434_v33  ;;  %v2461_v63 = vld [vmem:[#allocation20 + $0x680] sm:$0xff]  ;;  %v2474_v50 = vld [vmem:[#allocation20 + $0x6e8] sm:$0xff] }
 0x5b5   : > { %3851 = vmatprep.mubr.bf16.mxu0 %v9062_v37  ;;  %3997 = vmatprep.mubr.bf16.mxu1 %v9062_v37  ;;  %v6567_v1 = vcombine.low %v2429_v15, %v2433_v53  ;;  %v6569_v23 = vcombine.low %v2430_v21, %v2434_v33  ;;  %v6576_v18 = vcombine.high %v2437_v28, %v2441_v4  ;;  %v2465_v51 = vld [vmem:[#allocation20 + $0x6a0] sm:$0xff]  ;;  %v2478_v21 = vld [vmem:[#allocation20 + $0x708] sm:$0xff] }
 0x5b6   : > { %3871 = vmatpush1.bf16.msra.mxu0 %v6551_v41  ;;  %4017 = vmatpush1.bf16.msra.mxu1 %v6553_v20  ;;  %v6578_v8 = vcombine.high %v2438_v57, %v2442_v36  ;;  %v6575_v5 = vcombine.low %v2437_v28, %v2441_v4  ;;  %v6577_v32 = vcombine.low %v2438_v57, %v2442_v36  ;;  %v2473_v61 = vld [vmem:[#allocation20 + $0x6e0] sm:$0xff]  ;;  %v2470_v20 = vld [vmem:[#allocation20 + $0x6c8] sm:$0xff] }
 0x5b7   : > { %3872 = vmatprep.subr.bf16.mxu0 %v6560_v31  ;;  %4018 = vmatprep.subr.bf16.mxu1 %v6562_v0  ;;  %v6584_v35 = vcombine.high %v2445_v3, %v2449_v19  ;;  %v6586_v24 = vcombine.high %v2446_v34, %v2450_v43  ;;  %v6583_v2 = vcombine.low %v2445_v3, %v2449_v19  ;;  %v2477_v0 = vld [vmem:[#allocation20 + $0x700] sm:$0xff]  ;;  %v2482_v33 = vld [vmem:[#allocation20 + $0x728] sm:$0xff] }
 0x5b8   : > { %v6585_v44 = vcombine.low %v2446_v34, %v2450_v43  ;;  %v6592_v55 = vcombine.high %v2453_v7, %v2457_v6  ;;  %v6594_v54 = vcombine.high %v2454_v56, %v2458_v62  ;;  %v6591_v46 = vcombine.low %v2453_v7, %v2457_v6  ;;  %v2481_v53 = vld [vmem:[#allocation20 + $0x720] sm:$0xff]  ;;  %v2486_v57 = vld [vmem:[#allocation20 + $0x748] sm:$0xff] }
 0x5b9   : > { %v6593_v58 = vcombine.low %v2454_v56, %v2458_v62  ;;  %v6600_v22 = vcombine.high %v2461_v63, %v2465_v51  ;;  %v6602_v41 = vcombine.high %v2462_v13, %v2466_v11  ;;  %v6599_v16 = vcombine.low %v2461_v63, %v2465_v51  ;;  %v2485_v28 = vld [vmem:[#allocation20 + $0x740] sm:$0xff]  ;;  %v2490_v36 = vld [vmem:[#allocation20 + $0x768] sm:$0xff]  ;;  %v2255_v63 = vld [vmem:[#allocation20 + $0x10] sm:$0xff] }
 0x5ba   : > { %3873 = vmatpush1.bf16.msra.mxu0 %v6559_v14  ;;  %4019 = vmatpush1.bf16.msra.mxu1 %v6561_v38  ;;  %v6601_v48 = vcombine.low %v2462_v13, %v2466_v11  ;;  %v6608_v15 = vcombine.high %v2469_v17, %v2473_v61  ;;  %v6610_v31 = vcombine.high %v2470_v20, %v2474_v50  ;;  %v2489_v4 = vld [vmem:[#allocation20 + $0x760] sm:$0xff]  ;;  %v2494_v34 = vld [vmem:[#allocation20 + $0x788] sm:$0xff]  ;;  %v2259_v51 = vld [vmem:[#allocation20 + $0x30] sm:$0xff] }
 0x5bb   : > { %3874 = vmatprep.subr.bf16.mxu0 %v6568_v42  ;;  %4020 = vmatprep.subr.bf16.mxu1 %v6570_v10  ;;  %v6607_v14 = vcombine.low %v2469_v17, %v2473_v61  ;;  %v6609_v38 = vcombine.low %v2470_v20, %v2474_v50  ;;  %v6616_v42 = vcombine.high %v2477_v0, %v2481_v53  ;;  %v2497_v19 = vld [vmem:[#allocation20 + $0x7a0] sm:$0xff]  ;;  %v2498_v43 = vld [vmem:[#allocation20 + $0x7a8] sm:$0xff]  ;;  %v2256_v13 = vld [vmem:[#allocation20 + $0x18] sm:$0xff] }
 0x5bc   : > { %3852 = vmatmul.mubr.bf16.gmra.mrb[36].mxu0 %v9072_v29  ;;  %3998 = vmatmul.mubr.bf16.gmra.mrb[44].mxu1 %v9072_v29  ;;  %v6618_v10 = vcombine.high %v2478_v21, %v2482_v33  ;;  %v6624_v3 = vcombine.high %v2485_v28, %v2489_v4  ;;  %v2501_v7 = vld [vmem:[#allocation20 + $0x7c0] sm:$0xff]  ;;  %v2502_v56 = vld [vmem:[#allocation20 + $0x7c8] sm:$0xff]  ;;  %v2260_v11 = vld [vmem:[#allocation20 + $0x38] sm:$0xff] }
 0x5bd   : > { %3894 = vmatprep.mubr.bf16.mxu0 %v9082_v59  ;;  %4040 = vmatprep.mubr.bf16.mxu1 %v9082_v59  ;;  %v2505_v6 = vld [vmem:[#allocation20 + $0x7e0] sm:$0xff]  ;;  %v2506_v62 = vld [vmem:[#allocation20 + $0x7e8] sm:$0xff]  ;;  %v2263_v17 = vld [vmem:[#allocation20 + $0x50] sm:$0xff] }
 0x5be   : > { %3875 = vmatpush1.bf16.msra.mxu0 %v6567_v1  ;;  %4021 = vmatpush1.bf16.msra.mxu1 %v6569_v23  ;;  %v6615_v1 = vcombine.low %v2477_v0, %v2481_v53  ;;  %v6617_v23 = vcombine.low %v2478_v21, %v2482_v33  ;;  %v2267_v61 = vld [vmem:[#allocation20 + $0x70] sm:$0xff]  ;;  %v2264_v20 = vld [vmem:[#allocation20 + $0x58] sm:$0xff] }
 0x5bf   : > { %3876 = vmatprep.subr.bf16.mxu0 %v6576_v18  ;;  %4022 = vmatprep.subr.bf16.mxu1 %v6578_v8  ;;  %v6626_v18 = vcombine.high %v2486_v57, %v2490_v36  ;;  %v2493_v8 = vld [vmem:[#allocation20 + $0x780] sm:$0xff]  ;;  %v2268_v50 = vld [vmem:[#allocation20 + $0x78] sm:$0xff]  ;;  %v2271_v0 = vld [vmem:[#allocation20 + $0x90] sm:$0xff] }
 0x5c0   : > { %v2275_v53 = vld [vmem:[#allocation20 + $0xb0] sm:$0xff]  ;;  %v2272_v21 = vld [vmem:[#allocation20 + $0x98] sm:$0xff] }
 0x5c1   : > { %v2276_v33 = vld [vmem:[#allocation20 + $0xb8] sm:$0xff] }
 0x5c2   : > { %3877 = vmatpush1.bf16.msra.mxu0 %v6575_v5  ;;  %4023 = vmatpush1.bf16.msra.mxu1 %v6577_v32  ;;  %v6623_v5 = vcombine.low %v2485_v28, %v2489_v4  ;;  %v6625_v32 = vcombine.low %v2486_v57, %v2490_v36  ;;  %v2279_v28 = vld [vmem:[#allocation20 + $0xd0] sm:$0xff]  ;;  %v2280_v57 = vld [vmem:[#allocation20 + $0xd8] sm:$0xff] }
 0x5c3   : > { %3878 = vmatprep.subr.bf16.mxu0 %v6584_v35  ;;  %4024 = vmatprep.subr.bf16.mxu1 %v6586_v24  ;;  %v6632_v35 = vcombine.high %v2493_v8, %v2497_v19  ;;  %v6634_v24 = vcombine.high %v2494_v34, %v2498_v43  ;;  %v2283_v4 = vld [vmem:[#allocation20 + $0xf0] sm:$0xff]  ;;  %v2284_v36 = vld [vmem:[#allocation20 + $0xf8] sm:$0xff] }
 0x5c6   : > { %3879 = vmatpush1.bf16.msra.mxu0 %v6583_v2  ;;  %4025 = vmatpush1.bf16.msra.mxu1 %v6585_v44  ;;  %v6631_v2 = vcombine.low %v2493_v8, %v2497_v19  ;;  %v6633_v44 = vcombine.low %v2494_v34, %v2498_v43  ;;  %v2287_v8 = vld [vmem:[#allocation20 + $0x110] sm:$0xff]  ;;  %v2288_v34 = vld [vmem:[#allocation20 + $0x118] sm:$0xff] }
 0x5c7   : > { %3880 = vmatprep.subr.bf16.mxu0 %v6592_v55  ;;  %4026 = vmatprep.subr.bf16.mxu1 %v6594_v54  ;;  %v6640_v55 = vcombine.high %v2501_v7, %v2505_v6  ;;  %v6642_v54 = vcombine.high %v2502_v56, %v2506_v62  ;;  %v2291_v19 = vld [vmem:[#allocation20 + $0x130] sm:$0xff]  ;;  %v2292_v43 = vld [vmem:[#allocation20 + $0x138] sm:$0xff] }
 0x5ca   : > { %3881 = vmatpush1.bf16.msra.mxu0 %v6591_v46  ;;  %4027 = vmatpush1.bf16.msra.mxu1 %v6593_v58  ;;  %v6639_v46 = vcombine.low %v2501_v7, %v2505_v6  ;;  %v6641_v58 = vcombine.low %v2502_v56, %v2506_v62  ;;  %v2295_v7 = vld [vmem:[#allocation20 + $0x150] sm:$0xff]  ;;  %v2296_v56 = vld [vmem:[#allocation20 + $0x158] sm:$0xff] }
 0x5cb   : > { %3882 = vmatprep.subr.bf16.mxu0 %v6600_v22  ;;  %4028 = vmatprep.subr.bf16.mxu1 %v6602_v41  ;;  %v6396_v22 = vcombine.high %v2255_v63, %v2259_v51  ;;  %v6398_v41 = vcombine.high %v2256_v13, %v2260_v11  ;;  %v2299_v6 = vld [vmem:[#allocation20 + $0x170] sm:$0xff]  ;;  %v2300_v62 = vld [vmem:[#allocation20 + $0x178] sm:$0xff] }
 0x5ce   : > { %3883 = vmatpush1.bf16.msra.mxu0 %v6599_v16  ;;  %4029 = vmatpush1.bf16.msra.mxu1 %v6601_v48  ;;  %v6395_v16 = vcombine.low %v2255_v63, %v2259_v51  ;;  %v6397_v48 = vcombine.low %v2256_v13, %v2260_v11  ;;  %v2303_v63 = vld [vmem:[#allocation20 + $0x190] sm:$0xff]  ;;  %v2304_v13 = vld [vmem:[#allocation20 + $0x198] sm:$0xff] }
 0x5cf   : > { %3884 = vmatprep.subr.bf16.mxu0 %v6608_v15  ;;  %4030 = vmatprep.subr.bf16.mxu1 %v6610_v31  ;;  %v6404_v15 = vcombine.high %v2263_v17, %v2267_v61  ;;  %v6406_v31 = vcombine.high %v2264_v20, %v2268_v50  ;;  %v2307_v51 = vld [vmem:[#allocation20 + $0x1b0] sm:$0xff]  ;;  %v2308_v11 = vld [vmem:[#allocation20 + $0x1b8] sm:$0xff] }
 0x5d2   : > { %3885 = vmatpush1.bf16.msra.mxu0 %v6607_v14  ;;  %4031 = vmatpush1.bf16.msra.mxu1 %v6609_v38  ;;  %v6403_v14 = vcombine.low %v2263_v17, %v2267_v61  ;;  %v6405_v38 = vcombine.low %v2264_v20, %v2268_v50  ;;  %v2311_v17 = vld [vmem:[#allocation20 + $0x1d0] sm:$0xff]  ;;  %v2312_v20 = vld [vmem:[#allocation20 + $0x1d8] sm:$0xff] }
 0x5d3   : > { %3886 = vmatprep.subr.bf16.mxu0 %v6616_v42  ;;  %4032 = vmatprep.subr.bf16.mxu1 %v6618_v10  ;;  %v6412_v42 = vcombine.high %v2271_v0, %v2275_v53  ;;  %v6414_v10 = vcombine.high %v2272_v21, %v2276_v33  ;;  %v2315_v61 = vld [vmem:[#allocation20 + $0x1f0] sm:$0xff]  ;;  %v2316_v50 = vld [vmem:[#allocation20 + $0x1f8] sm:$0xff] }
 0x5d6   : > { %3887 = vmatpush1.bf16.msra.mxu0 %v6615_v1  ;;  %4033 = vmatpush1.bf16.msra.mxu1 %v6617_v23  ;;  %v6411_v1 = vcombine.low %v2271_v0, %v2275_v53  ;;  %v6413_v23 = vcombine.low %v2272_v21, %v2276_v33  ;;  %v2319_v0 = vld [vmem:[#allocation20 + $0x210] sm:$0xff]  ;;  %v2320_v21 = vld [vmem:[#allocation20 + $0x218] sm:$0xff] }
 0x5d7   : > { %3888 = vmatprep.subr.bf16.mxu0 %v6624_v3  ;;  %4034 = vmatprep.subr.bf16.mxu1 %v6626_v18  ;;  %v6420_v3 = vcombine.high %v2279_v28, %v2283_v4  ;;  %v6422_v18 = vcombine.high %v2280_v57, %v2284_v36  ;;  %v2323_v53 = vld [vmem:[#allocation20 + $0x230] sm:$0xff]  ;;  %v2324_v33 = vld [vmem:[#allocation20 + $0x238] sm:$0xff] }
 0x5da   : > { %3889 = vmatpush1.bf16.msra.mxu0 %v6623_v5  ;;  %4035 = vmatpush1.bf16.msra.mxu1 %v6625_v32  ;;  %v6419_v5 = vcombine.low %v2279_v28, %v2283_v4  ;;  %v6421_v32 = vcombine.low %v2280_v57, %v2284_v36  ;;  %v2327_v28 = vld [vmem:[#allocation20 + $0x250] sm:$0xff]  ;;  %v2328_v57 = vld [vmem:[#allocation20 + $0x258] sm:$0xff] }
 0x5db   : > { %3890 = vmatprep.subr.bf16.mxu0 %v6632_v35  ;;  %4036 = vmatprep.subr.bf16.mxu1 %v6634_v24  ;;  %v6428_v35 = vcombine.high %v2287_v8, %v2291_v19  ;;  %v6430_v24 = vcombine.high %v2288_v34, %v2292_v43  ;;  %v2331_v4 = vld [vmem:[#allocation20 + $0x270] sm:$0xff]  ;;  %v2332_v36 = vld [vmem:[#allocation20 + $0x278] sm:$0xff] }
 0x5de   : > { %3891 = vmatpush1.bf16.msra.mxu0 %v6631_v2  ;;  %4037 = vmatpush1.bf16.msra.mxu1 %v6633_v44  ;;  %v6427_v2 = vcombine.low %v2287_v8, %v2291_v19  ;;  %v6429_v44 = vcombine.low %v2288_v34, %v2292_v43  ;;  %v2339_v8 = vld [vmem:[#allocation20 + $0x2b0] sm:$0xff]  ;;  %v2336_v19 = vld [vmem:[#allocation20 + $0x298] sm:$0xff]  ;;  %v6467_v43 = vcombine.low %v2327_v28, %v2331_v4 }
 0x5df   : > { %3892 = vmatprep.subr.bf16.mxu0 %v6640_v55  ;;  %4038 = vmatprep.subr.bf16.mxu1 %v6642_v54  ;;  %v6436_v55 = vcombine.high %v2295_v7, %v2299_v6  ;;  %v6438_v54 = vcombine.high %v2296_v56, %v2300_v62  ;;  %v2340_v34 = vld [vmem:[#allocation20 + $0x2b8] sm:$0xff] }
 0x5e2   : > { %3893 = vmatpush1.bf16.msra.mxu0 %v6639_v46  ;;  %4039 = vmatpush1.bf16.msra.mxu1 %v6641_v58  ;;  %v6435_v46 = vcombine.low %v2295_v7, %v2299_v6  ;;  %v6437_v58 = vcombine.low %v2296_v56, %v2300_v62  ;;  %v2347_v7 = vld [vmem:[#allocation20 + $0x2f0] sm:$0xff]  ;;  %v2344_v6 = vld [vmem:[#allocation20 + $0x2d8] sm:$0xff] }
 0x5e3   : > { %4081 = vmatprep.subr.bf16.mxu0 %v6396_v22  ;;  %4227 = vmatprep.subr.bf16.mxu1 %v6398_v41  ;;  %v6444_v22 = vcombine.high %v2303_v63, %v2307_v51  ;;  %v6446_v41 = vcombine.high %v2304_v13, %v2308_v11  ;;  %v2348_v56 = vld [vmem:[#allocation20 + $0x2f8] sm:$0xff] }
 0x5e5   : > { %3895 = vmatmul.mubr.bf16.vlgmr.msra.gmra.mrb[24].mxu0 %v9088_v9  ;;  %4041 = vmatmul.mubr.bf16.vlgmr.msra.gmra.mrb[32].mxu1 %v9088_v9 }
 0x5e6   : > { %3904 = vmatprep.mubr.bf16.mxu0 %v9106_v45  ;;  %4050 = vmatprep.mubr.bf16.mxu1 %v9106_v45 }
 0x5e7   : > { %4082 = vmatpush1.bf16.msra.mxu0 %v6395_v16  ;;  %4228 = vmatpush1.bf16.msra.mxu1 %v6397_v48  ;;  %v6443_v16 = vcombine.low %v2303_v63, %v2307_v51  ;;  %v6445_v48 = vcombine.low %v2304_v13, %v2308_v11  ;;  %v2355_v63 = vld [vmem:[#allocation20 + $0x330] sm:$0xff]  ;;  %v2352_v51 = vld [vmem:[#allocation20 + $0x318] sm:$0xff] }
 0x5e8   : > { %4083 = vmatprep.subr.bf16.mxu0 %v6404_v15  ;;  %4229 = vmatprep.subr.bf16.mxu1 %v6406_v31  ;;  %v6452_v15 = vcombine.high %v2311_v17, %v2315_v61  ;;  %v6454_v31 = vcombine.high %v2312_v20, %v2316_v50  ;;  %v2356_v13 = vld [vmem:[#allocation20 + $0x338] sm:$0xff] }
 0x5eb   : > { %4084 = vmatpush1.bf16.msra.mxu0 %v6403_v14  ;;  %4230 = vmatpush1.bf16.msra.mxu1 %v6405_v38  ;;  %v6451_v14 = vcombine.low %v2311_v17, %v2315_v61  ;;  %v6453_v38 = vcombine.low %v2312_v20, %v2316_v50  ;;  %v2363_v17 = vld [vmem:[#allocation20 + $0x370] sm:$0xff]  ;;  %v2360_v61 = vld [vmem:[#allocation20 + $0x358] sm:$0xff] }
 0x5ec   : > { %4085 = vmatprep.subr.bf16.mxu0 %v6412_v42  ;;  %4231 = vmatprep.subr.bf16.mxu1 %v6414_v10  ;;  %v6460_v42 = vcombine.high %v2319_v0, %v2323_v53  ;;  %v6462_v10 = vcombine.high %v2320_v21, %v2324_v33  ;;  %v2364_v20 = vld [vmem:[#allocation20 + $0x378] sm:$0xff] }
 0x5ed   : > { %3905 = vmatmul.mubr.bf16.gmra.mrb[28].mxu0 %v9112_v49  ;;  %4051 = vmatmul.mubr.bf16.gmra.mrb[36].mxu1 %v9112_v49 }
 0x5ee   : > { %3914 = vmatprep.mubr.bf16.mxu0 %v9122_v25  ;;  %4060 = vmatprep.mubr.bf16.mxu1 %v9122_v25 }
 0x5ef   : > { %4086 = vmatpush1.bf16.msra.mxu0 %v6411_v1  ;;  %4232 = vmatpush1.bf16.msra.mxu1 %v6413_v23  ;;  %v6459_v1 = vcombine.low %v2319_v0, %v2323_v53  ;;  %v6461_v23 = vcombine.low %v2320_v21, %v2324_v33  ;;  %v2371_v0 = vld [vmem:[#allocation20 + $0x3b0] sm:$0xff]  ;;  %v2368_v53 = vld [vmem:[#allocation20 + $0x398] sm:$0xff] }
 0x5f0   : > { %4087 = vmatprep.subr.bf16.mxu0 %v6420_v3  ;;  %4233 = vmatprep.subr.bf16.mxu1 %v6422_v18  ;;  %v6468_v3 = vcombine.high %v2327_v28, %v2331_v4  ;;  %v2335_v18 = vld [vmem:[#allocation20 + $0x290] sm:$0xff]  ;;  %v2372_v21 = vld [vmem:[#allocation20 + $0x3b8] sm:$0xff] }
 0x5f1   : > { %v6475_v62 = vcombine.low %v2335_v18, %v2339_v8  ;;  %v2379_v28 = vld [vmem:[#allocation20 + $0x3f0] sm:$0xff]  ;;  %v2376_v4 = vld [vmem:[#allocation20 + $0x3d8] sm:$0xff] }
 0x5f3   : > { %4088 = vmatpush1.bf16.msra.mxu0 %v6419_v5  ;;  %4234 = vmatpush1.bf16.msra.mxu1 %v6421_v32  ;;  %v6469_v5 = vcombine.low %v2328_v57, %v2332_v36  ;;  %v6476_v32 = vcombine.high %v2335_v18, %v2339_v8  ;;  %v2387_v18 = vld [vmem:[#allocation20 + $0x430] sm:$0xff]  ;;  %v2384_v8 = vld [vmem:[#allocation20 + $0x418] sm:$0xff] }
 0x5f4   : > { %4089 = vmatprep.subr.bf16.mxu0 %v6428_v35  ;;  %4235 = vmatprep.subr.bf16.mxu1 %v6430_v24  ;;  %v6478_v35 = vcombine.high %v2336_v19, %v2340_v34  ;;  %v2343_v24 = vld [vmem:[#allocation20 + $0x2d0] sm:$0xff] }
 0x5f5   : > { %3915 = vmatmul.mubr.bf16.gmra.mrb[32].mxu0 %v9126_v27  ;;  %4061 = vmatmul.mubr.bf16.gmra.mrb[40].mxu1 %v9126_v27  ;;  %v6483_v11 = vcombine.low %v2343_v24, %v2347_v7 }
 0x5f6   : > { %3924 = vmatprep.mubr.bf16.mxu0 %v9140_v26  ;;  %4070 = vmatprep.mubr.bf16.mxu1 %v9140_v26 }
 0x5f7   : > { %4090 = vmatpush1.bf16.msra.mxu0 %v6427_v2  ;;  %4236 = vmatpush1.bf16.msra.mxu1 %v6429_v44  ;;  %v6477_v2 = vcombine.low %v2336_v19, %v2340_v34  ;;  %v6484_v44 = vcombine.high %v2343_v24, %v2347_v7  ;;  %v2388_v19 = vld [vmem:[#allocation20 + $0x438] sm:$0xff]  ;;  %v2395_v24 = vld [vmem:[#allocation20 + $0x470] sm:$0xff] }
 0x5f8   : > { %4091 = vmatprep.subr.bf16.mxu0 %v6436_v55  ;;  %4237 = vmatprep.subr.bf16.mxu1 %v6438_v54  ;;  %v6486_v55 = vcombine.high %v2344_v6, %v2348_v56  ;;  %v2351_v54 = vld [vmem:[#allocation20 + $0x310] sm:$0xff]  ;;  %v2392_v7 = vld [vmem:[#allocation20 + $0x458] sm:$0xff] }
 0x5f9   : > { %v6491_v50 = vcombine.low %v2351_v54, %v2355_v63 }
 0x5fb   : > { %4092 = vmatpush1.bf16.msra.mxu0 %v6435_v46  ;;  %4238 = vmatpush1.bf16.msra.mxu1 %v6437_v58  ;;  %v6485_v46 = vcombine.low %v2344_v6, %v2348_v56  ;;  %v6492_v58 = vcombine.high %v2351_v54, %v2355_v63  ;;  %v2396_v6 = vld [vmem:[#allocation20 + $0x478] sm:$0xff]  ;;  %v2403_v54 = vld [vmem:[#allocation20 + $0x4b0] sm:$0xff] }
 0x5fc   : > { %4093 = vmatprep.subr.bf16.mxu0 %v6444_v22  ;;  %4239 = vmatprep.subr.bf16.mxu1 %v6446_v41  ;;  %v6494_v22 = vcombine.high %v2352_v51, %v2356_v13  ;;  %v2359_v41 = vld [vmem:[#allocation20 + $0x350] sm:$0xff]  ;;  %v2400_v63 = vld [vmem:[#allocation20 + $0x498] sm:$0xff] }
 0x5fd   : > { %3925 = vmatmul.mubr.bf16.gmra.mrb[36].mxu0 %v9148_v52  ;;  %4071 = vmatmul.mubr.bf16.gmra.mrb[44].mxu1 %v9148_v52  ;;  %v6499_v33 = vcombine.low %v2359_v41, %v2363_v17 }
 0x5fe   : > { %4113 = vmatprep.mubr.bf16.mxu0 %v9016_v30  ;;  %4259 = vmatprep.mubr.bf16.mxu1 %v9016_v30  ;;  %v6470_v30 = vcombine.high %v2328_v57, %v2332_v36  ;;  %v2380_v57 = vld [vmem:[#allocation20 + $0x3f8] sm:$0xff] }
 0x5ff   : > { %4094 = vmatpush1.bf16.msra.mxu0 %v6443_v16  ;;  %4240 = vmatpush1.bf16.msra.mxu1 %v6445_v48  ;;  %v6493_v16 = vcombine.low %v2352_v51, %v2356_v13  ;;  %v6500_v48 = vcombine.high %v2359_v41, %v2363_v17  ;;  %v2404_v51 = vld [vmem:[#allocation20 + $0x4b8] sm:$0xff]  ;;  %v2411_v41 = vld [vmem:[#allocation20 + $0x4f0] sm:$0xff] }
 0x600   : > { %4095 = vmatprep.subr.bf16.mxu0 %v6452_v15  ;;  %4241 = vmatprep.subr.bf16.mxu1 %v6454_v31  ;;  %v6502_v15 = vcombine.high %v2360_v61, %v2364_v20  ;;  %v2367_v31 = vld [vmem:[#allocation20 + $0x390] sm:$0xff]  ;;  %v2408_v17 = vld [vmem:[#allocation20 + $0x4d8] sm:$0xff] }
 0x601   : > { %v6507_v36 = vcombine.low %v2367_v31, %v2371_v0 }
 0x603   : > { %4096 = vmatpush1.bf16.msra.mxu0 %v6451_v14  ;;  %4242 = vmatpush1.bf16.msra.mxu1 %v6453_v38  ;;  %v6501_v14 = vcombine.low %v2360_v61, %v2364_v20  ;;  %v6508_v38 = vcombine.high %v2367_v31, %v2371_v0  ;;  %v2412_v61 = vld [vmem:[#allocation20 + $0x4f8] sm:$0xff]  ;;  %v6541_v20 = vcombine.low %v2400_v63, %v2404_v51 }
 0x604   : > { %4097 = vmatprep.subr.bf16.mxu0 %v6460_v42  ;;  %4243 = vmatprep.subr.bf16.mxu1 %v6462_v10  ;;  %v6510_v42 = vcombine.high %v2368_v53, %v2372_v21  ;;  %v2375_v10 = vld [vmem:[#allocation20 + $0x3d0] sm:$0xff]  ;;  %v2420_v31 = vld [vmem:[#allocation20 + $0x538] sm:$0xff] }
 0x605   : > { %v6515_v34 = vcombine.low %v2375_v10, %v2379_v28 }
 0x607   : > { %4098 = vmatpush1.bf16.msra.mxu0 %v6459_v1  ;;  %4244 = vmatpush1.bf16.msra.mxu1 %v6461_v23  ;;  %v6509_v1 = vcombine.low %v2368_v53, %v2372_v21  ;;  %v6516_v23 = vcombine.high %v2375_v10, %v2379_v28  ;;  %v6549_v53 = vcombine.low %v2408_v17, %v2412_v61  ;;  %v2428_v10 = vld [vmem:[#allocation20 + $0x578] sm:$0xff] }
 0x608   : > { %4099 = vmatprep.subr.bf16.mxu0 %v6468_v3  ;;  %4245 = vmatprep.subr.bf16.mxu1 %v6470_v30  ;;  %v6518_v3 = vcombine.high %v2376_v4, %v2380_v57  ;;  %v2383_v30 = vld [vmem:[#allocation20 + $0x410] sm:$0xff] }
 0x609   : > { %v6523_v56 = vcombine.low %v2383_v30, %v2387_v18 }
 0x60b   : > { %4100 = vmatpush1.bf16.msra.mxu0 %v6467_v43  ;;  %4246 = vmatpush1.bf16.msra.mxu1 %v6469_v5  ;;  %v6517_v43 = vcombine.low %v2376_v4, %v2380_v57  ;;  %v6524_v5 = vcombine.high %v2383_v30, %v2387_v18 }
 0x60c   : > { %4101 = vmatprep.subr.bf16.mxu0 %v6476_v32  ;;  %4247 = vmatprep.subr.bf16.mxu1 %v6478_v35  ;;  %v6526_v32 = vcombine.high %v2384_v8, %v2388_v19  ;;  %v2391_v35 = vld [vmem:[#allocation20 + $0x450] sm:$0xff] }
 0x60d   : > { %v6531_v13 = vcombine.low %v2391_v35, %v2395_v24 }
 0x60f   : > { %4102 = vmatpush1.bf16.msra.mxu0 %v6475_v62  ;;  %4248 = vmatpush1.bf16.msra.mxu1 %v6477_v2  ;;  %v6525_v62 = vcombine.low %v2384_v8, %v2388_v19  ;;  %v6532_v2 = vcombine.high %v2391_v35, %v2395_v24  ;;  %v2439_v19 = vld [vmem:[#allocation20 + $0x5d0] sm:$0xff] }
 0x610   : > { %4103 = vmatprep.subr.bf16.mxu0 %v6484_v44  ;;  %4249 = vmatprep.subr.bf16.mxu1 %v6486_v55  ;;  %v6534_v44 = vcombine.high %v2392_v7, %v2396_v6  ;;  %v2399_v55 = vld [vmem:[#allocation20 + $0x490] sm:$0xff] }
 0x613   : > { %4104 = vmatpush1.bf16.msra.mxu0 %v6483_v11  ;;  %4250 = vmatpush1.bf16.msra.mxu1 %v6485_v46  ;;  %v6533_v11 = vcombine.low %v2392_v7, %v2396_v6  ;;  %v6540_v46 = vcombine.high %v2399_v55, %v2403_v54  ;;  %v2447_v7 = vld [vmem:[#allocation20 + $0x610] sm:$0xff]  ;;  %v2448_v6 = vld [vmem:[#allocation20 + $0x618] sm:$0xff] }
 0x614   : > { %4105 = vmatprep.subr.bf16.mxu0 %v6492_v58  ;;  %4251 = vmatprep.subr.bf16.mxu1 %v6494_v22  ;;  %v6542_v58 = vcombine.high %v2400_v63, %v2404_v51  ;;  %v2407_v22 = vld [vmem:[#allocation20 + $0x4d0] sm:$0xff]  ;;  %v2456_v51 = vld [vmem:[#allocation20 + $0x658] sm:$0xff] }
 0x615   : > { %v6547_v0 = vcombine.low %v2407_v22, %v2411_v41  ;;  %v2459_v63 = vld [vmem:[#allocation20 + $0x670] sm:$0xff] }
 0x617   : > { %4106 = vmatpush1.bf16.msra.mxu0 %v6491_v50  ;;  %4252 = vmatpush1.bf16.msra.mxu1 %v6493_v16  ;;  %v6548_v50 = vcombine.high %v2407_v22, %v2411_v41  ;;  %v6550_v16 = vcombine.high %v2408_v17, %v2412_v61  ;;  %v2463_v22 = vld [vmem:[#allocation20 + $0x690] sm:$0xff]  ;;  %v2468_v17 = vld [vmem:[#allocation20 + $0x6b8] sm:$0xff] }
 0x618   : > { %4107 = vmatprep.subr.bf16.mxu0 %v6500_v48  ;;  %4253 = vmatprep.subr.bf16.mxu1 %v6502_v15  ;;  %v2415_v48 = vld [vmem:[#allocation20 + $0x510] sm:$0xff]  ;;  %v2416_v15 = vld [vmem:[#allocation20 + $0x518] sm:$0xff] }
 0x619   : > { %v6557_v28 = vcombine.low %v2416_v15, %v2420_v31  ;;  %v2467_v41 = vld [vmem:[#allocation20 + $0x6b0] sm:$0xff] }
 0x61b   : > { %4108 = vmatpush1.bf16.msra.mxu0 %v6499_v33  ;;  %4254 = vmatpush1.bf16.msra.mxu1 %v6501_v14  ;;  %v6558_v33 = vcombine.high %v2416_v15, %v2420_v31  ;;  %v2423_v14 = vld [vmem:[#allocation20 + $0x550] sm:$0xff]  ;;  %v2476_v15 = vld [vmem:[#allocation20 + $0x6f8] sm:$0xff]  ;;  %v6603_v31 = vcombine.low %v2463_v22, %v2467_v41 }
 0x61c   : > { %4109 = vmatprep.subr.bf16.mxu0 %v6508_v38  ;;  %4255 = vmatprep.subr.bf16.mxu1 %v6510_v42  ;;  %v2427_v38 = vld [vmem:[#allocation20 + $0x570] sm:$0xff]  ;;  %v2424_v42 = vld [vmem:[#allocation20 + $0x558] sm:$0xff] }
 0x61d   : > { %v6564_v4 = vcombine.high %v2423_v14, %v2427_v38  ;;  %v6566_v57 = vcombine.high %v2424_v42, %v2428_v10  ;;  %v6565_v30 = vcombine.low %v2424_v42, %v2428_v10  ;;  %v2484_v42 = vld [vmem:[#allocation20 + $0x738] sm:$0xff] }
 0x61f   : > { %4110 = vmatpush1.bf16.msra.mxu0 %v6507_v36  ;;  %4256 = vmatpush1.bf16.msra.mxu1 %v6509_v1  ;;  %v2431_v36 = vld [vmem:[#allocation20 + $0x590] sm:$0xff]  ;;  %v2432_v1 = vld [vmem:[#allocation20 + $0x598] sm:$0xff] }
 0x620   : > { %4111 = vmatprep.subr.bf16.mxu0 %v6516_v23  ;;  %4257 = vmatprep.subr.bf16.mxu1 %v6518_v3  ;;  %v2436_v23 = vld [vmem:[#allocation20 + $0x5b8] sm:$0xff]  ;;  %v6563_v3 = vcombine.low %v2423_v14, %v2427_v38  ;;  %v2483_v14 = vld [vmem:[#allocation20 + $0x730] sm:$0xff] }
 0x621   : > { %v6574_v8 = vcombine.high %v2432_v1, %v2436_v23  ;;  %v2480_v38 = vld [vmem:[#allocation20 + $0x718] sm:$0xff] }
 0x623   : > { %4112 = vmatpush1.bf16.msra.mxu0 %v6515_v34  ;;  %4258 = vmatpush1.bf16.msra.mxu1 %v6517_v43  ;;  %v2443_v34 = vld [vmem:[#allocation20 + $0x5f0] sm:$0xff]  ;;  %v2440_v43 = vld [vmem:[#allocation20 + $0x5d8] sm:$0xff] }
 0x624   : > { %4154 = vmatprep.subr.bf16.mxu0 %v6524_v5  ;;  %4300 = vmatprep.subr.bf16.mxu1 %v6526_v32  ;;  %v2444_v5 = vld [vmem:[#allocation20 + $0x5f8] sm:$0xff]  ;;  %v6573_v32 = vcombine.low %v2432_v1, %v2436_v23  ;;  %v6580_v35 = vcombine.high %v2439_v19, %v2443_v34 }
 0x625   : > { %v6582_v24 = vcombine.high %v2440_v43, %v2444_v5  ;;  %v2492_v1 = vld [vmem:[#allocation20 + $0x778] sm:$0xff] }
 0x626   : > { %4114 = vmatmul.mubr.bf16.vlgmr.msra.gmra.mrb[40].mxu0 %v9020_v39  ;;  %4260 = vmatmul.mubr.bf16.vlgmr.msra.gmra.mrb[48].mxu1 %v9020_v39  ;;  %v6539_v39 = vcombine.low %v2399_v55, %v2403_v54  ;;  %v2455_v54 = vld [vmem:[#allocation20 + $0x650] sm:$0xff] }
 0x627   : > { %4123 = vmatprep.mubr.bf16.mxu0 %v9022_v12  ;;  %4155 = vmatpush1.bf16.msra.mxu0 %v6523_v56  ;;  %v2452_v56 = vld [vmem:[#allocation20 + $0x638] sm:$0xff]  ;;  %v6595_v61 = vcombine.low %v2455_v54, %v2459_v63 }
 0x628   : > { %4269 = vmatprep.mubr.bf16.mxu1 %v9022_v12  ;;  %4301 = vmatpush1.bf16.msra.mxu1 %v6525_v62  ;;  %v2419_v12 = vld [vmem:[#allocation20 + $0x530] sm:$0xff]  ;;  %v6579_v62 = vcombine.low %v2439_v19, %v2443_v34  ;;  %v6590_v55 = vcombine.high %v2448_v6, %v2452_v56  ;;  %v2496_v34 = vld [vmem:[#allocation20 + $0x798] sm:$0xff] }
 0x629   : > { %4156 = vmatprep.subr.bf16.mxu0 %v6532_v2  ;;  %4302 = vmatprep.subr.bf16.mxu1 %v6534_v44  ;;  %v6556_v21 = vcombine.high %v2415_v48, %v2419_v12  ;;  %v6581_v2 = vcombine.low %v2440_v43, %v2444_v5  ;;  %v2499_v19 = vld [vmem:[#allocation20 + $0x7b0] sm:$0xff]  ;;  %v2500_v43 = vld [vmem:[#allocation20 + $0x7b8] sm:$0xff] }
 0x62b   : > { %4157 = vmatpush1.bf16.msra.mxu0 %v6531_v13  ;;  %v2460_v13 = vld [vmem:[#allocation20 + $0x678] sm:$0xff] }
 0x62c   : > { %4303 = vmatpush1.bf16.msra.mxu1 %v6533_v11  ;;  %4158 = vmatprep.subr.bf16.mxu0 %v6540_v46  ;;  %v6589_v11 = vcombine.low %v2448_v6, %v2452_v56  ;;  %v6596_v46 = vcombine.high %v2455_v54, %v2459_v63  ;;  %v2508_v6 = vld [vmem:[#allocation20 + $0x7f8] sm:$0xff] }
 0x62d   : > { %4304 = vmatprep.subr.bf16.mxu1 %v6542_v58  ;;  %v6598_v58 = vcombine.high %v2456_v51, %v2460_v13 }
 0x62e   : > { %4124 = vmatmul.mubr.bf16.gmra.mrb[44].mxu0 %v9031_v47  ;;  %4270 = vmatmul.mubr.bf16.gmra.mrb[52].mxu1 %v9031_v47  ;;  %v6555_v47 = vcombine.low %v2415_v48, %v2419_v12  ;;  %v2475_v48 = vld [vmem:[#allocation20 + $0x6f0] sm:$0xff]  ;;  %v2472_v12 = vld [vmem:[#allocation20 + $0x6d8] sm:$0xff] }
 0x62f   : > { %4133 = vmatprep.mubr.bf16.mxu0 %v9041_v40  ;;  %4159 = vmatpush1.bf16.msra.mxu0 %v6539_v39  ;;  %v6597_v39 = vcombine.low %v2456_v51, %v2460_v13 }
 0x630   : > { %4279 = vmatprep.mubr.bf16.mxu1 %v9041_v40  ;;  %4305 = vmatpush1.bf16.msra.mxu1 %v6541_v20  ;;  %v2435_v40 = vld [vmem:[#allocation20 + $0x5b0] sm:$0xff]  ;;  %v6604_v20 = vcombine.high %v2463_v22, %v2467_v41 }
 0x631   : > { %4160 = vmatprep.subr.bf16.mxu0 %v6548_v50  ;;  %4306 = vmatprep.subr.bf16.mxu1 %v6550_v16  ;;  %v6572_v18 = vcombine.high %v2431_v36, %v2435_v40  ;;  %v2471_v16 = vld [vmem:[#allocation20 + $0x6d0] sm:$0xff] }
 0x632   : > { %v6611_v10 = vcombine.low %v2471_v16, %v2475_v48 }
 0x633   : > { %4161 = vmatpush1.bf16.msra.mxu0 %v6547_v0 }
 0x634   : > { %4307 = vmatpush1.bf16.msra.mxu1 %v6549_v53  ;;  %4162 = vmatprep.subr.bf16.mxu0 %v6556_v21  ;;  %v6612_v53 = vcombine.high %v2471_v16, %v2475_v48  ;;  %v6614_v21 = vcombine.high %v2472_v12, %v2476_v15 }
 0x635   : > { %4308 = vmatprep.subr.bf16.mxu1 %v6558_v33  ;;  %v2479_v33 = vld [vmem:[#allocation20 + $0x710] sm:$0xff] }
 0x636   : > { %4134 = vmatmul.mubr.bf16.gmra.mrb[48].mxu0 %v9056_v60  ;;  %4280 = vmatmul.mubr.bf16.gmra.mrb[56].mxu1 %v9056_v60  ;;  %v6571_v60 = vcombine.low %v2431_v36, %v2435_v40  ;;  %v2491_v36 = vld [vmem:[#allocation20 + $0x770] sm:$0xff]  ;;  %v2488_v40 = vld [vmem:[#allocation20 + $0x758] sm:$0xff]  ;;  %v6619_v23 = vcombine.low %v2479_v33, %v2483_v14 }
 0x637   : > { %4143 = vmatprep.mubr.bf16.mxu0 %v9062_v37  ;;  %4163 = vmatpush1.bf16.msra.mxu0 %v6555_v47  ;;  %v6613_v47 = vcombine.low %v2472_v12, %v2476_v15 }
 0x638   : > { %4289 = vmatprep.mubr.bf16.mxu1 %v9062_v37  ;;  %4309 = vmatpush1.bf16.msra.mxu1 %v6557_v28  ;;  %v2451_v37 = vld [vmem:[#allocation20 + $0x630] sm:$0xff]  ;;  %v6620_v28 = vcombine.high %v2479_v33, %v2483_v14 }
 0x639   : > { %4164 = vmatprep.subr.bf16.mxu0 %v6564_v4  ;;  %4310 = vmatprep.subr.bf16.mxu1 %v6566_v57  ;;  %v6588_v44 = vcombine.high %v2447_v7, %v2451_v37  ;;  %v6622_v4 = vcombine.high %v2480_v38, %v2484_v42  ;;  %v2487_v57 = vld [vmem:[#allocation20 + $0x750] sm:$0xff] }
 0x63a   : > { %v6627_v5 = vcombine.low %v2487_v57, %v2491_v36 }
 0x63b   : > { %4165 = vmatpush1.bf16.msra.mxu0 %v6563_v3  ;;  %v6621_v3 = vcombine.low %v2480_v38, %v2484_v42 }
 0x63c   : > { %4311 = vmatpush1.bf16.msra.mxu1 %v6565_v30  ;;  %4166 = vmatprep.subr.bf16.mxu0 %v6572_v18  ;;  %v6628_v30 = vcombine.high %v2487_v57, %v2491_v36  ;;  %v6630_v18 = vcombine.high %v2488_v40, %v2492_v1 }
 0x63d   : > { %4312 = vmatprep.subr.bf16.mxu1 %v6574_v8  ;;  %v2495_v8 = vld [vmem:[#allocation20 + $0x790] sm:$0xff] }
 0x63e   : > { %4144 = vmatmul.mubr.bf16.gmra.mrb[52].mxu0 %v9072_v29  ;;  %4290 = vmatmul.mubr.bf16.gmra.mrb[60].mxu1 %v9072_v29  ;;  %v6587_v29 = vcombine.low %v2447_v7, %v2451_v37  ;;  %v2507_v7 = vld [vmem:[#allocation20 + $0x7f0] sm:$0xff]  ;;  %v2504_v37 = vld [vmem:[#allocation20 + $0x7d8] sm:$0xff]  ;;  %v6635_v56 = vcombine.low %v2495_v8, %v2499_v19 }
 0x63f   : > { %4167 = vmatpush1.bf16.msra.mxu0 %v6571_v60  ;;  %4186 = vmatprep.mubr.bf16.mxu0 %v9082_v59  ;;  %v6629_v60 = vcombine.low %v2488_v40, %v2492_v1  ;;  %v6645_v54 = vcombine.low %v2504_v37, %v2508_v6 }
 0x640   : > { %4313 = vmatpush1.bf16.msra.mxu1 %v6573_v32  ;;  %4332 = vmatprep.mubr.bf16.mxu1 %v9082_v59  ;;  %v2464_v59 = vld [vmem:[#allocation20 + $0x698] sm:$0xff]  ;;  %v6636_v32 = vcombine.high %v2495_v8, %v2499_v19 }
 0x641   : > { %4168 = vmatprep.subr.bf16.mxu0 %v6580_v35  ;;  %4314 = vmatprep.subr.bf16.mxu1 %v6582_v24  ;;  %v6606_v50 = vcombine.high %v2464_v59, %v2468_v17  ;;  %v6605_v0 = vcombine.low %v2464_v59, %v2468_v17  ;;  %v6638_v35 = vcombine.high %v2496_v34, %v2500_v43  ;;  %v2503_v24 = vld [vmem:[#allocation20 + $0x7d0] sm:$0xff] }
 0x643   : > { %4169 = vmatpush1.bf16.msra.mxu0 %v6579_v62  ;;  %v6637_v62 = vcombine.low %v2496_v34, %v2500_v43 }
 0x644   : > { %4315 = vmatpush1.bf16.msra.mxu1 %v6581_v2  ;;  %4170 = vmatprep.subr.bf16.mxu0 %v6588_v44  ;;  %v6644_v2 = vcombine.high %v2503_v24, %v2507_v7  ;;  %v6646_v44 = vcombine.high %v2504_v37, %v2508_v6 }
 0x645   : > { %4316 = vmatprep.subr.bf16.mxu1 %v6590_v55  ;;  %v6643_v55 = vcombine.low %v2503_v24, %v2507_v7 }
 0x647   : > { %4171 = vmatpush1.bf16.msra.mxu0 %v6587_v29 }
 0x648   : > { %4317 = vmatpush1.bf16.msra.mxu1 %v6589_v11  ;;  %4172 = vmatprep.subr.bf16.mxu0 %v6596_v46 }
 0x649   : > { %4318 = vmatprep.subr.bf16.mxu1 %v6598_v58 }
 0x64b   : > { %4173 = vmatpush1.bf16.msra.mxu0 %v6595_v61 }
 0x64c   : > { %4319 = vmatpush1.bf16.msra.mxu1 %v6597_v39  ;;  %4174 = vmatprep.subr.bf16.mxu0 %v6604_v20 }
 0x64d   : > { %4320 = vmatprep.subr.bf16.mxu1 %v6606_v50 }
 0x64f   : > { %4175 = vmatpush1.bf16.msra.mxu0 %v6603_v31 }
 0x650   : > { %4321 = vmatpush1.bf16.msra.mxu1 %v6605_v0  ;;  %4176 = vmatprep.subr.bf16.mxu0 %v6612_v53 }
 0x651   : > { %4322 = vmatprep.subr.bf16.mxu1 %v6614_v21 }
 0x653   : > { %4177 = vmatpush1.bf16.msra.mxu0 %v6611_v10 }
 0x654   : > { %4323 = vmatpush1.bf16.msra.mxu1 %v6613_v47  ;;  %4178 = vmatprep.subr.bf16.mxu0 %v6620_v28 }
 0x655   : > { %4324 = vmatprep.subr.bf16.mxu1 %v6622_v4 }
 0x657   : > { %4179 = vmatpush1.bf16.msra.mxu0 %v6619_v23 }
 0x658   : > { %4325 = vmatpush1.bf16.msra.mxu1 %v6621_v3  ;;  %4180 = vmatprep.subr.bf16.mxu0 %v6628_v30 }
 0x659   : > { %4326 = vmatprep.subr.bf16.mxu1 %v6630_v18 }
 0x65b   : > { %4181 = vmatpush1.bf16.msra.mxu0 %v6627_v5 }
 0x65c   : > { %4327 = vmatpush1.bf16.msra.mxu1 %v6629_v60  ;;  %4182 = vmatprep.subr.bf16.mxu0 %v6636_v32 }
 0x65d   : > { %4328 = vmatprep.subr.bf16.mxu1 %v6638_v35 }
 0x65f   : > { %4183 = vmatpush1.bf16.msra.mxu0 %v6635_v56 }
 0x660   : > { %4329 = vmatpush1.bf16.msra.mxu1 %v6637_v62  ;;  %4184 = vmatprep.subr.bf16.mxu0 %v6644_v2 }
 0x661   : > { %4330 = vmatprep.subr.bf16.mxu1 %v6646_v44 }
 0x663   : > { %4185 = vmatpush1.bf16.msra.mxu0 %v6643_v55 }
 0x664   : > { %4331 = vmatpush1.bf16.msra.mxu1 %v6645_v54 }
 0x666   : > { %4187 = vmatmul.mubr.bf16.vlgmr.msra.gmra.mrb[40].mxu0 %v9088_v9 }
 0x667   : > { %4333 = vmatmul.mubr.bf16.vlgmr.msra.gmra.mrb[48].mxu1 %v9088_v9  ;;  %4196 = vmatprep.mubr.bf16.mxu0 %v9106_v45 }
 0x668   : > { %4342 = vmatprep.mubr.bf16.mxu1 %v9106_v45 }
 0x66e   : > { %4197 = vmatmul.mubr.bf16.gmra.mrb[44].mxu0 %v9112_v49 }
 0x66f   : > { %4343 = vmatmul.mubr.bf16.gmra.mrb[52].mxu1 %v9112_v49  ;;  %4206 = vmatprep.mubr.bf16.mxu0 %v9122_v25 }
 0x670   : > { %4352 = vmatprep.mubr.bf16.mxu1 %v9122_v25 }
 0x676   : > { %4207 = vmatmul.mubr.bf16.gmra.mrb[48].mxu0 %v9126_v27 }
 0x677   : > { %4353 = vmatmul.mubr.bf16.gmra.mrb[56].mxu1 %v9126_v27  ;;  %4216 = vmatprep.mubr.bf16.mxu0 %v9140_v26 }
 0x678   : > { %4362 = vmatprep.mubr.bf16.mxu1 %v9140_v26 }
 0x67e   : > { %4217 = vmatmul.mubr.bf16.gmra.mrb[52].mxu0 %v9148_v52 }
 0x67f   : > { %4363 = vmatmul.mubr.bf16.gmra.mrb[60].mxu1 %v9148_v52 }
 0x6b8   : > { %v9204_v9 = vpop.f32.mrb[24].mxu0  ;;  %v9206_v45 = vpop.f32.mrb[32].mxu1 }
 0x6b9   : > { %v9208_v49 = vpop.f32.mrb[25].mxu0  ;;  %v9210_v63 = vpop.f32.mrb[33].mxu1  ;;  %v4477_v25 = vmul.f32 %v9204_v9, %v9204_v9  ;;  %v4479_v27 = vmul.f32 %v9206_v45, %v9206_v45 }
 0x6ba   : > { %v4478_v26 = vmul.f32 %v9208_v49, %v9208_v49  ;;  %v4480_v52 = vmul.f32 %v9210_v63, %v9210_v63  ;;  %v9220_v51 = vpop.f32.mrb[26].mxu0  ;;  %v9222_v13 = vpop.f32.mrb[34].mxu1 }
 0x6bb   : > { %v4373_v29 = vadd.f32 %v9220_v51, %v9204_v9  ;;  %v4485_v11 = vmul.f32 %v9220_v51, %v9220_v51  ;;  %v4399_v46 = vadd.f32 %v9222_v13, %v9206_v45  ;;  %v4487_v58 = vmul.f32 %v9222_v13, %v9222_v13  ;;  %v9232_v22 = vpop.f32.mrb[27].mxu0  ;;  %v9234_v41 = vpop.f32.mrb[35].mxu1 }
 0x6bc   : > { %v4386_v59 = vadd.f32 %v9232_v22, %v9208_v49  ;;  %v4486_v17 = vmul.f32 %v9232_v22, %v9232_v22  ;;  %v4412_v61 = vadd.f32 %v9234_v41, %v9210_v63  ;;  %v4488_v39 = vmul.f32 %v9234_v41, %v9234_v41 }
 0x6bd   : > { %v4541_v20 = vadd.f32 %v4485_v11, %v4477_v25  ;;  %v4567_v50 = vadd.f32 %v4487_v58, %v4479_v27 }
 0x6be   : > { %v4554_v16 = vadd.f32 %v4486_v17, %v4478_v26  ;;  %v4580_v48 = vadd.f32 %v4488_v39, %v4480_v52 }
 0x6c0   : > { %v9244_v12 = vpop.f32.mrb[28].mxu0  ;;  %v9246_v15 = vpop.f32.mrb[36].mxu1 }
 0x6c1   : > { %v4374_v31 = vadd.f32 %v4373_v29, %v9244_v12  ;;  %v4493_v0 = vmul.f32 %v9244_v12, %v9244_v12  ;;  %v4400_v53 = vadd.f32 %v4399_v46, %v9246_v15  ;;  %v4495_v21 = vmul.f32 %v9246_v15, %v9246_v15  ;;  %v9254_v33 = vpop.f32.mrb[29].mxu0  ;;  %v9256_v14 = vpop.f32.mrb[37].mxu1 }
 0x6c2   : > { %v4387_v38 = vadd.f32 %v4386_v59, %v9254_v33  ;;  %v4494_v42 = vmul.f32 %v9254_v33, %v9254_v33  ;;  %v4413_v10 = vadd.f32 %v4412_v61, %v9256_v14  ;;  %v4496_v47 = vmul.f32 %v9256_v14, %v9256_v14  ;;  %v9264_v28 = vpop.f32.mrb[30].mxu0  ;;  %v9266_v4 = vpop.f32.mrb[38].mxu1 }
 0x6c3   : > { %10617 = vst [vmem:[#allocation50_spill] sm:$0xff] %v9264_v28  ;;  %10618 = vst [vmem:[#allocation52_spill] sm:$0xff] %v9266_v4  ;;  %v4542_v57 = vadd.f32 %v4541_v20, %v4493_v0  ;;  %v4568_v36 = vadd.f32 %v4567_v50, %v4495_v21  ;;  %v4375_v40 = vadd.f32 %v4374_v31, %v9264_v28  ;;  %v9271_v23 = vpop.f32.mrb[31].mxu0  ;;  %v9273_v3 = vpop.f32.mrb[39].mxu1 }
 0x6c4   : > { %v4501_v1 = vmul.f32 %v9264_v28, %v9264_v28  ;;  %10619 = vst [vmem:[#allocation44_spill] sm:$0xff] %v9271_v23  ;;  %10620 = vst [vmem:[#allocation45_spill] sm:$0xff] %v9273_v3  ;;  %v4555_v30 = vadd.f32 %v4554_v16, %v4494_v42  ;;  %v4581_v18 = vadd.f32 %v4580_v48, %v4496_v47 }
 0x6c5   : > { %v4401_v8 = vadd.f32 %v4400_v53, %v9266_v4  ;;  %v4503_v19 = vmul.f32 %v9266_v4, %v9266_v4  ;;  %v4388_v43 = vadd.f32 %v4387_v38, %v9271_v23  ;;  %v4502_v5 = vmul.f32 %v9271_v23, %v9271_v23 }
 0x6c6   : > { %v4543_v34 = vadd.f32 %v4542_v57, %v4501_v1  ;;  %v4414_v60 = vadd.f32 %v4413_v10, %v9273_v3  ;;  %v4504_v35 = vmul.f32 %v9273_v3, %v9273_v3 }
 0x6c7   : > { %v4569_v32 = vadd.f32 %v4568_v36, %v4503_v19  ;;  %v4556_v24 = vadd.f32 %v4555_v30, %v4502_v5 }
 0x6c8   : > { %v4582_v7 = vadd.f32 %v4581_v18, %v4504_v35  ;;  %v9284_v37 = vpop.f32.mrb[32].mxu0  ;;  %v9286_v6 = vpop.f32.mrb[40].mxu1 }
 0x6c9   : > { %10621 = vst [vmem:[#allocation46_spill] sm:$0xff] %v9284_v37  ;;  %10622 = vst [vmem:[#allocation47_spill] sm:$0xff] %v9286_v6  ;;  %v4376_v56 = vadd.f32 %v4375_v40, %v9284_v37  ;;  %v4509_v62 = vmul.f32 %v9284_v37, %v9284_v37  ;;  %v4402_v2 = vadd.f32 %v4401_v8, %v9286_v6  ;;  %v9294_v55 = vpop.f32.mrb[33].mxu0  ;;  %v9296_v54 = vpop.f32.mrb[41].mxu1 }
 0x6ca   : > { %v4511_v44 = vmul.f32 %v9286_v6, %v9286_v6  ;;  %10623 = vst [vmem:[#allocation48_spill] sm:$0xff] %v9294_v55  ;;  %10624 = vst [vmem:[#allocation55_spill] sm:$0xff] %v9296_v54  ;;  %v4389_v25 = vadd.f32 %v4388_v43, %v9294_v55  ;;  %v4510_v27 = vmul.f32 %v9294_v55, %v9294_v55  ;;  %v9304_v29 = vpop.f32.mrb[34].mxu0  ;;  %v9306_v11 = vpop.f32.mrb[42].mxu1 }
 0x6cb   : > { %v4415_v26 = vadd.f32 %v4414_v60, %v9296_v54  ;;  %v4512_v52 = vmul.f32 %v9296_v54, %v9296_v54  ;;  %10625 = vst [vmem:[#allocation51_spill] sm:$0xff] %v9304_v29  ;;  %10626 = vst [vmem:[#allocation49_spill] sm:$0xff] %v9306_v11  ;;  %v4544_v46 = vadd.f32 %v4543_v34, %v4509_v62  ;;  %v9311_v61 = vpop.f32.mrb[35].mxu0  ;;  %v9313_v39 = vpop.f32.mrb[43].mxu1 }
 0x6cc   : > { %v4570_v58 = vadd.f32 %v4569_v32, %v4511_v44  ;;  %v4377_v59 = vadd.f32 %v4376_v56, %v9304_v29  ;;  %v4517_v17 = vmul.f32 %v9304_v29, %v9304_v29  ;;  %10627 = vst [vmem:[#allocation56_spill] sm:$0xff] %v9311_v61  ;;  %10628 = vst [vmem:[#allocation57_spill] sm:$0xff] %v9313_v39 }
 0x6cd   : > { %v4557_v20 = vadd.f32 %v4556_v24, %v4510_v27  ;;  %v4583_v50 = vadd.f32 %v4582_v7, %v4512_v52  ;;  %v4403_v16 = vadd.f32 %v4402_v2, %v9306_v11  ;;  %v4519_v48 = vmul.f32 %v9306_v11, %v9306_v11 }
 0x6ce   : > { %v4545_v31 = vadd.f32 %v4544_v46, %v4517_v17  ;;  %v4390_v0 = vadd.f32 %v4389_v25, %v9311_v61  ;;  %v4518_v53 = vmul.f32 %v9311_v61, %v9311_v61  ;;  %v4416_v21 = vadd.f32 %v4415_v26, %v9313_v39 }
 0x6cf   : > { %v4571_v38 = vadd.f32 %v4570_v58, %v4519_v48  ;;  %v4520_v42 = vmul.f32 %v9313_v39, %v9313_v39 }
 0x6d0   : > { %v4558_v10 = vadd.f32 %v4557_v20, %v4518_v53  ;;  %v9324_v57 = vpop.f32.mrb[36].mxu0  ;;  %v9326_v36 = vpop.f32.mrb[44].mxu1 }
 0x6d1   : > { %v4584_v47 = vadd.f32 %v4583_v50, %v4520_v42  ;;  %10629 = vst [vmem:[#allocation58_spill] sm:$0xff] %v9324_v57  ;;  %10630 = vst [vmem:[#allocation59_spill] sm:$0xff] %v9326_v36  ;;  %v4378_v40 = vadd.f32 %v4377_v59, %v9324_v57  ;;  %v4525_v1 = vmul.f32 %v9324_v57, %v9324_v57  ;;  %v9334_v8 = vpop.f32.mrb[37].mxu0  ;;  %v9336_v19 = vpop.f32.mrb[45].mxu1 }
 0x6d2   : > { %v4404_v30 = vadd.f32 %v4403_v16, %v9326_v36  ;;  %v4527_v18 = vmul.f32 %v9326_v36, %v9326_v36  ;;  %10631 = vst [vmem:[#allocation60_spill] sm:$0xff] %v9334_v8  ;;  %10632 = vst [vmem:[#allocation61_spill] sm:$0xff] %v9336_v19  ;;  %v4391_v34 = vadd.f32 %v4390_v0, %v9334_v8  ;;  %v9344_v32 = vpop.f32.mrb[38].mxu0  ;;  %v9346_v35 = vpop.f32.mrb[46].mxu1 }
 0x6d3   : > { %v4526_v43 = vmul.f32 %v9334_v8, %v9334_v8  ;;  %v4417_v5 = vadd.f32 %v4416_v21, %v9336_v19  ;;  %v4528_v60 = vmul.f32 %v9336_v19, %v9336_v19  ;;  %10633 = vst [vmem:[#allocation62_spill] sm:$0xff] %v9344_v32  ;;  %10634 = vst [vmem:[#allocation63_spill] sm:$0xff] %v9346_v35  ;;  %v9351_v2 = vpop.f32.mrb[39].mxu0  ;;  %v9353_v44 = vpop.f32.mrb[47].mxu1 }
 0x6d4   : > { %v4546_v24 = vadd.f32 %v4545_v31, %v4525_v1  ;;  %v4572_v7 = vadd.f32 %v4571_v38, %v4527_v18  ;;  %v4379_v56 = vadd.f32 %v4378_v40, %v9344_v32  ;;  %v4533_v62 = vmul.f32 %v9344_v32, %v9344_v32  ;;  %10635 = vst [vmem:[#allocation64_spill] sm:$0xff] %v9351_v2 }
 0x6d5   : > { %10636 = vst [vmem:[#allocation65_spill] sm:$0xff] %v9353_v44  ;;  %v4559_v25 = vadd.f32 %v4558_v10, %v4526_v43  ;;  %v4585_v27 = vadd.f32 %v4584_v47, %v4528_v60  ;;  %v4405_v26 = vadd.f32 %v4404_v30, %v9346_v35  ;;  %v4535_v52 = vmul.f32 %v9346_v35, %v9346_v35 }
 0x6d6   : > { %v4380_v46 = vrot.slane %v4379_v56, 4  ;;  %v4547_v58 = vadd.f32 %v4546_v24, %v4533_v62  ;;  %v4392_v59 = vadd.f32 %v4391_v34, %v9351_v2  ;;  %v4534_v17 = vmul.f32 %v9351_v2, %v9351_v2 }
 0x6d7   : > { %v4406_v20 = vrot.slane %v4405_v26, 4  ;;  %v4573_v50 = vadd.f32 %v4572_v7, %v4535_v52  ;;  %v4418_v16 = vadd.f32 %v4417_v5, %v9353_v44  ;;  %v4536_v48 = vmul.f32 %v9353_v44, %v9353_v44 }
 0x6d8   : > { %v4381_v31 = vadd.f32 %v4380_v46, %v4379_v56  ;;  %v4548_v0 = vrot.slane %v4547_v58, 4  ;;  %v4393_v53 = vrot.slane %v4392_v59, 4  ;;  %v4560_v21 = vadd.f32 %v4559_v25, %v4534_v17 }
 0x6d9   : > { %v4407_v38 = vadd.f32 %v4406_v20, %v4405_v26  ;;  %v4574_v42 = vrot.slane %v4573_v50, 4  ;;  %v4419_v10 = vrot.slane %v4418_v16, 4  ;;  %v4586_v47 = vadd.f32 %v4585_v27, %v4536_v48 }
 0x6da   : > { %v4382_v40 = vrot.slane %v4381_v31, 2  ;;  %v4549_v1 = vadd.f32 %v4548_v0, %v4547_v58  ;;  %v4394_v30 = vadd.f32 %v4393_v53, %v4392_v59  ;;  %v4561_v18 = vrot.slane %v4560_v21, 4 }
 0x6db   : > { %v4408_v34 = vrot.slane %v4407_v38, 2  ;;  %v4575_v43 = vadd.f32 %v4574_v42, %v4573_v50  ;;  %v4420_v60 = vadd.f32 %v4419_v10, %v4418_v16  ;;  %v4587_v24 = vrot.slane %v4586_v47, 4 }
 0x6dc   : > { %v4383_v5 = vadd.f32 %v4382_v40, %v4381_v31  ;;  %v4550_v7 = vrot.slane %v4549_v1, 2  ;;  %v4395_v62 = vrot.slane %v4394_v30, 2  ;;  %v4562_v52 = vadd.f32 %v4561_v18, %v4560_v21 }
 0x6dd   : > { %v4409_v56 = vadd.f32 %v4408_v34, %v4407_v38  ;;  %v4576_v46 = vrot.slane %v4575_v43, 2  ;;  %v4421_v44 = vrot.slane %v4420_v60, 2  ;;  %v4588_v25 = vadd.f32 %v4587_v24, %v4586_v47 }
 0x6de   : > { %v4384_v26 = vrot.slane %v4383_v5, 1  ;;  %v4551_v17 = vadd.f32 %v4550_v7, %v4549_v1  ;;  %v4396_v20 = vadd.f32 %v4395_v62, %v4394_v30  ;;  %v4563_v27 = vrot.slane %v4562_v52, 2 }
 0x6df   : > { %v4410_v48 = vrot.slane %v4409_v56, 1  ;;  %v4577_v58 = vadd.f32 %v4576_v46, %v4575_v43  ;;  %v4422_v59 = vadd.f32 %v4421_v44, %v4420_v60  ;;  %v4589_v0 = vrot.slane %v4588_v25, 2 }
 0x6e0   : > { %v4385_v53 = vadd.f32 %v4384_v26, %v4383_v5  ;;  %v4552_v50 = vrot.slane %v4551_v17, 1  ;;  %v4397_v16 = vrot.slane %v4396_v20, 1  ;;  %v4564_v42 = vadd.f32 %v4563_v27, %v4562_v52 }
 0x6e1   : > { %v4411_v31 = vadd.f32 %v4410_v48, %v4409_v56  ;;  %v4578_v10 = vrot.slane %v4577_v58, 1  ;;  %v4423_v40 = vrot.slane %v4422_v59, 1  ;;  %v4590_v21 = vadd.f32 %v4589_v0, %v4588_v25 }
 0x6e2   : > { %v4553_v38 = vadd.f32 %v4552_v50, %v4551_v17  ;;  %v9364_v18 = vmul.f32 0.015625, %v4385_v53  ;;  %v4398_v47 = vadd.f32 %v4397_v16, %v4396_v20  ;;  %v4565_v34 = vrot.slane %v4564_v42, 1 }
 0x6e3   : > { %v4579_v1 = vadd.f32 %v4578_v10, %v4577_v58  ;;  %v9366_v30 = vmul.f32 0.015625, %v4411_v31  ;;  %v4424_v24 = vadd.f32 %v4423_v40, %v4422_v59  ;;  %v4591_v43 = vrot.slane %v4590_v21, 1 }
 0x6e4   : > { %v4653_v44 = vmul.f32 0.015625, %v4553_v38  ;;  %v4661_v60 = vmul.f32 %v9364_v18, %v9364_v18  ;;  %v4566_v5 = vadd.f32 %v4565_v34, %v4564_v42  ;;  %v9370_v7 = vmul.f32 0.015625, %v4398_v47 }
 0x6e5   : > { %v4655_v62 = vmul.f32 0.015625, %v4579_v1  ;;  %v4663_v52 = vmul.f32 %v9366_v30, %v9366_v30  ;;  %v4592_v56 = vadd.f32 %v4591_v43, %v4590_v21  ;;  %v9374_v46 = vmul.f32 0.015625, %v4424_v24  ;;  %v10637_v43 = vld [vmem:[#allocation42_spill] sm:$0xff] }
 0x6e6   : > { %v4669_v25 = vsub.f32 %v4653_v44, %v4661_v60  ;;  %v4654_v26 = vmul.f32 0.015625, %v4566_v5  ;;  %v4662_v17 = vmul.f32 %v9370_v7, %v9370_v7 }
 0x6e7   : > { %v4671_v20 = vsub.f32 %v4655_v62, %v4663_v52  ;;  %v4656_v27 = vmul.f32 0.015625, %v4592_v56  ;;  %v4664_v48 = vmul.f32 %v9374_v46, %v9374_v46 }
 0x6e8   : > { %v4677_v58 = vmax.f32 %v4669_v25, 0.0  ;;  %v4670_v59 = vsub.f32 %v4654_v26, %v4662_v17 }
 0x6e9   : > { %v4679_v0 = vmax.f32 %v4671_v20, 0.0  ;;  %v4672_v53 = vsub.f32 %v4656_v27, %v4664_v48 }
 0x6ea   : > { %v4686_v50 = vadd.f32 1e-05, %v4677_v58  ;;  %v4678_v16 = vmax.f32 %v4670_v59, 0.0 }
 0x6eb   : > { %v4688_v42 = vadd.f32 1e-05, %v4679_v0  ;;  %v4680_v31 = vmax.f32 %v4672_v53, 0.0 }
 0x6ec   : > { %7318 = vrsqrt.f32 %v4686_v50  ;;  %v4687_v10 = vadd.f32 1e-05, %v4678_v16 }
 0x6ed   : > { %7320 = vrsqrt.f32 %v4688_v42  ;;  %v4689_v40 = vadd.f32 1e-05, %v4680_v31 }
 0x6ee   : > { %7322 = vrsqrt.f32 %v4687_v10 }
 0x6ef   : > { %7324 = vrsqrt.f32 %v4689_v40 }
 0x6f6   : > { %v7319_v21 = vpop.eup %7318 }
 0x6f7   : > { %v7321_v38 = vpop.eup %7320 }
 0x6f8   : > { %v7323_v47 = vpop.eup %7322 }
 0x6f9   : > { %v7325_v34 = vpop.eup %7324  ;;  %v4710_v1 = vcombine.low %v7319_v21, %v7323_v47 }
 0x6fa   : > { %v4711_v24 = vcombine.low %v7321_v38, %v7325_v34 }
 0x6fb   : > { %v9381_v44 = vrot.slane %v4710_v1, %v10637_v43 }
 0x6fc   : > { %v9384_v60 = vrot.slane %v4711_v24, %v10637_v43 }
 0x739   : > { %v9388_v62 = vpop.f32.mrb[40].mxu0 }
 0x73a   : > { %v9390_v52 = vpop.f32.mrb[48].mxu1  ;;  %v9392_v56 = vpop.f32.mrb[41].mxu0  ;;  %v4481_v25 = vmul.f32 %v9388_v62, %v9388_v62 }
 0x73b   : > { %v9396_v26 = vpop.f32.mrb[49].mxu1  ;;  %v9398_v17 = vpop.f32.mrb[42].mxu0  ;;  %v4483_v20 = vmul.f32 %v9390_v52, %v9390_v52  ;;  %v4482_v27 = vmul.f32 %v9392_v56, %v9392_v56 }
 0x73c   : > { %v4425_v48 = vadd.f32 %v9398_v17, %v9388_v62  ;;  %v4489_v58 = vmul.f32 %v9398_v17, %v9398_v17  ;;  %v9408_v59 = vpop.f32.mrb[50].mxu1  ;;  %v9410_v0 = vpop.f32.mrb[43].mxu0  ;;  %v4484_v10 = vmul.f32 %v9396_v26, %v9396_v26 }
 0x73d   : > { %v4451_v53 = vadd.f32 %v9408_v59, %v9390_v52  ;;  %v4491_v50 = vmul.f32 %v9408_v59, %v9408_v59  ;;  %v4438_v16 = vadd.f32 %v9410_v0, %v9392_v56  ;;  %v4490_v42 = vmul.f32 %v9410_v0, %v9410_v0  ;;  %v9420_v31 = vpop.f32.mrb[51].mxu1 }
 0x73e   : > { %v4593_v40 = vadd.f32 %v4489_v58, %v4481_v25  ;;  %v4464_v21 = vadd.f32 %v9420_v31, %v9396_v26  ;;  %v4492_v38 = vmul.f32 %v9420_v31, %v9420_v31 }
 0x73f   : > { %v4619_v47 = vadd.f32 %v4491_v50, %v4483_v20  ;;  %v4606_v34 = vadd.f32 %v4490_v42, %v4482_v27 }
 0x740   : > { %v4632_v1 = vadd.f32 %v4492_v38, %v4484_v10 }
 0x741   : > { %v9428_v24 = vpop.f32.mrb[44].mxu0 }
 0x742   : > { %v4426_v5 = vadd.f32 %v4425_v48, %v9428_v24  ;;  %v4497_v35 = vmul.f32 %v9428_v24, %v9428_v24  ;;  %v9433_v2 = vpop.f32.mrb[52].mxu1  ;;  %v9435_v32 = vpop.f32.mrb[45].mxu0 }
 0x743   : > { %v4452_v25 = vadd.f32 %v4451_v53, %v9433_v2  ;;  %v4499_v58 = vmul.f32 %v9433_v2, %v9433_v2  ;;  %v4439_v20 = vadd.f32 %v4438_v16, %v9435_v32  ;;  %v4498_v27 = vmul.f32 %v9435_v32, %v9435_v32  ;;  %v9443_v50 = vpop.f32.mrb[53].mxu1  ;;  %v9445_v48 = vpop.f32.mrb[46].mxu0 }
 0x744   : > { %10638 = vst [vmem:[#allocation42_spill] sm:$0xff] %v9443_v50  ;;  %10639 = vst [vmem:[#allocation66_spill] sm:$0xff] %v9445_v48  ;;  %v4594_v42 = vadd.f32 %v4593_v40, %v4497_v35  ;;  %v4465_v10 = vadd.f32 %v4464_v21, %v9443_v50  ;;  %v4500_v38 = vmul.f32 %v9443_v50, %v9443_v50  ;;  %v9451_v19 = vpop.f32.mrb[54].mxu1  ;;  %v9453_v36 = vpop.f32.mrb[47].mxu0 }
 0x745   : > { %v4427_v53 = vadd.f32 %v4426_v5, %v9445_v48  ;;  %10640 = vst [vmem:[#allocation67_spill] sm:$0xff] %v9451_v19  ;;  %10641 = vst [vmem:[#allocation68_spill] sm:$0xff] %v9453_v36  ;;  %v4620_v16 = vadd.f32 %v4619_v47, %v4499_v58  ;;  %v4607_v8 = vadd.f32 %v4606_v34, %v4498_v27  ;;  %v9458_v11 = vpop.f32.mrb[55].mxu1 }
 0x746   : > { %v4505_v57 = vmul.f32 %v9445_v48, %v9445_v48  ;;  %v4453_v39 = vadd.f32 %v4452_v25, %v9451_v19  ;;  %10642 = vst [vmem:[#allocation69_spill] sm:$0xff] %v9458_v11  ;;  %v4633_v35 = vadd.f32 %v4632_v1, %v4500_v38  ;;  %v4507_v40 = vmul.f32 %v9451_v19, %v9451_v19 }
 0x747   : > { %v4440_v21 = vadd.f32 %v4439_v20, %v9453_v36  ;;  %v4506_v5 = vmul.f32 %v9453_v36, %v9453_v36  ;;  %v4466_v47 = vadd.f32 %v4465_v10, %v9458_v11  ;;  %v4508_v34 = vmul.f32 %v9458_v11, %v9458_v11 }
 0x748   : > { %v4595_v61 = vadd.f32 %v4594_v42, %v4505_v57  ;;  %v4621_v58 = vadd.f32 %v4620_v16, %v4507_v40 }
 0x749   : > { %v4608_v27 = vadd.f32 %v4607_v8, %v4506_v5  ;;  %v4634_v25 = vadd.f32 %v4633_v35, %v4508_v34  ;;  %v9468_v29 = vpop.f32.mrb[48].mxu0 }
 0x74a   : > { %10643 = vst [vmem:[#allocation70_spill] sm:$0xff] %v9468_v29  ;;  %v4428_v1 = vadd.f32 %v4427_v53, %v9468_v29  ;;  %v4513_v38 = vmul.f32 %v9468_v29, %v9468_v29  ;;  %v9473_v20 = vpop.f32.mrb[56].mxu1  ;;  %v9475_v54 = vpop.f32.mrb[49].mxu0 }
 0x74b   : > { %10644 = vst [vmem:[#allocation71_spill] sm:$0xff] %v9473_v20  ;;  %10645 = vst [vmem:[#allocation72_spill] sm:$0xff] %v9475_v54  ;;  %v4454_v57 = vadd.f32 %v4453_v39, %v9473_v20  ;;  %v4515_v42 = vmul.f32 %v9473_v20, %v9473_v20  ;;  %v4441_v10 = vadd.f32 %v4440_v21, %v9475_v54  ;;  %v9483_v16 = vpop.f32.mrb[57].mxu1  ;;  %v9485_v53 = vpop.f32.mrb[50].mxu0 }
 0x74c   : > { %v4514_v8 = vmul.f32 %v9475_v54, %v9475_v54  ;;  %10646 = vst [vmem:[#allocation73_spill] sm:$0xff] %v9483_v16  ;;  %10647 = vst [vmem:[#allocation74_spill] sm:$0xff] %v9485_v53  ;;  %v4596_v35 = vadd.f32 %v4595_v61, %v4513_v38  ;;  %v4467_v40 = vadd.f32 %v4466_v47, %v9483_v16  ;;  %v9491_v34 = vpop.f32.mrb[58].mxu1  ;;  %v9493_v20 = vpop.f32.mrb[51].mxu0 }
 0x74d   : > { %v4516_v5 = vmul.f32 %v9483_v16, %v9483_v16  ;;  %v4429_v39 = vadd.f32 %v4428_v1, %v9485_v53  ;;  %10648 = vst [vmem:[#allocation75_spill] sm:$0xff] %v9491_v34  ;;  %10649 = vst [vmem:[#allocation76_spill] sm:$0xff] %v9493_v20  ;;  %v4622_v21 = vadd.f32 %v4621_v58, %v4515_v42  ;;  %v9498_v55 = vpop.f32.mrb[59].mxu1 }
 0x74e   : > { %v4609_v29 = vadd.f32 %v4608_v27, %v4514_v8  ;;  %v4521_v54 = vmul.f32 %v9485_v53, %v9485_v53  ;;  %v4455_v6 = vadd.f32 %v4454_v57, %v9491_v34  ;;  %10650 = vst [vmem:[#allocation77_spill] sm:$0xff] %v9498_v55  ;;  %v4523_v47 = vmul.f32 %v9491_v34, %v9491_v34 }
 0x74f   : > { %v4635_v61 = vadd.f32 %v4634_v25, %v4516_v5  ;;  %v4442_v38 = vadd.f32 %v4441_v10, %v9493_v20  ;;  %v4522_v1 = vmul.f32 %v9493_v20, %v9493_v20  ;;  %v4468_v58 = vadd.f32 %v4467_v40, %v9498_v55 }
 0x750   : > { %v4597_v16 = vadd.f32 %v4596_v35, %v4521_v54  ;;  %v4524_v27 = vmul.f32 %v9498_v55, %v9498_v55  ;;  %v4623_v42 = vadd.f32 %v4622_v21, %v4523_v47 }
 0x751   : > { %v4610_v8 = vadd.f32 %v4609_v29, %v4522_v1  ;;  %v9508_v53 = vpop.f32.mrb[52].mxu0 }
 0x752   : > { %v4636_v57 = vadd.f32 %v4635_v61, %v4524_v27  ;;  %10651 = vst [vmem:[#allocation78_spill] sm:$0xff] %v9508_v53  ;;  %v4430_v25 = vadd.f32 %v4429_v39, %v9508_v53  ;;  %v4529_v5 = vmul.f32 %v9508_v53, %v9508_v53  ;;  %v9513_v10 = vpop.f32.mrb[60].mxu1  ;;  %v9515_v34 = vpop.f32.mrb[53].mxu0 }
 0x753   : > { %10652 = vst [vmem:[#allocation79_spill] sm:$0xff] %v9513_v10  ;;  %10653 = vst [vmem:[#allocation80_spill] sm:$0xff] %v9515_v34  ;;  %v4456_v54 = vadd.f32 %v4455_v6, %v9513_v10  ;;  %v4531_v35 = vmul.f32 %v9513_v10, %v9513_v10  ;;  %v4443_v40 = vadd.f32 %v4442_v38, %v9515_v34  ;;  %v9523_v21 = vpop.f32.mrb[61].mxu1  ;;  %v9525_v39 = vpop.f32.mrb[54].mxu0 }
 0x754   : > { %v4530_v29 = vmul.f32 %v9515_v34, %v9515_v34  ;;  %10654 = vst [vmem:[#allocation81_spill] sm:$0xff] %v9523_v21  ;;  %10655 = vst [vmem:[#allocation82_spill] sm:$0xff] %v9525_v39  ;;  %v4598_v61 = vadd.f32 %v4597_v16, %v4529_v5  ;;  %v4469_v47 = vadd.f32 %v4468_v58, %v9523_v21  ;;  %v9531_v27 = vpop.f32.mrb[62].mxu1  ;;  %v9533_v10 = vpop.f32.mrb[55].mxu0 }
 0x755   : > { %v4532_v1 = vmul.f32 %v9523_v21, %v9523_v21  ;;  %v4431_v6 = vadd.f32 %v4430_v25, %v9525_v39  ;;  %10656 = vst [vmem:[#allocation83_spill] sm:$0xff] %v9531_v27  ;;  %10657 = vst [vmem:[#allocation84_spill] sm:$0xff] %v9533_v10  ;;  %v4624_v38 = vadd.f32 %v4623_v42, %v4531_v35  ;;  %v9538_v20 = vpop.f32.mrb[63].mxu1 }
 0x756   : > { %v4611_v53 = vadd.f32 %v4610_v8, %v4530_v29  ;;  %v4537_v34 = vmul.f32 %v9525_v39, %v9525_v39  ;;  %v4457_v55 = vadd.f32 %v4456_v54, %v9531_v27  ;;  %10658 = vst [vmem:[#allocation85_spill] sm:$0xff] %v9538_v20  ;;  %v4539_v5 = vmul.f32 %v9531_v27, %v9531_v27 }
 0x757   : > { %v4637_v16 = vadd.f32 %v4636_v57, %v4532_v1  ;;  %v4432_v58 = vrot.slane %v4431_v6, 4  ;;  %v4444_v25 = vadd.f32 %v4443_v40, %v9533_v10  ;;  %v4538_v42 = vmul.f32 %v9533_v10, %v9533_v10 }
 0x758   : > { %v4599_v21 = vadd.f32 %v4598_v61, %v4537_v34  ;;  %v4458_v37 = vrot.slane %v4457_v55, 4  ;;  %v4470_v8 = vadd.f32 %v4469_v47, %v9538_v20  ;;  %v4625_v29 = vadd.f32 %v4624_v38, %v4539_v5 }
 0x759   : > { %v4433_v35 = vadd.f32 %v4432_v58, %v4431_v6  ;;  %v4445_v39 = vrot.slane %v4444_v25, 4  ;;  %v4540_v54 = vmul.f32 %v9538_v20, %v9538_v20  ;;  %v4612_v11 = vadd.f32 %v4611_v53, %v4538_v42 }
 0x75a   : > { %v4600_v57 = vrot.slane %v4599_v21, 4  ;;  %v4459_v1 = vadd.f32 %v4458_v37, %v4457_v55  ;;  %v4471_v19 = vrot.slane %v4470_v8, 4  ;;  %v4626_v36 = vrot.slane %v4625_v29, 4 }
 0x75b   : > { %v4434_v27 = vrot.slane %v4433_v35, 2  ;;  %v4446_v40 = vadd.f32 %v4445_v39, %v4444_v25  ;;  %v4638_v34 = vadd.f32 %v4637_v16, %v4540_v54  ;;  %v4613_v3 = vrot.slane %v4612_v11, 4 }
 0x75c   : > { %v4601_v61 = vadd.f32 %v4600_v57, %v4599_v21  ;;  %v4460_v48 = vrot.slane %v4459_v1, 2  ;;  %v4472_v10 = vadd.f32 %v4471_v19, %v4470_v8  ;;  %v4627_v47 = vadd.f32 %v4626_v36, %v4625_v29 }
 0x75d   : > { %v4435_v4 = vadd.f32 %v4434_v27, %v4433_v35  ;;  %v4447_v6 = vrot.slane %v4446_v40, 2  ;;  %v4639_v38 = vrot.slane %v4638_v34, 4  ;;  %v4614_v23 = vadd.f32 %v4613_v3, %v4612_v11 }
 0x75e   : > { %v4602_v58 = vrot.slane %v4601_v61, 2  ;;  %v4461_v5 = vadd.f32 %v4460_v48, %v4459_v1  ;;  %v4473_v20 = vrot.slane %v4472_v10, 2  ;;  %v4628_v37 = vrot.slane %v4627_v47, 2 }
 0x75f   : > { %v4436_v28 = vrot.slane %v4435_v4, 1  ;;  %v4448_v55 = vadd.f32 %v4447_v6, %v4446_v40  ;;  %v4640_v53 = vadd.f32 %v4639_v38, %v4638_v34  ;;  %v4615_v39 = vrot.slane %v4614_v23, 2 }
 0x760   : > { %v4603_v42 = vadd.f32 %v4602_v58, %v4601_v61  ;;  %v4462_v50 = vrot.slane %v4461_v5, 1  ;;  %v4474_v16 = vadd.f32 %v4473_v20, %v4472_v10  ;;  %v4629_v25 = vadd.f32 %v4628_v37, %v4627_v47 }
 0x761   : > { %v4437_v21 = vadd.f32 %v4436_v28, %v4435_v4  ;;  %v4449_v54 = vrot.slane %v4448_v55, 1  ;;  %v4641_v19 = vrot.slane %v4640_v53, 2  ;;  %v4616_v8 = vadd.f32 %v4615_v39, %v4614_v23 }
 0x762   : > { %v4604_v27 = vrot.slane %v4603_v42, 1  ;;  %v4463_v36 = vadd.f32 %v4462_v50, %v4461_v5  ;;  %v4475_v35 = vrot.slane %v4474_v16, 1  ;;  %v4630_v3 = vrot.slane %v4629_v25, 1 }
 0x763   : > { %v9548_v29 = vmul.f32 0.015625, %v4437_v21  ;;  %v4450_v11 = vadd.f32 %v4449_v54, %v4448_v55  ;;  %v4642_v48 = vadd.f32 %v4641_v19, %v4640_v53  ;;  %v4617_v40 = vrot.slane %v4616_v8, 1 }
 0x764   : > { %v4605_v57 = vadd.f32 %v4604_v27, %v4603_v42  ;;  %v9550_v1 = vmul.f32 0.015625, %v4463_v36  ;;  %v4476_v34 = vadd.f32 %v4475_v35, %v4474_v16  ;;  %v4631_v4 = vadd.f32 %v4630_v3, %v4629_v25 }
 0x765   : > { %v4665_v28 = vmul.f32 %v9548_v29, %v9548_v29  ;;  %v4650_v20 = vmul.f32 0.015625, %v4450_v11  ;;  %v4643_v10 = vrot.slane %v4642_v48, 1  ;;  %v4618_v50 = vadd.f32 %v4617_v40, %v4616_v8 }
 0x766   : > { %v4657_v61 = vmul.f32 0.015625, %v4605_v57  ;;  %v4667_v23 = vmul.f32 %v9550_v1, %v9550_v1  ;;  %v4652_v47 = vmul.f32 0.015625, %v4476_v34  ;;  %v4659_v6 = vmul.f32 0.015625, %v4631_v4 }
 0x767   : > { %v4666_v38 = vmul.f32 %v4650_v20, %v4650_v20  ;;  %v4644_v58 = vadd.f32 %v4643_v10, %v4642_v48  ;;  %v4658_v37 = vmul.f32 0.015625, %v4618_v50 }
 0x768   : > { %v4673_v5 = vsub.f32 %v4657_v61, %v4665_v28  ;;  %v4668_v55 = vmul.f32 %v4652_v47, %v4652_v47  ;;  %v4675_v53 = vsub.f32 %v4659_v6, %v4667_v23  ;;  %v10659_v61 = vcombine.low %v9381_v44, %v9384_v60  ;;  %v4685_v6 = vld [vmem:[#allocation21] sm:$0xff] }
 0x769   : > { %v4660_v42 = vmul.f32 0.015625, %v4644_v58  ;;  %v4674_v16 = vsub.f32 %v4658_v37, %v4666_v38  ;;  %v10660_v58 = vld [vmem:[#allocation40_spill] sm:$0xff]  ;;  %v10663_v44 = vld [vmem:[#allocation53_spill] sm:$0xff] }
 0x76a   : > { %v4681_v39 = vmax.f32 %v4673_v5, 0.0  ;;  %v4683_v21 = vmax.f32 %v4675_v53, 0.0  ;;  %v4750_v23 = vrot.slane %v10659_v61, %v10637_v43  ;;  %v10492_v5 = vsub.s32 4, %v10660_v58 }
 0x76b   : > { %v4676_v25 = vsub.f32 %v4660_v42, %v4668_v55  ;;  %v4682_v19 = vmax.f32 %v4674_v16, 0.0  ;;  %v10491_v37 = vsub.s32 5, %v10660_v58  ;;  %v10490_v55 = vsub.s32 6, %v10660_v58 }
 0x76c   : > { %v4690_v54 = vadd.f32 1e-05, %v4681_v39  ;;  %v4692_v27 = vadd.f32 1e-05, %v4683_v21  ;;  %v10489_v53 = vsub.s32 7, %v10660_v58  ;;  %v10661_v39 = vld [vmem:[#allocation41_spill] sm:$0xff] }
 0x76d   : > { %v4684_v36 = vmax.f32 %v4676_v25, 0.0  ;;  %v4691_v35 = vadd.f32 1e-05, %v4682_v19  ;;  %v10662_v21 = vld [vmem:[#allocation43_spill] sm:$0xff] }
 0x76e   : > { %7326 = vrsqrt.f32 %v4690_v54  ;;  %v10664_v54 = vld [vmem:[#allocation54_spill] sm:$0xff] }
 0x76f   : > { %7328 = vrsqrt.f32 %v4692_v27  ;;  %v4693_v8 = vadd.f32 1e-05, %v4684_v36 }
 0x770   : > { %7330 = vrsqrt.f32 %v4691_v35 }
 0x771   : > { %7332 = vrsqrt.f32 %v4693_v8 }
 0x778   : > { %v7327_v3 = vpop.eup %7326 }
 0x779   : > { %v7329_v11 = vpop.eup %7328 }
 0x77a   : > { %v7331_v48 = vpop.eup %7330 }
 0x77b   : > { %v7333_v57 = vpop.eup %7332  ;;  %v4712_v40 = vcombine.low %v7327_v3, %v7331_v48 }
 0x77c   : > { %v4713_v34 = vcombine.low %v7329_v11, %v7333_v57 }
 0x77d   : > { %v4734_v28 = vrot.slane %v4712_v40, %v10637_v43 }
 0x77e   : > { %v4741_v4 = vrot.slane %v4713_v34, %v10637_v43 }
 0x780   : > { %v4743_v10 = vcombine.low %v4734_v28, %v4741_v4 }
 0x782   : > { %v4757_v50 = vrot.slane %v4743_v10, %v10637_v43 }
 0x784   : > { %v4758_v38 = vcombine.low %v4750_v23, %v4757_v50 }
 0x786   : > { %v4760_v42 = vmul.f32 %v4758_v38, %v4685_v6 }
 0x788   : > { %v9568_v16 = vrot.slane %v4760_v42, %v10661_v39  ;;  %v9571_v25 = vrot.slane %v4760_v42, %v10662_v21  ;;  %v9574_v60 = vrot.slane %v4760_v42, %v10663_v44  ;;  %v9577_v19 = vrot.slane %v4760_v42, %v10664_v54 }
 0x789   : > { %v9581_v27 = vrot.slane %v4760_v42, %v10492_v5  ;;  %v9585_v36 = vrot.slane %v4760_v42, %v10491_v37  ;;  %v9589_v35 = vrot.slane %v4760_v42, %v10490_v55  ;;  %v9593_v8 = vrot.slane %v4760_v42, %v10489_v53  ;;  %v10685_v53 = vld [vmem:[#allocation56_spill] sm:$0xff]  ;;  %v10687_v55 = vld [vmem:[#allocation49_spill] sm:$0xff]  ;;  %v10691_v5 = vld [vmem:[#allocation74_spill] sm:$0xff] }
 0x78a   : > { %v4803_v3 = vmul.f32 %v9568_v16, %v9364_v18  ;;  %v4804_v11 = vmul.f32 %v9571_v25, %v9370_v7  ;;  %v4805_v48 = vmul.f32 %v9574_v60, %v9366_v30  ;;  %v4806_v57 = vmul.f32 %v9577_v19, %v9374_v46  ;;  %v10689_v37 = vld [vmem:[#allocation57_spill] sm:$0xff] }
 0x78b   : > { %v4807_v40 = vmul.f32 %v9581_v27, %v9548_v29  ;;  %v4808_v34 = vmul.f32 %v9585_v36, %v4650_v20  ;;  %v4809_v28 = vmul.f32 %v9589_v35, %v9550_v1  ;;  %v4810_v4 = vmul.f32 %v9593_v8, %v4652_v47 }
 0x78c   : > { %v4819_v18 = vcombine.low %v4803_v3, %v4804_v11  ;;  %v4820_v10 = vcombine.low %v4805_v48, %v4806_v57  ;;  %v9611_v7 = vmul.f32 %v9568_v16, %v9204_v9  ;;  %v9615_v30 = vmul.f32 %v9571_v25, %v9208_v49 }
 0x78d   : > { %v4821_v46 = vcombine.low %v4807_v40, %v4808_v34  ;;  %v4822_v61 = vcombine.low %v4809_v28, %v4810_v4  ;;  %v9619_v29 = vmul.f32 %v9574_v60, %v9206_v45  ;;  %v9623_v1 = vmul.f32 %v9577_v19, %v9210_v63  ;;  %v10667_v34 = vld [vmem:[#allocation44_spill] sm:$0xff]  ;;  %v10669_v4 = vld [vmem:[#allocation45_spill] sm:$0xff] }
 0x78e   : > { %v4829_v20 = vrot.slane %v4819_v18, %v10637_v43  ;;  %v4836_v47 = vrot.slane %v4820_v10, %v10637_v43  ;;  %v9629_v9 = vmul.f32 %v9581_v27, %v9388_v62  ;;  %v9633_v49 = vmul.f32 %v9585_v36, %v9392_v56  ;;  %v10668_v28 = vld [vmem:[#allocation52_spill] sm:$0xff]  ;;  %v10670_v18 = vld [vmem:[#allocation66_spill] sm:$0xff] }
 0x78f   : > { %v4843_v23 = vrot.slane %v4821_v46, %v10637_v43  ;;  %v4850_v45 = vrot.slane %v4822_v61, %v10637_v43  ;;  %v9639_v63 = vmul.f32 %v9589_v35, %v9390_v52  ;;  %v9643_v50 = vmul.f32 %v9593_v8, %v9396_v26  ;;  %v10671_v46 = vld [vmem:[#allocation68_spill] sm:$0xff] }
 0x790   : > { %v4851_v6 = vcombine.low %v4829_v20, %v4836_v47  ;;  %v9647_v62 = vmul.f32 %v9568_v16, %v9220_v51  ;;  %v9651_v56 = vmul.f32 %v9571_v25, %v9232_v22  ;;  %v9655_v38 = vmul.f32 %v9574_v60, %v9222_v13  ;;  %v10672_v20 = vld [vmem:[#allocation67_spill] sm:$0xff] }
 0x791   : > { %v4852_v42 = vcombine.low %v4843_v23, %v4850_v45  ;;  %v9659_v52 = vmul.f32 %v9577_v19, %v9234_v41  ;;  %v9663_v26 = vmul.f32 %v9581_v27, %v9398_v17  ;;  %v9667_v51 = vmul.f32 %v9585_v36, %v9410_v0  ;;  %v10673_v45 = vld [vmem:[#allocation69_spill] sm:$0xff] }
 0x792   : > { %v4859_v22 = vrot.slane %v4851_v6, %v10637_v43  ;;  %v9672_v3 = vmul.f32 %v9589_v35, %v9408_v59  ;;  %v9676_v13 = vmul.f32 %v9593_v8, %v9420_v31  ;;  %v9680_v41 = vmul.f32 %v9568_v16, %v9244_v12  ;;  %v4761_v31 = vld [vmem:[#allocation23] sm:$0xff] }
 0x793   : > { %v4866_v17 = vrot.slane %v4852_v42, %v10637_v43  ;;  %v9685_v0 = vmul.f32 %v9571_v25, %v9254_v33  ;;  %v9689_v11 = vmul.f32 %v9574_v60, %v9246_v15  ;;  %v9693_v59 = vmul.f32 %v9577_v19, %v9256_v14  ;;  %v10665_v43 = vld [vmem:[#allocation42_spill] sm:$0xff] }
 0x794   : > { %v9697_v48 = vmul.f32 %v9581_v27, %v9428_v24  ;;  %v9701_v12 = vmul.f32 %v9585_v36, %v9435_v32  ;;  %v9705_v33 = vmul.f32 %v9589_v35, %v9433_v2  ;;  %v9709_v15 = vmul.f32 %v9593_v8, %v10665_v43  ;;  %v10666_v14 = vld [vmem:[#allocation50_spill] sm:$0xff] }
 0x795   : > { %v4867_v57 = vcombine.low %v4859_v22, %v4866_v17  ;;  %v9713_v40 = vmul.f32 %v9568_v16, %v10666_v14  ;;  %v9717_v24 = vmul.f32 %v9571_v25, %v10667_v34  ;;  %v9721_v32 = vmul.f32 %v9574_v60, %v10668_v28  ;;  %v10674_v42 = vld [vmem:[#allocation46_spill] sm:$0xff]  ;;  %v10675_v17 = vld [vmem:[#allocation48_spill] sm:$0xff]  ;;  %v10676_v14 = vld [vmem:[#allocation47_spill] sm:$0xff] }
 0x796   : > { %v9725_v2 = vmul.f32 %v9577_v19, %v10669_v4  ;;  %v9729_v10 = vmul.f32 %v9581_v27, %v10670_v18  ;;  %v9733_v61 = vmul.f32 %v9585_v36, %v10671_v46  ;;  %v9737_v47 = vmul.f32 %v9589_v35, %v10672_v20  ;;  %v10677_v28 = vld [vmem:[#allocation55_spill] sm:$0xff]  ;;  %v10679_v18 = vld [vmem:[#allocation72_spill] sm:$0xff] }
 0x797   : > { %v4869_v23 = vsub.f32 %v4761_v31, %v4867_v57  ;;  %v9741_v6 = vmul.f32 %v9593_v8, %v10673_v45  ;;  %v9745_v22 = vmul.f32 %v9568_v16, %v10674_v42  ;;  %v9749_v43 = vmul.f32 %v9571_v25, %v10675_v17  ;;  %v10678_v31 = vld [vmem:[#allocation70_spill] sm:$0xff]  ;;  %v10680_v20 = vld [vmem:[#allocation71_spill] sm:$0xff]  ;;  %v10681_v42 = vld [vmem:[#allocation73_spill] sm:$0xff] }
 0x798   : > { %v9753_v34 = vmul.f32 %v9574_v60, %v10676_v14  ;;  %v9757_v4 = vmul.f32 %v9577_v19, %v10677_v28  ;;  %v9761_v57 = vmul.f32 %v9581_v27, %v10678_v31  ;;  %v9765_v46 = vmul.f32 %v9585_v36, %v10679_v18  ;;  %v10683_v14 = vld [vmem:[#allocation51_spill] sm:$0xff] }
 0x799   : > { %v9769_v45 = vmul.f32 %v9589_v35, %v10680_v20  ;;  %v9773_v17 = vmul.f32 %v9593_v8, %v10681_v42  ;;  %v9777_v28 = vmul.f32 %v9568_v16, %v10683_v14  ;;  %v9781_v31 = vmul.f32 %v9571_v25, %v10685_v53 }
 0x79a   : > { %v9785_v18 = vmul.f32 %v9574_v60, %v10687_v55  ;;  %v9789_v20 = vmul.f32 %v9577_v19, %v10689_v37  ;;  %v9793_v42 = vmul.f32 %v9581_v27, %v10691_v5 }
 0x79b   : > { %10682 = vst [vmem:[#allocation40_spill] sm:$0xff] %v9773_v17  ;;  %10684 = vst [vmem:[#allocation41_spill] sm:$0xff] %v9777_v28  ;;  %v10693_v17 = vld [vmem:[#allocation76_spill] sm:$0xff]  ;;  %v10695_v28 = vld [vmem:[#allocation75_spill] sm:$0xff] }
 0x79c   : > { %10686 = vst [vmem:[#allocation43_spill] sm:$0xff] %v9781_v31  ;;  %10688 = vst [vmem:[#allocation53_spill] sm:$0xff] %v9785_v18  ;;  %v9797_v14 = vmul.f32 %v9585_v36, %v10693_v17  ;;  %v9801_v53 = vmul.f32 %v9589_v35, %v10695_v28  ;;  %v10697_v31 = vld [vmem:[#allocation77_spill] sm:$0xff]  ;;  %v10699_v18 = vld [vmem:[#allocation58_spill] sm:$0xff] }
 0x79d   : > { %10690 = vst [vmem:[#allocation54_spill] sm:$0xff] %v9789_v20  ;;  %10692 = vst [vmem:[#allocation42_spill] sm:$0xff] %v9793_v42  ;;  %v9805_v55 = vmul.f32 %v9593_v8, %v10697_v31  ;;  %v9809_v37 = vmul.f32 %v9568_v16, %v10699_v18  ;;  %v10701_v20 = vld [vmem:[#allocation60_spill] sm:$0xff]  ;;  %v10703_v42 = vld [vmem:[#allocation59_spill] sm:$0xff] }
 0x79e   : > { %10694 = vst [vmem:[#allocation50_spill] sm:$0xff] %v9797_v14  ;;  %10696 = vst [vmem:[#allocation44_spill] sm:$0xff] %v9801_v53  ;;  %v9813_v5 = vmul.f32 %v9571_v25, %v10701_v20  ;;  %v9817_v17 = vmul.f32 %v9574_v60, %v10703_v42  ;;  %v10705_v14 = vld [vmem:[#allocation61_spill] sm:$0xff]  ;;  %v10707_v53 = vld [vmem:[#allocation78_spill] sm:$0xff] }
 0x79f   : > { %10698 = vst [vmem:[#allocation52_spill] sm:$0xff] %v9805_v55  ;;  %10700 = vst [vmem:[#allocation45_spill] sm:$0xff] %v9809_v37  ;;  %v9821_v28 = vmul.f32 %v9577_v19, %v10705_v14  ;;  %v9825_v31 = vmul.f32 %v9581_v27, %v10707_v53  ;;  %v10709_v55 = vld [vmem:[#allocation80_spill] sm:$0xff]  ;;  %v10711_v37 = vld [vmem:[#allocation79_spill] sm:$0xff] }
 0x7a0   : > { %10702 = vst [vmem:[#allocation66_spill] sm:$0xff] %v9813_v5  ;;  %10704 = vst [vmem:[#allocation68_spill] sm:$0xff] %v9817_v17  ;;  %v9829_v18 = vmul.f32 %v9585_v36, %v10709_v55  ;;  %v9833_v20 = vmul.f32 %v9589_v35, %v10711_v37  ;;  %v10713_v5 = vld [vmem:[#allocation81_spill] sm:$0xff]  ;;  %v10715_v17 = vld [vmem:[#allocation62_spill] sm:$0xff] }
 0x7a1   : > { %10706 = vst [vmem:[#allocation67_spill] sm:$0xff] %v9821_v28  ;;  %10708 = vst [vmem:[#allocation69_spill] sm:$0xff] %v9825_v31  ;;  %v9837_v42 = vmul.f32 %v9593_v8, %v10713_v5  ;;  %v9841_v14 = vmul.f32 %v9568_v16, %v10715_v17  ;;  %v10716_v28 = vld [vmem:[#allocation64_spill] sm:$0xff]  ;;  %v10717_v31 = vld [vmem:[#allocation63_spill] sm:$0xff] }
 0x7a2   : > { %10710 = vst [vmem:[#allocation46_spill] sm:$0xff] %v9829_v18  ;;  %10712 = vst [vmem:[#allocation48_spill] sm:$0xff] %v9833_v20  ;;  %v9845_v53 = vmul.f32 %v9571_v25, %v10716_v28  ;;  %v9849_v55 = vmul.f32 %v9574_v60, %v10717_v31  ;;  %v10718_v18 = vld [vmem:[#allocation65_spill] sm:$0xff]  ;;  %v10719_v20 = vld [vmem:[#allocation82_spill] sm:$0xff]  ;;  %v9872_v31 = vrot.slane %v4869_v23, %v10661_v39  ;;  %v10725_v39 = vsub.s32 6, %v10660_v58 }
 0x7a3   : > { %10714 = vst [vmem:[#allocation47_spill] sm:$0xff] %v9837_v42  ;;  %v9853_v37 = vmul.f32 %v9577_v19, %v10718_v18  ;;  %v9857_v5 = vmul.f32 %v9581_v27, %v10719_v20  ;;  %v10720_v42 = vld [vmem:[#allocation84_spill] sm:$0xff]  ;;  %v10721_v17 = vld [vmem:[#allocation83_spill] sm:$0xff]  ;;  %v10722_v28 = vld [vmem:[#allocation85_spill] sm:$0xff]  ;;  %v9875_v19 = vrot.slane %v4869_v23, %v10662_v21  ;;  %v9878_v27 = vrot.slane %v4869_v23, %v10663_v44 }
 0x7a4   : > { %v9861_v16 = vmul.f32 %v9585_v36, %v10720_v42  ;;  %v9865_v25 = vmul.f32 %v9589_v35, %v10721_v17  ;;  %v9869_v60 = vmul.f32 %v9593_v8, %v10722_v28  ;;  %v9881_v36 = vrot.slane %v4869_v23, %v10664_v54 }
 0x7a5   : > { %v10723_v18 = vsub.s32 4, %v10660_v58  ;;  %v10724_v20 = vsub.s32 5, %v10660_v58  ;;  %v9893_v42 = vrot.slane %v4869_v23, %v10725_v39  ;;  %v10726_v21 = vsub.s32 7, %v10660_v58  ;;  %v10741_v39 = vld [vmem:[#allocation43_spill] sm:$0xff] }
 0x7a6   : > { %v9901_v44 = vadd.f32 %v9872_v31, %v9611_v7  ;;  %v9905_v54 = vadd.f32 %v9875_v19, %v9615_v30  ;;  %v9909_v28 = vadd.f32 %v9878_v27, %v9619_v29 }
 0x7a7   : > { %v9885_v35 = vrot.slane %v4869_v23, %v10723_v18  ;;  %v9889_v8 = vrot.slane %v4869_v23, %v10724_v20  ;;  %v9897_v17 = vrot.slane %v4869_v23, %v10726_v21  ;;  %v9913_v18 = vadd.f32 %v9881_v36, %v9623_v1  ;;  %v10739_v20 = vld [vmem:[#allocation41_spill] sm:$0xff] }
 0x7a8   : > { %10727 = vst [vmem:[#allocation55_spill] sm:$0xff] %v9901_v44  ;;  %10728 = vst [vmem:[#allocation70_spill] sm:$0xff] %v9905_v54  ;;  %v9925_v30 = vadd.f32 %v9893_v42, %v9639_v63  ;;  %v9933_v1 = vadd.f32 %v9872_v31, %v9647_v62  ;;  %v9945_v63 = vadd.f32 %v9881_v36, %v9659_v52  ;;  %v10743_v21 = vld [vmem:[#allocation53_spill] sm:$0xff] }
 0x7a9   : > { %10729 = vst [vmem:[#allocation72_spill] sm:$0xff] %v9909_v28  ;;  %10730 = vst [vmem:[#allocation71_spill] sm:$0xff] %v9913_v18  ;;  %v9917_v58 = vadd.f32 %v9885_v35, %v9629_v9  ;;  %v9921_v7 = vadd.f32 %v9889_v8, %v9633_v49  ;;  %v9929_v29 = vadd.f32 %v9897_v17, %v9643_v50 }
 0x7aa   : > { %10733 = vst [vmem:[#allocation56_spill] sm:$0xff] %v9925_v30  ;;  %v9937_v9 = vadd.f32 %v9875_v19, %v9651_v56  ;;  %v9941_v49 = vadd.f32 %v9878_v27, %v9655_v38  ;;  %v9949_v50 = vadd.f32 %v9885_v35, %v9663_v26  ;;  %v9953_v62 = vadd.f32 %v9889_v8, %v9667_v51 }
 0x7ab   : > { %10731 = vst [vmem:[#allocation73_spill] sm:$0xff] %v9917_v58  ;;  %10732 = vst [vmem:[#allocation51_spill] sm:$0xff] %v9921_v7  ;;  %v9957_v56 = vadd.f32 %v9893_v42, %v9672_v3  ;;  %v9961_v38 = vadd.f32 %v9897_v17, %v9676_v13  ;;  %v9965_v52 = vadd.f32 %v9872_v31, %v9680_v41 }
 0x7ac   : > { %10734 = vst [vmem:[#allocation49_spill] sm:$0xff] %v9929_v29  ;;  %v9969_v26 = vadd.f32 %v9875_v19, %v9685_v0  ;;  %v9973_v51 = vadd.f32 %v9878_v27, %v9689_v11  ;;  %v9977_v3 = vadd.f32 %v9881_v36, %v9693_v59  ;;  %v9981_v13 = vadd.f32 %v9885_v35, %v9697_v48 }
 0x7ad   : > { %v9985_v41 = vadd.f32 %v9889_v8, %v9701_v12  ;;  %v9989_v0 = vadd.f32 %v9893_v42, %v9705_v33  ;;  %v9993_v11 = vadd.f32 %v9897_v17, %v9709_v15  ;;  %v9997_v59 = vadd.f32 %v9872_v31, %v9713_v40 }
 0x7ae   : > { %v10001_v48 = vadd.f32 %v9875_v19, %v9717_v24  ;;  %v10005_v12 = vadd.f32 %v9878_v27, %v9721_v32  ;;  %v10009_v33 = vadd.f32 %v9881_v36, %v9725_v2  ;;  %v10013_v15 = vadd.f32 %v9885_v35, %v9729_v10 }
 0x7af   : > { %v10017_v40 = vadd.f32 %v9889_v8, %v9733_v61  ;;  %v10021_v24 = vadd.f32 %v9893_v42, %v9737_v47  ;;  %v10025_v32 = vadd.f32 %v9897_v17, %v9741_v6  ;;  %v10029_v2 = vadd.f32 %v9872_v31, %v9745_v22 }
 0x7b0   : > { %v10033_v10 = vadd.f32 %v9875_v19, %v9749_v43  ;;  %v10037_v61 = vadd.f32 %v9878_v27, %v9753_v34  ;;  %v10041_v47 = vadd.f32 %v9881_v36, %v9757_v4  ;;  %v10045_v23 = vadd.f32 %v9885_v35, %v9761_v57  ;;  %v10737_v43 = vld [vmem:[#allocation40_spill] sm:$0xff] }
 0x7b1   : > { %v10049_v6 = vadd.f32 %v9889_v8, %v9765_v46  ;;  %v10053_v22 = vadd.f32 %v9893_v42, %v9769_v45  ;;  %v10057_v34 = vadd.f32 %v9897_v17, %v10737_v43  ;;  %v10061_v4 = vadd.f32 %v9872_v31, %v10739_v20 }
 0x7b2   : > { %v10065_v57 = vadd.f32 %v9875_v19, %v10741_v39  ;;  %v10069_v46 = vadd.f32 %v9878_v27, %v10743_v21 }
 0x7b3   : > { %10735 = vst [vmem:[#allocation57_spill] sm:$0xff] %v10049_v6  ;;  %10736 = vst [vmem:[#allocation74_spill] sm:$0xff] %v10053_v22  ;;  %v10745_v6 = vld [vmem:[#allocation54_spill] sm:$0xff] }
 0x7b4   : > { %10738 = vst [vmem:[#allocation76_spill] sm:$0xff] %v10057_v34  ;;  %10740 = vst [vmem:[#allocation75_spill] sm:$0xff] %v10061_v4  ;;  %v10073_v45 = vadd.f32 %v9881_v36, %v10745_v6  ;;  %v10747_v22 = vld [vmem:[#allocation42_spill] sm:$0xff]  ;;  %v10751_v4 = vld [vmem:[#allocation44_spill] sm:$0xff] }
 0x7b5   : > { %10742 = vst [vmem:[#allocation77_spill] sm:$0xff] %v10065_v57  ;;  %10744 = vst [vmem:[#allocation58_spill] sm:$0xff] %v10069_v46  ;;  %v10077_v43 = vadd.f32 %v9885_v35, %v10747_v22  ;;  %v10749_v34 = vld [vmem:[#allocation50_spill] sm:$0xff]  ;;  %v10085_v39 = vadd.f32 %v9893_v42, %v10751_v4  ;;  %v10753_v57 = vld [vmem:[#allocation52_spill] sm:$0xff] }
 0x7b6   : > { %10746 = vst [vmem:[#allocation60_spill] sm:$0xff] %v10073_v45  ;;  %v10081_v20 = vadd.f32 %v9889_v8, %v10749_v34  ;;  %v10089_v21 = vadd.f32 %v9897_v17, %v10753_v57  ;;  %v10755_v46 = vld [vmem:[#allocation45_spill] sm:$0xff]  ;;  %v10757_v45 = vld [vmem:[#allocation66_spill] sm:$0xff] }
 0x7b7   : > { %10748 = vst [vmem:[#allocation59_spill] sm:$0xff] %v10077_v43  ;;  %10752 = vst [vmem:[#allocation78_spill] sm:$0xff] %v10085_v39  ;;  %v10093_v6 = vadd.f32 %v9872_v31, %v10755_v46  ;;  %v10097_v22 = vadd.f32 %v9875_v19, %v10757_v45  ;;  %v10759_v43 = vld [vmem:[#allocation68_spill] sm:$0xff]  ;;  %v10761_v39 = vld [vmem:[#allocation69_spill] sm:$0xff] }
 0x7b8   : > { %10750 = vst [vmem:[#allocation61_spill] sm:$0xff] %v10081_v20  ;;  %10754 = vst [vmem:[#allocation80_spill] sm:$0xff] %v10089_v21  ;;  %v10101_v34 = vadd.f32 %v9878_v27, %v10759_v43  ;;  %v10760_v20 = vld [vmem:[#allocation67_spill] sm:$0xff]  ;;  %v10109_v57 = vadd.f32 %v9885_v35, %v10761_v39  ;;  %v10762_v21 = vld [vmem:[#allocation46_spill] sm:$0xff]  ;;  %v10129_v39 = vadd.f32 %v9875_v19, %v9845_v53 }
 0x7b9   : > { %10756 = vst [vmem:[#allocation79_spill] sm:$0xff] %v10093_v6  ;;  %10758 = vst [vmem:[#allocation81_spill] sm:$0xff] %v10097_v22  ;;  %v10105_v4 = vadd.f32 %v9881_v36, %v10760_v20  ;;  %v10113_v46 = vadd.f32 %v9889_v8, %v10762_v21  ;;  %v10763_v6 = vld [vmem:[#allocation48_spill] sm:$0xff]  ;;  %v10764_v22 = vld [vmem:[#allocation47_spill] sm:$0xff]  ;;  %v10125_v20 = vadd.f32 %v9872_v31, %v9841_v14 }
 0x7ba   : > { %v10117_v45 = vadd.f32 %v9893_v42, %v10763_v6  ;;  %v10121_v43 = vadd.f32 %v9897_v17, %v10764_v22  ;;  %v10133_v21 = vadd.f32 %v9878_v27, %v9849_v55  ;;  %v10137_v6 = vadd.f32 %v9881_v36, %v9853_v37  ;;  %v10767_v19 = vld [vmem:[#allocation57_spill] sm:$0xff]  ;;  %v10768_v37 = vld [vmem:[#allocation74_spill] sm:$0xff] }
 0x7bb   : > { %v10141_v22 = vadd.f32 %v9885_v35, %v9857_v5  ;;  %v10145_v14 = vadd.f32 %v9889_v8, %v9861_v16  ;;  %v10149_v53 = vadd.f32 %v9893_v42, %v9865_v25  ;;  %v10153_v55 = vadd.f32 %v9897_v17, %v9869_v60  ;;  %v10769_v31 = vld [vmem:[#allocation76_spill] sm:$0xff]  ;;  %v10770_v29 = vld [vmem:[#allocation75_spill] sm:$0xff] }
 0x7bc   : > { %v5047_v35 = vmax.f32 %v9933_v1, 0.0  ;;  %v5048_v60 = vmax.f32 %v9937_v9, 0.0  ;;  %v5049_v8 = vmax.f32 %v9941_v49, 0.0  ;;  %v5050_v42 = vmax.f32 %v9945_v63, 0.0  ;;  %v10771_v30 = vld [vmem:[#allocation77_spill] sm:$0xff]  ;;  %v10772_v7 = vld [vmem:[#allocation58_spill] sm:$0xff] }
 0x7bd   : > { %10765 = vst [vmem:[#allocation62_spill] sm:$0xff] %v10149_v53  ;;  %10766 = vst [vmem:[#allocation64_spill] sm:$0xff] %v10153_v55  ;;  %v5051_v17 = vmax.f32 %v9949_v50, 0.0  ;;  %v5052_v5 = vmax.f32 %v9953_v62, 0.0  ;;  %v5053_v27 = vmax.f32 %v9957_v56, 0.0  ;;  %v5054_v16 = vmax.f32 %v9961_v38, 0.0 }
 0x7be   : > { %v5055_v36 = vmax.f32 %v9965_v52, 0.0  ;;  %v5056_v25 = vmax.f32 %v9969_v26, 0.0  ;;  %v5057_v1 = vmax.f32 %v9973_v51, 0.0  ;;  %v5058_v9 = vmax.f32 %v9977_v3, 0.0  ;;  %v10773_v58 = vld [vmem:[#allocation60_spill] sm:$0xff]  ;;  %v10774_v18 = vld [vmem:[#allocation59_spill] sm:$0xff] }
 0x7bf   : > { %v5059_v49 = vmax.f32 %v9981_v13, 0.0  ;;  %v5060_v63 = vmax.f32 %v9985_v41, 0.0  ;;  %v5061_v50 = vmax.f32 %v9989_v0, 0.0  ;;  %v5062_v62 = vmax.f32 %v9993_v11, 0.0  ;;  %v10775_v28 = vld [vmem:[#allocation61_spill] sm:$0xff]  ;;  %v10776_v54 = vld [vmem:[#allocation78_spill] sm:$0xff] }
 0x7c0   : > { %v5063_v56 = vmax.f32 %v9997_v59, 0.0  ;;  %v5064_v38 = vmax.f32 %v10001_v48, 0.0  ;;  %v5065_v52 = vmax.f32 %v10005_v12, 0.0  ;;  %v5066_v26 = vmax.f32 %v10009_v33, 0.0  ;;  %v10777_v44 = vld [vmem:[#allocation80_spill] sm:$0xff]  ;;  %v10778_v55 = vld [vmem:[#allocation79_spill] sm:$0xff] }
 0x7c1   : > { %v5067_v51 = vmax.f32 %v10013_v15, 0.0  ;;  %v5068_v3 = vmax.f32 %v10017_v40, 0.0  ;;  %v5069_v13 = vmax.f32 %v10021_v24, 0.0  ;;  %v5070_v41 = vmax.f32 %v10025_v32, 0.0  ;;  %v10779_v53 = vld [vmem:[#allocation81_spill] sm:$0xff] }
 0x7c2   : > { %v5071_v0 = vmax.f32 %v10029_v2, 0.0  ;;  %v5072_v11 = vmax.f32 %v10033_v10, 0.0  ;;  %v5073_v59 = vmax.f32 %v10037_v61, 0.0  ;;  %v5074_v48 = vmax.f32 %v10041_v47, 0.0 }
 0x7c3   : > { %v5075_v12 = vmax.f32 %v10045_v23, 0.0  ;;  %v5076_v33 = vmax.f32 %v10767_v19, 0.0  ;;  %v5077_v15 = vmax.f32 %v10768_v37, 0.0  ;;  %v5078_v40 = vmax.f32 %v10769_v31, 0.0 }
 0x7c4   : > { %v5079_v24 = vmax.f32 %v10770_v29, 0.0  ;;  %v5080_v32 = vmax.f32 %v10771_v30, 0.0  ;;  %v5081_v2 = vmax.f32 %v10772_v7, 0.0  ;;  %v5082_v10 = vmax.f32 %v10773_v58, 0.0 }
 0x7c5   : > { %v5083_v61 = vmax.f32 %v10774_v18, 0.0  ;;  %v5084_v47 = vmax.f32 %v10775_v28, 0.0  ;;  %v5085_v23 = vmax.f32 %v10776_v54, 0.0  ;;  %v5086_v19 = vmax.f32 %v10777_v44, 0.0 }
 0x7c6   : > { %v5087_v37 = vmax.f32 %v10778_v55, 0.0  ;;  %v5088_v31 = vmax.f32 %v10779_v53, 0.0  ;;  %v5089_v29 = vmax.f32 %v10101_v34, 0.0  ;;  %v5090_v30 = vmax.f32 %v10105_v4, 0.0 }
 0x7c7   : > { %v5091_v7 = vmax.f32 %v10109_v57, 0.0  ;;  %v5092_v58 = vmax.f32 %v10113_v46, 0.0  ;;  %v5093_v18 = vmax.f32 %v10117_v45, 0.0  ;;  %v5094_v28 = vmax.f32 %v10121_v43, 0.0  ;;  %v10780_v57 = vld [vmem:[#allocation62_spill] sm:$0xff]  ;;  %v10781_v45 = vld [vmem:[#allocation64_spill] sm:$0xff] }
 0x7c8   : > { %v5095_v54 = vmax.f32 %v10125_v20, 0.0  ;;  %v5096_v44 = vmax.f32 %v10129_v39, 0.0  ;;  %v5097_v55 = vmax.f32 %v10133_v21, 0.0  ;;  %v5098_v53 = vmax.f32 %v10137_v6, 0.0  ;;  %v10782_v20 = vld [vmem:[#allocation55_spill] sm:$0xff]  ;;  %v10784_v6 = vld [vmem:[#allocation70_spill] sm:$0xff] }
 0x7c9   : > { %v5099_v34 = vmax.f32 %v10141_v22, 0.0  ;;  %v5100_v4 = vmax.f32 %v10145_v14, 0.0  ;;  %v5101_v46 = vmax.f32 %v10780_v57, 0.0  ;;  %v5102_v43 = vmax.f32 %v10781_v45, 0.0  ;;  %v10786_v57 = vld [vmem:[#allocation72_spill] sm:$0xff] }
 0x7ca   : > { %v10783_v39 = vmax.f32 %v10782_v20, 0.0  ;;  %v10785_v22 = vmax.f32 %v10784_v6, 0.0  ;;  %v10787_v45 = vmax.f32 %v10786_v57, 0.0 }
 0x7cc   : > { %v5103_v21 = vpack.c.bf16 %v5047_v35, %v10783_v39  ;;  %v5104_v14 = vpack.c.bf16 %v5048_v60, %v10785_v22  ;;  %v5105_v20 = vpack.c.bf16 %v5049_v8, %v10787_v45  ;;  %v10788_v35 = vld [vmem:[#allocation71_spill] sm:$0xff]  ;;  %v10790_v22 = vld [vmem:[#allocation73_spill] sm:$0xff] }
 0x7cd   : > { %v10789_v39 = vmax.f32 %v10788_v35, 0.0  ;;  %v10791_v60 = vmax.f32 %v10790_v22, 0.0  ;;  %v10792_v8 = vld [vmem:[#allocation51_spill] sm:$0xff] }
 0x7ce   : > { %v10793_v45 = vmax.f32 %v10792_v8, 0.0  ;;  %5135 = vst [vmem:[#allocation2] sm:$0xff] %v5103_v21  ;;  %5136 = vst [vmem:[#allocation2 + $0x8] sm:$0xff] %v5104_v14  ;;  %v5123_v21 = vpack.c.bf16 %v5083_v61, %v5075_v12  ;;  %v5124_v14 = vpack.c.bf16 %v5084_v47, %v5076_v33 }
 0x7cf   : > { %v5106_v6 = vpack.c.bf16 %v5050_v42, %v10789_v39  ;;  %v5107_v57 = vpack.c.bf16 %v5051_v17, %v10791_v60  ;;  %v10794_v39 = vld [vmem:[#allocation56_spill] sm:$0xff]  ;;  %v10796_v17 = vld [vmem:[#allocation49_spill] sm:$0xff]  ;;  %5137 = vst [vmem:[#allocation2 + $0x10] sm:$0xff] %v5105_v20 }
 0x7d0   : > { %v5108_v35 = vpack.c.bf16 %v5052_v5, %v10793_v45  ;;  %v10795_v42 = vmax.f32 %v10794_v39, 0.0  ;;  %v10797_v60 = vmax.f32 %v10796_v17, 0.0  ;;  %v5111_v5 = vpack.c.bf16 %v5063_v56, %v5055_v36  ;;  %5155 = vst [vmem:[#allocation2 + $0xa0] sm:$0xff] %v5123_v21  ;;  %5156 = vst [vmem:[#allocation2 + $0xa8] sm:$0xff] %v5124_v14 }
 0x7d1   : > { %v5112_v45 = vpack.c.bf16 %v5064_v38, %v5056_v25  ;;  %v5113_v39 = vpack.c.bf16 %v5065_v52, %v5057_v1  ;;  %v5116_v17 = vpack.c.bf16 %v5068_v3, %v5060_v63  ;;  %5138 = vst [vmem:[#allocation2 + $0x18] sm:$0xff] %v5106_v6  ;;  %5139 = vst [vmem:[#allocation2 + $0x20] sm:$0xff] %v5107_v57 }
 0x7d2   : > { %v5109_v22 = vpack.c.bf16 %v5053_v27, %v10795_v42  ;;  %v5110_v8 = vpack.c.bf16 %v5054_v16, %v10797_v60  ;;  %v5114_v27 = vpack.c.bf16 %v5066_v26, %v5058_v9  ;;  %v5115_v42 = vpack.c.bf16 %v5067_v51, %v5059_v49  ;;  %5140 = vst [vmem:[#allocation2 + $0x28] sm:$0xff] %v5108_v35 }
 0x7d3   : > { %v5117_v16 = vpack.c.bf16 %v5069_v13, %v5061_v50  ;;  %v5118_v60 = vpack.c.bf16 %v5070_v41, %v5062_v62  ;;  %v5119_v36 = vpack.c.bf16 %v5079_v24, %v5071_v0  ;;  %v5120_v56 = vpack.c.bf16 %v5080_v32, %v5072_v11  ;;  %5143 = vst [vmem:[#allocation2 + $0x40] sm:$0xff] %v5111_v5 }
 0x7d4   : > { %5141 = vst [vmem:[#allocation2 + $0x30] sm:$0xff] %v5109_v22  ;;  %5142 = vst [vmem:[#allocation2 + $0x38] sm:$0xff] %v5110_v8  ;;  %v5121_v25 = vpack.c.bf16 %v5081_v2, %v5073_v59  ;;  %v5122_v38 = vpack.c.bf16 %v5082_v10, %v5074_v48  ;;  %v5125_v1 = vpack.c.bf16 %v5085_v23, %v5077_v15 }
 0x7d5   : > { %5144 = vst [vmem:[#allocation2 + $0x48] sm:$0xff] %v5112_v45  ;;  %5145 = vst [vmem:[#allocation2 + $0x50] sm:$0xff] %v5113_v39  ;;  %v5126_v9 = vpack.c.bf16 %v5086_v19, %v5078_v40  ;;  %v5127_v49 = vpack.c.bf16 %v5095_v54, %v5087_v37  ;;  %v5128_v63 = vpack.c.bf16 %v5096_v44, %v5088_v31 }
 0x7d6   : > { %5146 = vst [vmem:[#allocation2 + $0x58] sm:$0xff] %v5114_v27  ;;  %5147 = vst [vmem:[#allocation2 + $0x60] sm:$0xff] %v5115_v42  ;;  %v5129_v50 = vpack.c.bf16 %v5097_v55, %v5089_v29  ;;  %v5130_v62 = vpack.c.bf16 %v5098_v53, %v5090_v30  ;;  %v5131_v52 = vpack.c.bf16 %v5099_v34, %v5091_v7 }
 0x7d7   : > { %5148 = vst [vmem:[#allocation2 + $0x68] sm:$0xff] %v5116_v17  ;;  %5149 = vst [vmem:[#allocation2 + $0x70] sm:$0xff] %v5117_v16  ;;  %v5132_v26 = vpack.c.bf16 %v5100_v4, %v5092_v58  ;;  %v5133_v51 = vpack.c.bf16 %v5101_v46, %v5093_v18  ;;  %v5134_v3 = vpack.c.bf16 %v5102_v43, %v5094_v28 }
 0x7d8   : > { %5150 = vst [vmem:[#allocation2 + $0x78] sm:$0xff] %v5118_v60  ;;  %5151 = vst [vmem:[#allocation2 + $0x80] sm:$0xff] %v5119_v36 }
 0x7d9   : > { %5152 = vst [vmem:[#allocation2 + $0x88] sm:$0xff] %v5120_v56  ;;  %5153 = vst [vmem:[#allocation2 + $0x90] sm:$0xff] %v5121_v25 }
 0x7da   : > { %5154 = vst [vmem:[#allocation2 + $0x98] sm:$0xff] %v5122_v38  ;;  %5157 = vst [vmem:[#allocation2 + $0xb0] sm:$0xff] %v5125_v1 }
 0x7db   : > { %5158 = vst [vmem:[#allocation2 + $0xb8] sm:$0xff] %v5126_v9  ;;  %5159 = vst [vmem:[#allocation2 + $0xc0] sm:$0xff] %v5127_v49 }
 0x7dc   : > { %5160 = vst [vmem:[#allocation2 + $0xc8] sm:$0xff] %v5128_v63  ;;  %5161 = vst [vmem:[#allocation2 + $0xd0] sm:$0xff] %v5129_v50 }
 0x7dd   : > { %5162 = vst [vmem:[#allocation2 + $0xd8] sm:$0xff] %v5130_v62  ;;  %5163 = vst [vmem:[#allocation2 + $0xe0] sm:$0xff] %v5131_v52 }
 0x7de   : > { %5164 = vst [vmem:[#allocation2 + $0xe8] sm:$0xff] %v5132_v26  ;;  %5165 = vst [vmem:[#allocation2 + $0xf0] sm:$0xff] %v5133_v51 }
 0x7df   : > { %5166 = vst [vmem:[#allocation2 + $0xf8] sm:$0xff] %v5134_v3 }
 0x7e0 PF: > { %v7334_v13 = vld [vmem:[%s8527_s26 + $0x40] sm:$0xff]   ;;  %v7338_v59 = vld [vmem:[%s8527_s26 + $0x48] sm:$0xff]   ;;  %v7342_v15 = vld [vmem:[%s8527_s26 + $0x50] sm:$0xff]   ;;  %s6713_s15 = sshll.u32 %s8081_s22, 7  ;;  %s6047_s7 = sshll.u32 %s8535_s28, 4  ;;  %s10335_s7 = int_to_ptr.vmem [resolvable:$true] %s6047_s7 }
 0x7e1   : > { %v7335_v41 = vld [vmem:[%s8527_s26 + $0xc0] sm:$0xff]   ;;  %6728 = vmatprep.subr.bf16.mxu0 %v7334_v13  ;;  %v7339_v48 = vld [vmem:[%s8527_s26 + $0xc8] sm:$0xff]   ;;  %v7343_v40 = vld [vmem:[%s8527_s26 + $0xd0] sm:$0xff]   ;;  %s10798_s11 = sld [smem:[#allocation101_spill]]  ;;  %s6035_s5 = scalar_lea.sflag [#allocation5], %s8524_s30 }
 0x7e2   : > { %v7336_v0 = vld [vmem:[%s8527_s26] sm:$0xff]   ;;  %6768 = vmatprep.subr.bf16.mxu1 %v7335_v41  ;;  %v7340_v12 = vld [vmem:[%s8527_s26 + $0x8] sm:$0xff]   ;;  %v7344_v24 = vld [vmem:[%s8527_s26 + $0x10] sm:$0xff]   ;;  %s7854_s17 = scalar_lea.vmem %s10335_s7, 1024  ;;  %p10799_p0 = scmp.ne.s32.totalorder %s10532_s25, 0 }
 0x7e3   : > { %v7337_v11 = vld [vmem:[%s8527_s26 + $0x80] sm:$0xff]   ;;  %6729 = vmatpush3.bf16.msra.mxu0 %v7336_v0  ;;  %v7341_v33 = vld [vmem:[%s8527_s26 + $0x88] sm:$0xff]   ;;  %v7345_v32 = vld [vmem:[%s8527_s26 + $0x90] sm:$0xff]   ;;  %p7855_p4 = scmp.ne.s32.totalorder %s10335_s7, %s7854_s17  ;;  %s7976_s22 = smov [#allocation27]  }
 0x7e4   : > { %6769 = vmatpush3.bf16.msra.mxu1 %v7337_v11  ;;  %6730 = vmatprep.subr.bf16.mxu0 %v7338_v59  ;;  %v7346_v2 = vld [vmem:[%s8527_s26 + $0x58] sm:$0xff]   ;;  %v7350_v23 = vld [vmem:[%s8527_s26 + $0x60] sm:$0xff]   ;;  %v7354_v29 = vld [vmem:[%s8527_s26 + $0x68] sm:$0xff]   ;;  %s7858_s0 = sshll.u32 %s7976_s22, 4  ;;  %s7859_s0 = int_to_ptr.vmem [resolvable:$false] %s7858_s0 }
 0x7e5   : > { %6770 = vmatprep.subr.bf16.mxu1 %v7339_v48  ;;  %v7347_v10 = vld [vmem:[%s8527_s26 + $0xd8] sm:$0xff]   ;;  %v7351_v19 = vld [vmem:[%s8527_s26 + $0xe0] sm:$0xff]   ;;  %v7355_v30 = vld [vmem:[%s8527_s26 + $0xe8] sm:$0xff]   ;;  %p7856_p2 = pnand %p7855_p4, %p10799_p0  ;;  %s7860_s10 = scalar_lea.vmem %s7859_s0, 2048 }
 0x7e6   : > { %v7348_v61 = vld [vmem:[%s8527_s26 + $0x18] sm:$0xff]   ;;  %v7352_v37 = vld [vmem:[%s8527_s26 + $0x20] sm:$0xff]   ;;  %v7356_v7 = vld [vmem:[%s8527_s26 + $0x28] sm:$0xff]   ;;  %p7861_p9 = scmp.lt.s32.totalorder %s10335_s7, %s7859_s0  ;;  %p7862_p3 = scmp.lt.s32.totalorder %s7860_s10, %s7854_s17 }
 0x7e7   : > { %6731 = vmatpush3.bf16.msra.mxu0 %v7340_v12  ;;  %v7349_v47 = vld [vmem:[%s8527_s26 + $0x98] sm:$0xff]   ;;  %v7353_v31 = vld [vmem:[%s8527_s26 + $0xa0] sm:$0xff]   ;;  %v7357_v58 = vld [vmem:[%s8527_s26 + $0xa8] sm:$0xff]   ;;  %s10333_s12 = scalar_lea.hbm %s10798_s11, %s6713_s15  ;;  %p7857_p7 = pneg %p7856_p2 }
 0x7e8   : > { %6771 = vmatpush3.bf16.msra.mxu1 %v7341_v33  ;;  %6732 = vmatprep.subr.bf16.mxu0 %v7342_v15  ;;  %v7358_v18 = vld [vmem:[%s8527_s26 + $0x70] sm:$0xff]   ;;  %v7362_v55 = vld [vmem:[%s8527_s26 + $0x78] sm:$0xff]   ;;  %v5168_v46 = vld [vmem:[#allocation2 + $0x8] sm:$0xff]  ;;  %p7863_p8 = por %p7862_p3, %p7861_p9 }
 0x7e9   : > { %6772 = vmatprep.subr.bf16.mxu1 %v7343_v40  ;;  %v7359_v28 = vld [vmem:[%s8527_s26 + $0xf0] sm:$0xff]   ;;  %v7363_v53 = vld [vmem:[%s8527_s26 + $0xf8] sm:$0xff]   ;;  %v5167_v20 = vld [vmem:[#allocation2] sm:$0xff]  ;;  %5750 = vmatprep.mubr.bf16.mxu0 %v5168_v46 }
 0x7ea   : > { %v7360_v54 = vld [vmem:[%s8527_s26 + $0x30] sm:$0xff]   ;;  %v7364_v34 = vld [vmem:[%s8527_s26 + $0x38] sm:$0xff]   ;;  %v7366_v57 = vld [vmem:[%s8527_s26 + $0x140] sm:$0xff]   ;;  %p7864_p1 = pnand %p7863_p8, %p7857_p7 }
 0x7eb   : > { %6733 = vmatpush3.bf16.msra.mxu0 %v7344_v24  ;;  %v7361_v44 = vld [vmem:[%s8527_s26 + $0xb0] sm:$0xff]   ;;  %v7365_v4 = vld [vmem:[%s8527_s26 + $0xb8] sm:$0xff]   ;;  %v7367_v35 = vld [vmem:[%s8527_s26 + $0x1c0] sm:$0xff]  }
 0x7ec   : > { %6773 = vmatpush3.bf16.msra.mxu1 %v7345_v32  ;;  %6734 = vmatprep.subr.bf16.mxu0 %v7346_v2  ;;  %v5170_v43 = vld [vmem:[#allocation2 + $0x18] sm:$0xff]  ;;  %v5169_v6 = vld [vmem:[#allocation2 + $0x10] sm:$0xff]  ;;  %v7368_v22 = vld [vmem:[%s8527_s26 + $0x100] sm:$0xff]  }
 0x7ed   : > { %6774 = vmatprep.subr.bf16.mxu1 %v7347_v10  ;;  %5815 = vmatprep.mubr.bf16.mxu1 %v5170_v43  ;;  %v7369_v8 = vld [vmem:[%s8527_s26 + $0x180] sm:$0xff]   ;;  %v7370_v5 = vld [vmem:[%s8527_s26 + $0x148] sm:$0xff]   ;;  %v5178_v17 = vld [vmem:[#allocation2 + $0x58] sm:$0xff] }
 0x7ee   : > { %v7371_v45 = vld [vmem:[%s8527_s26 + $0x1c8] sm:$0xff]   ;;  %v5175_v16 = vld [vmem:[#allocation2 + $0x40] sm:$0xff]  ;;  %v5177_v60 = vld [vmem:[#allocation2 + $0x50] sm:$0xff] }
 0x7ef   : > { %6735 = vmatpush3.bf16.msra.mxu0 %v7348_v61  ;;  %v7372_v39 = vld [vmem:[%s8527_s26 + $0x108] sm:$0xff]   ;;  %v7374_v36 = vld [vmem:[%s8527_s26 + $0x150] sm:$0xff]   ;;  %v7378_v21 = vld [vmem:[%s8527_s26 + $0x158] sm:$0xff]  }
 0x7f0   : > { %6775 = vmatpush3.bf16.msra.mxu1 %v7349_v47  ;;  %6736 = vmatprep.subr.bf16.mxu0 %v7350_v23  ;;  %v7373_v27 = vld [vmem:[%s8527_s26 + $0x188] sm:$0xff]   ;;  %v7375_v56 = vld [vmem:[%s8527_s26 + $0x1d0] sm:$0xff]   ;;  %v7379_v14 = vld [vmem:[%s8527_s26 + $0x1d8] sm:$0xff]  }
 0x7f1   : > { %6776 = vmatprep.subr.bf16.mxu1 %v7351_v19  ;;  %v5176_v42 = vld [vmem:[#allocation2 + $0x48] sm:$0xff]  ;;  %v7376_v25 = vld [vmem:[%s8527_s26 + $0x110] sm:$0xff]   ;;  %v7380_v1 = vld [vmem:[%s8527_s26 + $0x118] sm:$0xff]  }
 0x7f2   : > { %v7377_v38 = vld [vmem:[%s8527_s26 + $0x190] sm:$0xff]   ;;  %v7381_v9 = vld [vmem:[%s8527_s26 + $0x198] sm:$0xff]   ;;  %v5184_v49 = vld [vmem:[#allocation2 + $0x88] sm:$0xff] }
 0x7f3   : > { %6737 = vmatpush3.bf16.msra.mxu0 %v7352_v37  ;;  %v5186_v63 = vld [vmem:[#allocation2 + $0x98] sm:$0xff]  ;;  %v5183_v50 = vld [vmem:[#allocation2 + $0x80] sm:$0xff]  ;;  %v5185_v62 = vld [vmem:[#allocation2 + $0x90] sm:$0xff] }
 0x7f4   : > { %6777 = vmatpush3.bf16.msra.mxu1 %v7353_v31  ;;  %6738 = vmatprep.subr.bf16.mxu0 %v7354_v29  ;;  %v7382_v52 = vld [vmem:[%s8527_s26 + $0x160] sm:$0xff]   ;;  %v7386_v13 = vld [vmem:[%s8527_s26 + $0x168] sm:$0xff]   ;;  %v5194_v48 = vld [vmem:[#allocation2 + $0xd8] sm:$0xff] }
 0x7f5   : > { %6778 = vmatprep.subr.bf16.mxu1 %v7355_v30  ;;  %v7383_v26 = vld [vmem:[%s8527_s26 + $0x1e0] sm:$0xff]   ;;  %v7387_v41 = vld [vmem:[%s8527_s26 + $0x1e8] sm:$0xff]   ;;  %v5193_v33 = vld [vmem:[#allocation2 + $0xd0] sm:$0xff] }
 0x7f6   : > { %v7384_v51 = vld [vmem:[%s8527_s26 + $0x120] sm:$0xff]   ;;  %v7388_v0 = vld [vmem:[%s8527_s26 + $0x128] sm:$0xff]   ;;  %v7390_v15 = vld [vmem:[%s8527_s26 + $0x170] sm:$0xff]  }
 0x7f7   : > { %6739 = vmatpush3.bf16.msra.mxu0 %v7356_v7  ;;  %v7385_v3 = vld [vmem:[%s8527_s26 + $0x1a0] sm:$0xff]   ;;  %v7389_v11 = vld [vmem:[%s8527_s26 + $0x1a8] sm:$0xff]   ;;  %v7391_v40 = vld [vmem:[%s8527_s26 + $0x1f0] sm:$0xff]  }
 0x7f8   : > { %6779 = vmatpush3.bf16.msra.mxu1 %v7357_v58  ;;  %6740 = vmatprep.subr.bf16.mxu0 %v7358_v18  ;;  %v5192_v59 = vld [vmem:[#allocation2 + $0xc8] sm:$0xff]  ;;  %v5191_v12 = vld [vmem:[#allocation2 + $0xc0] sm:$0xff]  ;;  %v7392_v24 = vld [vmem:[%s8527_s26 + $0x130] sm:$0xff]  }
 0x7f9   : > { %6780 = vmatprep.subr.bf16.mxu1 %v7359_v28  ;;  %v7393_v32 = vld [vmem:[%s8527_s26 + $0x1b0] sm:$0xff]   ;;  %v7394_v2 = vld [vmem:[%s8527_s26 + $0x178] sm:$0xff]   ;;  %v5172_v23 = vld [vmem:[#allocation2 + $0x28] sm:$0xff] }
 0x7fa   : > { %v7395_v10 = vld [vmem:[%s8527_s26 + $0x1f8] sm:$0xff]   ;;  %v5171_v37 = vld [vmem:[#allocation2 + $0x20] sm:$0xff]  ;;  %v5173_v31 = vld [vmem:[#allocation2 + $0x30] sm:$0xff] }
 0x7fb   : > { %6741 = vmatpush3.bf16.msra.mxu0 %v7360_v54  ;;  %v7396_v61 = vld [vmem:[%s8527_s26 + $0x138] sm:$0xff]   ;;  %v5180_v29 = vld [vmem:[#allocation2 + $0x68] sm:$0xff]  ;;  %v5179_v7 = vld [vmem:[#allocation2 + $0x60] sm:$0xff] }
 0x7fc   : > { %6781 = vmatpush3.bf16.msra.mxu1 %v7361_v44  ;;  %6742 = vmatprep.subr.bf16.mxu0 %v7362_v55  ;;  %v7397_v47 = vld [vmem:[%s8527_s26 + $0x1b8] sm:$0xff]   ;;  %v5181_v58 = vld [vmem:[#allocation2 + $0x70] sm:$0xff]  ;;  %v5188_v18 = vld [vmem:[#allocation2 + $0xa8] sm:$0xff] }
 0x7fd   : > { %6782 = vmatprep.subr.bf16.mxu1 %v7363_v53  ;;  %v5174_v19 = vld [vmem:[#allocation2 + $0x38] sm:$0xff]  ;;  %v5187_v54 = vld [vmem:[#allocation2 + $0xa0] sm:$0xff]  ;;  %v5189_v44 = vld [vmem:[#allocation2 + $0xb0] sm:$0xff] }
 0x7fe   : > { %v5182_v30 = vld [vmem:[#allocation2 + $0x78] sm:$0xff]  ;;  %v5196_v55 = vld [vmem:[#allocation2 + $0xe8] sm:$0xff] }
 0x7ff   : > { %6743 = vmatpush3.bf16.msra.mxu0 %v7364_v34  ;;  %v5190_v28 = vld [vmem:[#allocation2 + $0xb8] sm:$0xff]  ;;  %v5195_v34 = vld [vmem:[#allocation2 + $0xe0] sm:$0xff] }
 0x800   : > { %6783 = vmatpush3.bf16.msra.mxu1 %v7365_v4  ;;  %6808 = vmatprep.subr.bf16.mxu0 %v7366_v57  ;;  %v5198_v53 = vld [vmem:[#allocation2 + $0xf8] sm:$0xff]  ;;  %v5197_v4 = vld [vmem:[#allocation2 + $0xf0] sm:$0xff] }
 0x801   : > { %6848 = vmatprep.subr.bf16.mxu1 %v7367_v35 }
 0x802   : > { %5751 = vmatmul.mubr.bf16.vlgmr.msra.gmra.mrb[0].mxu0 %v5167_v20  ;;  %v6647_v20 = vld [vmem:[%s665_s29] ss:$0 sm:$0xff] }
 0x803   : > { %5816 = vmatmul.mubr.bf16.vlgmr.msra.gmra.mrb[0].mxu1 %v5169_v6  ;;  %6809 = vmatpush3.bf16.msra.mxu0 %v7368_v22 }
 0x804   : > { %6849 = vmatpush3.bf16.msra.mxu1 %v7369_v8  ;;  %6810 = vmatprep.subr.bf16.mxu0 %v7370_v5 }
 0x805   : > { %6850 = vmatprep.subr.bf16.mxu1 %v7371_v45  ;;  %5758 = vmatprep.mubr.bf16.mxu0 %v5176_v42 }
 0x806   : > { %5823 = vmatprep.mubr.bf16.mxu1 %v5178_v17 }
 0x807   : > { %6811 = vmatpush3.bf16.msra.mxu0 %v7372_v39 }
 0x808   : > { %6851 = vmatpush3.bf16.msra.mxu1 %v7373_v27  ;;  %6812 = vmatprep.subr.bf16.mxu0 %v7374_v36 }
 0x809   : > { %6852 = vmatprep.subr.bf16.mxu1 %v7375_v56 }
 0x80a   : > { %5759 = vmatmul.mubr.bf16.gmra.mrb[4].mxu0 %v5175_v16 }
 0x80b   : > { %5824 = vmatmul.mubr.bf16.gmra.mrb[4].mxu1 %v5177_v60  ;;  %6813 = vmatpush3.bf16.msra.mxu0 %v7376_v25 }
 0x80c   : > { %6853 = vmatpush3.bf16.msra.mxu1 %v7377_v38  ;;  %6814 = vmatprep.subr.bf16.mxu0 %v7378_v21 }
 0x80d   : > { %6854 = vmatprep.subr.bf16.mxu1 %v7379_v14  ;;  %5766 = vmatprep.mubr.bf16.mxu0 %v5184_v49 }
 0x80e   : > { %5831 = vmatprep.mubr.bf16.mxu1 %v5186_v63 }
 0x80f   : > { %6815 = vmatpush3.bf16.msra.mxu0 %v7380_v1 }
 0x810   : > { %6855 = vmatpush3.bf16.msra.mxu1 %v7381_v9  ;;  %6816 = vmatprep.subr.bf16.mxu0 %v7382_v52 }
 0x811   : > { %6856 = vmatprep.subr.bf16.mxu1 %v7383_v26 }
 0x812   : > { %5767 = vmatmul.mubr.bf16.gmra.mrb[8].mxu0 %v5183_v50 }
 0x813   : > { %5832 = vmatmul.mubr.bf16.gmra.mrb[8].mxu1 %v5185_v62  ;;  %6817 = vmatpush3.bf16.msra.mxu0 %v7384_v51 }
 0x814   : > { %6857 = vmatpush3.bf16.msra.mxu1 %v7385_v3  ;;  %6818 = vmatprep.subr.bf16.mxu0 %v7386_v13 }
 0x815   : > { %6858 = vmatprep.subr.bf16.mxu1 %v7387_v41  ;;  %5774 = vmatprep.mubr.bf16.mxu0 %v5192_v59 }
 0x816   : > { %5839 = vmatprep.mubr.bf16.mxu1 %v5194_v48 }
 0x817   : > { %6819 = vmatpush3.bf16.msra.mxu0 %v7388_v0 }
 0x818   : > { %6859 = vmatpush3.bf16.msra.mxu1 %v7389_v11  ;;  %6820 = vmatprep.subr.bf16.mxu0 %v7390_v15 }
 0x819   : > { %6860 = vmatprep.subr.bf16.mxu1 %v7391_v40 }
 0x81a   : > { %5775 = vmatmul.mubr.bf16.gmra.mrb[12].mxu0 %v5191_v12 }
 0x81b   : > { %5840 = vmatmul.mubr.bf16.gmra.mrb[12].mxu1 %v5193_v33  ;;  %6821 = vmatpush3.bf16.msra.mxu0 %v7392_v24 }
 0x81c   : > { %6861 = vmatpush3.bf16.msra.mxu1 %v7393_v32  ;;  %6822 = vmatprep.subr.bf16.mxu0 %v7394_v2 }
 0x81d   : > { %6862 = vmatprep.subr.bf16.mxu1 %v7395_v10  ;;  %5880 = vmatprep.mubr.bf16.mxu0 %v5172_v23 }
 0x81e   : > { %5945 = vmatprep.mubr.bf16.mxu1 %v5174_v19 }
 0x81f   : > { %6823 = vmatpush3.bf16.msra.mxu0 %v7396_v61 }
 0x820   : > { %6863 = vmatpush3.bf16.msra.mxu1 %v7397_v47 }
 0x822   : > { %5881 = vmatmul.mubr.bf16.vlgmr.msra.gmra.mrb[16].mxu0 %v5171_v37 }
 0x823   : > { %5946 = vmatmul.mubr.bf16.vlgmr.msra.gmra.mrb[16].mxu1 %v5173_v31  ;;  %5888 = vmatprep.mubr.bf16.mxu0 %v5180_v29 }
 0x824   : > { %5953 = vmatprep.mubr.bf16.mxu1 %v5182_v30 }
 0x82a   : > { %5889 = vmatmul.mubr.bf16.gmra.mrb[20].mxu0 %v5179_v7 }
 0x82b   : > { %5954 = vmatmul.mubr.bf16.gmra.mrb[20].mxu1 %v5181_v58  ;;  %5896 = vmatprep.mubr.bf16.mxu0 %v5188_v18 }
 0x82c   : > { %5961 = vmatprep.mubr.bf16.mxu1 %v5190_v28 }
 0x832   : > { %5897 = vmatmul.mubr.bf16.gmra.mrb[24].mxu0 %v5187_v54 }
 0x833   : > { %5962 = vmatmul.mubr.bf16.gmra.mrb[24].mxu1 %v5189_v44  ;;  %5904 = vmatprep.mubr.bf16.mxu0 %v5196_v55 }
 0x834   : > { %5969 = vmatprep.mubr.bf16.mxu1 %v5198_v53 }
 0x83a   : > { %5905 = vmatmul.mubr.bf16.gmra.mrb[28].mxu0 %v5195_v34 }
 0x83b   : > { %5970 = vmatmul.mubr.bf16.gmra.mrb[28].mxu1 %v5197_v4 }
 0x8d5   : > { %v6744_v46 = vpop.f32.mrb[0].mxu0 }
 0x8d6   : > { %v6784_v43 = vpop.f32.mrb[0].mxu1  ;;  %v6745_v6 = vpop.f32.mrb[1].mxu0 }
 0x8d7   : > { %v6746_v57 = vadd.f32 %v6745_v6, %v6744_v46  ;;  %v6785_v35 = vpop.f32.mrb[1].mxu1  ;;  %v6747_v22 = vpop.f32.mrb[2].mxu0 }
 0x8d8   : > { %v6786_v8 = vadd.f32 %v6785_v35, %v6784_v43  ;;  %v6787_v5 = vpop.f32.mrb[2].mxu1  ;;  %v6748_v45 = vpop.f32.mrb[3].mxu0 }
 0x8d9   : > { %v5753_v39 = vadd.f32 %v6746_v57, %v6647_v20  ;;  %v6749_v27 = vadd.f32 %v6748_v45, %v6747_v22  ;;  %v6788_v42 = vpop.f32.mrb[3].mxu1 }
 0x8da   : > { %v6789_v17 = vadd.f32 %v6788_v42, %v6787_v5 }
 0x8db   : > { %v5818_v16 = vadd.f32 %v6786_v8, %v5753_v39  ;;  %v5756_v60 = vadd.f32 %v6749_v27, %v6647_v20 }
 0x8dd   : > { %v10301_v36 = vadd.f32 %v6789_v17, %v5756_v60  ;;  %v6750_v56 = vpop.f32.mrb[4].mxu0 }
 0x8de   : > { %v6790_v25 = vpop.f32.mrb[4].mxu1  ;;  %v6751_v38 = vpop.f32.mrb[5].mxu0 }
 0x8df   : > { %v6791_v21 = vpop.f32.mrb[5].mxu1  ;;  %v6752_v14 = vadd.f32 %v6751_v38, %v6750_v56  ;;  %v6753_v9 = vpop.f32.mrb[6].mxu0 }
 0x8e0   : > { %v6792_v1 = vadd.f32 %v6791_v21, %v6790_v25  ;;  %v6793_v49 = vpop.f32.mrb[6].mxu1  ;;  %v6754_v63 = vpop.f32.mrb[7].mxu0 }
 0x8e1   : > { %v6794_v50 = vpop.f32.mrb[7].mxu1  ;;  %v5761_v62 = vadd.f32 %v6752_v14, %v6647_v20  ;;  %v6755_v52 = vadd.f32 %v6754_v63, %v6753_v9 }
 0x8e2   : > { %v6795_v26 = vadd.f32 %v6794_v50, %v6793_v49 }
 0x8e3   : > { %v10303_v51 = vadd.f32 %v6792_v1, %v5761_v62  ;;  %v5764_v3 = vadd.f32 %v6755_v52, %v6647_v20 }
 0x8e5   : > { %v10305_v13 = vadd.f32 %v6795_v26, %v5764_v3  ;;  %v6756_v41 = vpop.f32.mrb[8].mxu0 }
 0x8e6   : > { %v6796_v0 = vpop.f32.mrb[8].mxu1  ;;  %v6757_v11 = vpop.f32.mrb[9].mxu0 }
 0x8e7   : > { %v6797_v59 = vpop.f32.mrb[9].mxu1  ;;  %v6758_v48 = vadd.f32 %v6757_v11, %v6756_v41  ;;  %v6759_v33 = vpop.f32.mrb[10].mxu0 }
 0x8e8   : > { %v6798_v12 = vadd.f32 %v6797_v59, %v6796_v0  ;;  %v6799_v15 = vpop.f32.mrb[10].mxu1  ;;  %v6760_v40 = vpop.f32.mrb[11].mxu0 }
 0x8e9   : > { %v6800_v24 = vpop.f32.mrb[11].mxu1  ;;  %v5769_v32 = vadd.f32 %v6758_v48, %v6647_v20  ;;  %v6761_v2 = vadd.f32 %v6760_v40, %v6759_v33 }
 0x8ea   : > { %v6801_v10 = vadd.f32 %v6800_v24, %v6799_v15 }
 0x8eb   : > { %v10307_v61 = vadd.f32 %v6798_v12, %v5769_v32  ;;  %v5772_v47 = vadd.f32 %v6761_v2, %v6647_v20 }
 0x8ed   : > { %v10309_v23 = vadd.f32 %v6801_v10, %v5772_v47  ;;  %v6762_v19 = vpop.f32.mrb[12].mxu0 }
 0x8ee   : > { %v6802_v37 = vpop.f32.mrb[12].mxu1  ;;  %v6763_v31 = vpop.f32.mrb[13].mxu0 }
 0x8ef   : > { %v6764_v29 = vadd.f32 %v6763_v31, %v6762_v19  ;;  %v6803_v30 = vpop.f32.mrb[13].mxu1  ;;  %v6765_v7 = vpop.f32.mrb[14].mxu0 }
 0x8f0   : > { %v6804_v58 = vadd.f32 %v6803_v30, %v6802_v37  ;;  %v6805_v18 = vpop.f32.mrb[14].mxu1  ;;  %v6766_v28 = vpop.f32.mrb[15].mxu0 }
 0x8f1   : > { %v5777_v54 = vadd.f32 %v6764_v29, %v6647_v20  ;;  %v6767_v44 = vadd.f32 %v6766_v28, %v6765_v7  ;;  %v6806_v55 = vpop.f32.mrb[15].mxu1 }
 0x8f2   : > { %v6807_v53 = vadd.f32 %v6806_v55, %v6805_v18 }
 0x8f3   : > { %v10311_v34 = vadd.f32 %v6804_v58, %v5777_v54  ;;  %v5780_v4 = vadd.f32 %v6767_v44, %v6647_v20 }
 0x8f5   : > { %v10313_v46 = vadd.f32 %v6807_v53, %v5780_v4  ;;  %v6824_v43 = vpop.f32.mrb[16].mxu0 }
 0x8f6   : > { %v6864_v6 = vpop.f32.mrb[16].mxu1  ;;  %v6825_v57 = vpop.f32.mrb[17].mxu0 }
 0x8f7   : > { %v6826_v35 = vadd.f32 %v6825_v57, %v6824_v43  ;;  %v6865_v22 = vpop.f32.mrb[17].mxu1  ;;  %v6827_v8 = vpop.f32.mrb[18].mxu0 }
 0x8f8   : > { %v6866_v5 = vadd.f32 %v6865_v22, %v6864_v6  ;;  %v6867_v45 = vpop.f32.mrb[18].mxu1  ;;  %v6828_v39 = vpop.f32.mrb[19].mxu0 }
 0x8f9   : > { %v5883_v27 = vadd.f32 %v6826_v35, %v5818_v16  ;;  %v6829_v42 = vadd.f32 %v6828_v39, %v6827_v8  ;;  %v6868_v17 = vpop.f32.mrb[19].mxu1 }
 0x8fa   : > { %v6869_v60 = vadd.f32 %v6868_v17, %v6867_v45 }
 0x8fb   : > { %v5948_v56 = vadd.f32 %v6866_v5, %v5883_v27  ;;  %v5886_v25 = vadd.f32 %v6829_v42, %v10301_v36 }
 0x8fd   : > { %v5978_v38 = vmax.f32 %v5948_v56, -30.0  ;;  %v5951_v20 = vadd.f32 %v6869_v60, %v5886_v25  ;;  %v6830_v21 = vpop.f32.mrb[20].mxu0 }
 0x8fe   : > { %v6870_v14 = vpop.f32.mrb[20].mxu1  ;;  %v6831_v1 = vpop.f32.mrb[21].mxu0 }
 0x8ff   : > { %v5986_v9 = vsub.f32 0.0, %v5978_v38  ;;  %v5979_v49 = vmax.f32 %v5951_v20, -30.0  ;;  %v6832_v63 = vadd.f32 %v6831_v1, %v6830_v21  ;;  %v6871_v50 = vpop.f32.mrb[21].mxu1  ;;  %v6833_v62 = vpop.f32.mrb[22].mxu0 }
 0x900   : > { %v6872_v52 = vadd.f32 %v6871_v50, %v6870_v14  ;;  %v6873_v26 = vpop.f32.mrb[22].mxu1  ;;  %v6834_v3 = vpop.f32.mrb[23].mxu0 }
 0x901   : > { %v5994_v16 = vmul.f32 1.442695, %v5986_v9  ;;  %v5987_v41 = vsub.f32 0.0, %v5979_v49  ;;  %v5891_v0 = vadd.f32 %v6832_v63, %v10303_v51  ;;  %v6835_v11 = vadd.f32 %v6834_v3, %v6833_v62  ;;  %v6874_v59 = vpop.f32.mrb[23].mxu1 }
 0x902   : > { %v6875_v36 = vadd.f32 %v6874_v59, %v6873_v26 }
 0x903   : > { %7398 = vpow2.f32 %v5994_v16  ;;  %v5996_v48 = vmul.f32 1.442695, %v5987_v41  ;;  %v5956_v12 = vadd.f32 %v6872_v52, %v5891_v0  ;;  %v5894_v33 = vadd.f32 %v6835_v11, %v10305_v13 }
 0x905   : > { %7400 = vpow2.f32 %v5996_v48  ;;  %v5980_v15 = vmax.f32 %v5956_v12, -30.0  ;;  %v5959_v40 = vadd.f32 %v6875_v36, %v5894_v33  ;;  %v6836_v24 = vpop.f32.mrb[24].mxu0 }
 0x906   : > { %v6876_v32 = vpop.f32.mrb[24].mxu1  ;;  %v6837_v2 = vpop.f32.mrb[25].mxu0 }
 0x907   : > { %v5988_v10 = vsub.f32 0.0, %v5980_v15  ;;  %v5981_v47 = vmax.f32 %v5959_v40, -30.0  ;;  %v6838_v19 = vadd.f32 %v6837_v2, %v6836_v24  ;;  %v6877_v37 = vpop.f32.mrb[25].mxu1  ;;  %v6839_v31 = vpop.f32.mrb[26].mxu0 }
 0x908   : > { %v6878_v51 = vadd.f32 %v6877_v37, %v6876_v32  ;;  %v6879_v29 = vpop.f32.mrb[26].mxu1  ;;  %v6840_v30 = vpop.f32.mrb[27].mxu0 }
 0x909   : > { %v5998_v7 = vmul.f32 1.442695, %v5988_v10  ;;  %v5989_v58 = vsub.f32 0.0, %v5981_v47  ;;  %v5899_v18 = vadd.f32 %v6838_v19, %v10307_v61  ;;  %v6841_v28 = vadd.f32 %v6840_v30, %v6839_v31  ;;  %v6880_v13 = vpop.f32.mrb[27].mxu1 }
 0x90a   : > { %v6881_v54 = vadd.f32 %v6880_v13, %v6879_v29 }
 0x90b   : > { %7402 = vpow2.f32 %v5998_v7  ;;  %v6000_v44 = vmul.f32 1.442695, %v5989_v58  ;;  %v5964_v55 = vadd.f32 %v6878_v51, %v5899_v18  ;;  %v5902_v53 = vadd.f32 %v6841_v28, %v10309_v23 }
 0x90d   : > { %v7399_v4 = vpop.eup %7398  ;;  %7404 = vpow2.f32 %v6000_v44  ;;  %v5982_v43 = vmax.f32 %v5964_v55, -30.0  ;;  %v5967_v6 = vadd.f32 %v6881_v54, %v5902_v53  ;;  %v6842_v57 = vpop.f32.mrb[28].mxu0 }
 0x90e   : > { %v6010_v35 = vadd.f32 1.0, %v7399_v4  ;;  %v6882_v22 = vpop.f32.mrb[28].mxu1  ;;  %v6843_v8 = vpop.f32.mrb[29].mxu0 }
 0x90f   : > { %v7401_v5 = vpop.eup %7400  ;;  %v5990_v45 = vsub.f32 0.0, %v5982_v43  ;;  %v5983_v39 = vmax.f32 %v5967_v6, -30.0  ;;  %v6844_v61 = vadd.f32 %v6843_v8, %v6842_v57  ;;  %v6883_v27 = vpop.f32.mrb[29].mxu1 }
 0x910   : > { %v6845_v42 = vpop.f32.mrb[30].mxu0  ;;  %7406 = vrcp.f32 %v6010_v35  ;;  %v6011_v17 = vadd.f32 1.0, %v7401_v5  ;;  %v6884_v60 = vadd.f32 %v6883_v27, %v6882_v22  ;;  %v6885_v56 = vpop.f32.mrb[30].mxu1 }
 0x911   : > { %v6846_v25 = vpop.f32.mrb[31].mxu0  ;;  %v6002_v23 = vmul.f32 1.442695, %v5990_v45  ;;  %v5991_v38 = vsub.f32 0.0, %v5983_v39  ;;  %v5907_v20 = vadd.f32 %v6844_v61, %v10311_v34  ;;  %v6886_v14 = vpop.f32.mrb[31].mxu1 }
 0x912   : > { %v6847_v21 = vadd.f32 %v6846_v25, %v6845_v42  ;;  %7408 = vrcp.f32 %v6011_v17  ;;  %v6887_v1 = vadd.f32 %v6886_v14, %v6885_v56 }
 0x913   : > { %7410 = vpow2.f32 %v6002_v23  ;;  %v6004_v9 = vmul.f32 1.442695, %v5991_v38  ;;  %v5972_v49 = vadd.f32 %v6884_v60, %v5907_v20 }
 0x914   : > { %v5910_v63 = vadd.f32 %v6847_v21, %v10313_v46 }
 0x915   : > { %v7403_v50 = vpop.eup %7402  ;;  %7412 = vpow2.f32 %v6004_v9  ;;  %v5984_v62 = vmax.f32 %v5972_v49, -30.0 }
 0x916   : > { %v5975_v52 = vadd.f32 %v6887_v1, %v5910_v63  ;;  %v6012_v26 = vadd.f32 1.0, %v7403_v50 }
 0x917   : > { %v7405_v3 = vpop.eup %7404  ;;  %v5992_v16 = vsub.f32 0.0, %v5984_v62 }
 0x918   : > { %v5985_v41 = vmax.f32 %v5975_v52, -30.0  ;;  %7414 = vrcp.f32 %v6012_v26  ;;  %v6013_v34 = vadd.f32 1.0, %v7405_v3 }
 0x919   : > { %v6006_v0 = vmul.f32 1.442695, %v5992_v16 }
 0x91a   : > { %v5993_v11 = vsub.f32 0.0, %v5985_v41  ;;  %v7407_v59 = vpop.eup %7406  ;;  %7416 = vrcp.f32 %v6013_v34 }
 0x91b   : > { %6026 = vst [vmem:[%s8535_s28] sm:$0xff] %v7407_v59  ;;  %7418 = vpow2.f32 %v6006_v0 }
 0x91c   : > { %v6008_v46 = vmul.f32 1.442695, %v5993_v11  ;;  %v7409_v36 = vpop.eup %7408 }
 0x91d   : > { %v7411_v48 = vpop.eup %7410  ;;  %6027 = vst [vmem:[%s8535_s28 + $0x8] sm:$0xff] %v7409_v36 }
 0x91e   : > { %7420 = vpow2.f32 %v6008_v46  ;;  %v6014_v12 = vadd.f32 1.0, %v7411_v48 }
 0x91f   : > { %v7413_v33 = vpop.eup %7412 }
 0x920   : > { %7422 = vrcp.f32 %v6014_v12  ;;  %v6015_v15 = vadd.f32 1.0, %v7413_v33 }
 0x922   : > { %v7415_v40 = vpop.eup %7414  ;;  %7424 = vrcp.f32 %v6015_v15 }
 0x923   : > { %6028 = vst [vmem:[%s8535_s28 + $0x10] sm:$0xff] %v7415_v40 }
 0x924   : > { %v7417_v24 = vpop.eup %7416 }
 0x925   : > { %v7419_v32 = vpop.eup %7418  ;;  %6029 = vst [vmem:[%s8535_s28 + $0x18] sm:$0xff] %v7417_v24 }
 0x926   : > { %v6016_v2 = vadd.f32 1.0, %v7419_v32 }
 0x928   : > { %v7421_v10 = vpop.eup %7420  ;;  %7426 = vrcp.f32 %v6016_v2 }
 0x929   : > { %v6017_v47 = vadd.f32 1.0, %v7421_v10 }
 0x92a   : > { %v7423_v19 = vpop.eup %7422 }
 0x92b   : > { %7428 = vrcp.f32 %v6017_v47  ;;  %6030 = vst [vmem:[%s8535_s28 + $0x20] sm:$0xff] %v7423_v19 }
 0x92c   : > { %v7425_v37 = vpop.eup %7424 }
 0x92d   : > { %6031 = vst [vmem:[%s8535_s28 + $0x28] sm:$0xff] %v7425_v37 }
 0x932   : > { %v7427_v31 = vpop.eup %7426 }
 0x933   : > { %6032 = vst [vmem:[%s8535_s28 + $0x30] sm:$0xff] %v7427_v31 }
 0x935   : > { %v7429_v51 = vpop.eup %7428 }
 0x936   : > { %6033 = vst [vmem:[%s8535_s28 + $0x38] sm:$0xff] %v7429_v51 }
 0x937   : > { %7867 = shalt.err (!%p7864_p1)
}
 0x938   : > { %s7868_s2 = scalar_lea.hbm %s10333_s12, 1024  ;;  %s7872_s1 = scalar_lea.hbm %s10798_s11, 7168 }
 0x939   : > { %p7869_p13 = scmp.ne.s32.totalorder %s10333_s12, %s7868_s2  ;;  %p7873_p11 = scmp.lt.u32.totalorder %s10333_s12, %s10798_s11 }
 0x93a   : > { %p7874_p5 = scmp.lt.u32.totalorder %s7872_s1, %s7868_s2  ;;  %p7876_p4 = scmp.lt.u32.totalorder %s7868_s2, %s10333_s12 }
 0x93b   : > { %p7870_p6 = pnand %p7869_p13, %p10799_p0 }
 0x93c   : > { %p7875_p10 = por %p7874_p5, %p7873_p11 }
 0x93d   : > { %p7871_p12 = pneg %p7870_p6 }
 0x93e   : > { %p7877_p2 = por %p7876_p4, %p7875_p10 }
 0x940   : > { %p7878_p7 = pnand %p7877_p2, %p7871_p12 }
 0x942   : > { %7881 = shalt.err (!%p7878_p7)
}
 0x943   : > { %s7977_s29 = smov 128   ;;  %s7978_s28 = smov 896  }
 0x944   : > { %s7979_s15 = smov 8  }
 0x945   : > { %7032 = dma.vmem_to_hbm [thread:$0]  (%p10799_p0), %s10335_s7, 1024, %s10333_s12, %s6035_s5, %s7977_s29, %s7978_s28, %s7979_s15  }
 0x946 PF: > { %p7112_p9 = scmp.ge.s32.totalorder %s7948_s21, 2  ;;  %s6062_s13 = sand.u32 1, %s7936_s18  }
 0x947   : > { %p10800_p3 = scmp.ne.s32.totalorder %s10533_s27, 0  ;;  %s6063_s16 = scalar_lea.sflag [#allocation5], %s6062_s13 }
 0x949   : > { %p7082_p8 = pnand %p7112_p9, %p10800_p3 }
 0x94b   : > { %7931 = dma.done.wait (!%p7082_p8), %s6063_s16, 1024  }
 0x94c   : > { %7933 = vsyncadd (!%p7082_p8), %s6063_s16, 4294966272  ;;  %s10801_s21 = sld [smem:[#allocation38_spill]]  ;;  %s10802_s17 = sld [smem:[#allocation39_spill]] }
 0x94d   : > { %s10803_s18 = smov %s7940_s19  ;;  %s10804_s19 = smov %s7944_s20 }
 0x952   : > { %p35_p1 = scmp.ge.s32.totalorder %s10801_s21, 9   ;;  %s10805_s20 = smov %s10802_s17 }
 0x954   :  { %37 = sbr.rel (!%p35_p1) target bundleno = 29 (0x1d), region = 193 }
 0x95b   :  { %6068 = vsyncpa [#allocation4], 1 }
 0x95c   :  { %6070 = vsyncpa [#allocation4 + $0x1], 1 }
 0x95d   :  { %6071 = vsyncpa [#allocation7], 1 }
 0x95e   :  { %6072 = vsyncpa [#allocation10], 1 }
 0x95f   :  { %6073 = vsyncpa [#allocation13], 1 }
 0x960   :  { %6074 = vsyncpa [#allocation16], 1 }
 0x961   :  { %6075 = vsyncpa [#allocation19], 1 }
 0x962   :  { %6076 = vsyncpa [#allocation22], 1 }
 0x963   :  { %6077 = vsyncpa [#allocation25], 1 }
 0x964   :  { %6079 = vsyncpa [#allocation25 + $0x1], 1 }
 0x965   :  { %6080 = vsyncpa [#allocation5], 1 }
 0x966   :  { %6082 = vsyncpa [#allocation5 + $0x1], 1 }

</bundles_post_ra>
